<compile_context>
chip_gen: v7x
topology: tpu7x:2x2x1
jax: 0.10.0
libtpu: 0.0.40
codegen_flags: <defaults>
</compile_context>

<pallas_src>
from functools import partial

import jax
import jax.numpy as jnp
from jax.experimental import pallas as pl
from jax.experimental.pallas import tpu as pltpu

MAX_NODES = 9
NODE_CLASSES = 4
EDGE_CLASSES = 4
LATENT = 128
BN_EPS = 1e-5

N_ADJ = MAX_NODES * MAX_NODES                       # 81
N_NODE = MAX_NODES * NODE_CLASSES                   # 36
N_EDGE = MAX_NODES * MAX_NODES * EDGE_CLASSES       # 324
HEADS_DIM = N_ADJ + N_NODE + N_EDGE                 # 441
HEADS_PAD = 512                                     # lane-dense padded head width

# rows of the packed small-vector blob (16, 512)
R_W1, R_B1, R_T1 = 0, 1, 2          # GCN1: folded weight / folded bias / BN offset  (32)
R_B2, R_T2 = 3, 4                   # GCN2: folded bias / BN offset                  (64)
R_B3 = 5                            # lin_1 bias                                    (128)
R_WG, R_BG = 6, 7                   # gated-pool weight (128) / bias (1)
R_BMS = 8                           # fused [mean|std] bias                         (256)
R_DB1, R_DB2, R_DB3 = 9, 10, 11     # decoder folded biases                 (128/256/512)
R_BH = 12                           # fused head bias (sym-folded, padded)          (512)
VEC_ROWS, VEC_COLS = 16, 512


# ----------------------------------------------------------------------------- kernel
def graphvae_kernel(
    a_ref,      # (1, N, N)   normalized adjacency (self loops included), per step
    x2_ref,     # (1, N, 2)   [atomic number | 1], per step
    pool_ref,   # (1, B, N)   one-hot graph membership (scatter-sum as matmul)
    eps_ref,    # (1, B, 128) reparameterization noise, per step
    w2_ref,     # (32, 64)    GCN2 linear, BN2 folded            (f32, resident)
    w3_ref,     # (64, 128)   lin_1                              (bf16, resident)
    wms_ref,    # (128, 256)  fused [out_mean | out_std]         (bf16, resident)
    dw1_ref,    # (128, 128)  decoder lin1, BN folded            (bf16, resident)
    dw2_ref,    # (128, 256)  decoder lin2, BN folded            (bf16, resident)
    dw3_ref,    # (256, 512)  decoder lin3, BN folded            (bf16, resident)
    wh_ref,     # (512, 512)  fused [adj|node|edge] head, sym-folded, padded (bf16)
    vec_ref,    # (16, 512)   packed small vectors (see R_* rows, resident)
    ms_ref,     # (1, B, 256) out: [loc | log_std]
    heads_ref,  # (1, B, 512) out: [adj(81) | node(36) | edge(324) | zeros]
):
    f32 = jnp.float32
    bf16 = jnp.bfloat16

    def row(r, n):                      # (1, n) static slice of the packed blob
        return vec_ref[r:r + 1, 0:n]

    a = a_ref[0]                        # (N, N)

    # ---- GCN layer 1: A @ (x0*w1 + b1) == (A@x0)*w1 + rowsum(A)*b1, BN1 folded, relu
    t = jnp.dot(a, x2_ref[0], preferred_element_type=f32)               # (N, 2)
    h = t[:, 0:1] * row(R_W1, 32) + t[:, 1:2] * row(R_B1, 32) + row(R_T1, 32)
    h = jnp.maximum(h, 0.0)
    # TODO(synk): F.dropout(p=0.5) is identity in eval mode; training-mode dropout not implemented.

    # ---- GCN layer 2: Linear(32,64) (BN2 folded) then aggregation, relu
    h = jnp.dot(h, w2_ref[...], preferred_element_type=f32) + row(R_B2, 64)
    h = jnp.dot(a, h, preferred_element_type=f32) + row(R_T2, 64)
    h = jnp.maximum(h, 0.0)

    # ---- lin_1 (64 -> 128) + relu                       (bf16 weights, f32 acc)
    h = jnp.dot(h.astype(bf16), w3_ref[...], preferred_element_type=f32) + row(R_B3, 128)
    h = jnp.maximum(h, 0.0)                                              # (N, 128)

    # ---- gated pooling (linear gate, as in the module) + fused mean/std heads
    attn = jnp.sum(h * row(R_WG, 128), axis=-1, keepdims=True) + row(R_BG, 1)
    pooled = jnp.dot(pool_ref[0], h * attn, preferred_element_type=f32)  # (B, 128)
    ms = jnp.dot(pooled.astype(bf16), wms_ref[...],
                 preferred_element_type=f32) + row(R_BMS, 256)
    ms_ref[0] = ms                                                       # [loc | log_std]

    # ---- reparameterized sample: z = loc + exp(log_std) * eps
    loc = ms[:, 0:LATENT]
    log_std = ms[:, LATENT:2 * LATENT]
    z = loc + jnp.exp(log_std) * eps_ref[0]

    # ---- decoder MLP (BN folded into weights; bf16 MXU operands, f32 accumulation)
    d = jnp.dot(z.astype(bf16), dw1_ref[...], preferred_element_type=f32) + row(R_DB1, 128)
    d = jnp.maximum(d, 0.0)
    d = jnp.dot(d.astype(bf16), dw2_ref[...], preferred_element_type=f32) + row(R_DB2, 256)
    d = jnp.maximum(d, 0.0)
    d = jnp.dot(d.astype(bf16), dw3_ref[...], preferred_element_type=f32) + row(R_DB3, 512)
    d = jnp.maximum(d, 0.0)                                              # (B, 512)

    # ---- fused, pre-symmetrized heads: one lane-dense (B, 512) store
    heads_ref[0] = (
        jnp.dot(d.astype(bf16), wh_ref[...], preferred_element_type=f32) + row(R_BH, HEADS_PAD)
    )


# ----------------------------------------------------------------------------- params
def init_params(key):
    """Deterministic parameter init in the original (PyTorch-style) layout."""
    def lin(k, fan_in, fan_out):
        k1, k2 = jax.random.split(k)
        bound = 1.0 / float(fan_in) ** 0.5
        w = jax.random.uniform(k1, (fan_in, fan_out), jnp.float32, -bound, bound)
        b = jax.random.uniform(k2, (1, fan_out), jnp.float32, -bound, bound)
        return w, b

    def bn(k, dim):
        kg, kb, km, kv = jax.random.split(k, 4)
        g = 1.0 + 0.1 * jax.random.normal(kg, (1, dim), jnp.float32)
        be = 0.1 * jax.random.normal(kb, (1, dim), jnp.float32)
        m = 0.1 * jax.random.normal(km, (1, dim), jnp.float32)
        v = 1.0 + 0.1 * jax.random.uniform(kv, (1, dim), jnp.float32)
        return [g, be, m, v]

    ks = jax.random.split(key, 20)
    p = []
    w1, b1 = lin(ks[0], 1, 32);    p += [w1, b1] + bn(ks[1], 32)
    w2, b2 = lin(ks[2], 32, 64);   p += [w2, b2] + bn(ks[3], 64)
    w3, b3 = lin(ks[4], 64, 128);  p += [w3, b3]
    wg, bg = lin(ks[5], 128, 1)                       # gated pool; store as (1, 128)
    wm, bm = lin(ks[6], 128, LATENT)
    ws, bs = lin(ks[7], 128, LATENT)
    # synthetic-test init choice (not a semantics change): keep the log-std head
    # small so exp(log_std) stays well-conditioned for the numerical comparison.
    ws, bs = ws * 0.05, bs * 0.05
    p += [wg.T, bg, wm, bm, ws, bs]
    dw1, db1 = lin(ks[8], 128, 128);   p += [dw1, db1] + bn(ks[9], 128)
    dw2, db2 = lin(ks[10], 128, 256);  p += [dw2, db2] + bn(ks[11], 256)
    dw3, db3 = lin(ks[12], 256, 512);  p += [dw3, db3] + bn(ks[13], 512)
    wadj, badj = lin(ks[14], 512, N_ADJ)
    wnode, bnode = lin(ks[15], 512, N_NODE)
    wedge, bedge = lin(ks[16], 512, N_EDGE)
    p += [wadj, badj, wnode, bnode, wedge, bedge]
    return p


def prepare_params(params):
    """Fold eval-mode BN, fuse heads, pre-symmetrize, pack small vectors."""
    (w1, b1, g1, be1, m1, v1,
     w2, b2, g2, be2, m2, v2,
     w3, b3,
     wg, bg, wm, bm, ws, bs,
     dw1, db1, dg1, dbe1, dm1, dv1,
     dw2, db2, dg2, dbe2, dm2, dv2,
     dw3, db3, dg3, dbe3, dm3, dv3,
     wadj, badj, wnode, bnode, wedge, bedge) = params

    def bn_fold(g, be, m, v):
        s = g / jnp.sqrt(v + BN_EPS)
        return s, be - m * s

    # encoder: BN applied after aggregation -> BN(A@(xW+b)) = A@(x(W*s)+(b*s)) + t
    s1, t1 = bn_fold(g1, be1, m1, v1)
    s2, t2 = bn_fold(g2, be2, m2, v2)
    w1f, b1f = w1.reshape(1, -1) * s1, b1 * s1
    w2f, b2f = w2 * s2, b2 * s2

    # decoder: BN(xW + b) = x(W*s) + (b*s + t)
    ds1, dt1 = bn_fold(dg1, dbe1, dm1, dv1)
    ds2, dt2 = bn_fold(dg2, dbe2, dm2, dv2)
    ds3, dt3 = bn_fold(dg3, dbe3, dm3, dv3)
    dw1f, db1f = dw1 * ds1, db1 * ds1 + dt1
    dw2f, db2f = dw2 * ds2, db2 * ds2 + dt2
    dw3f, db3f = dw3 * ds3, db3 * ds3 + dt3

    # fused mean/std heads
    wms = jnp.concatenate([wm, ws], axis=1)            # (128, 256)
    bms = jnp.concatenate([bm, bs], axis=1)            # (1, 256)

    # fold the decoder's (x + x.T)/2 symmetrization into the head weights/biases
    def sym_adj(w):
        wr = w.reshape(-1, MAX_NODES, MAX_NODES)
        return ((wr + jnp.swapaxes(wr, 1, 2)) * 0.5).reshape(w.shape)

    def sym_edge(w):
        wr = w.reshape(-1, MAX_NODES, MAX_NODES, EDGE_CLASSES)
        return ((wr + jnp.swapaxes(wr, 1, 2)) * 0.5).reshape(w.shape)

    wheads = jnp.concatenate([sym_adj(wadj), wnode, sym_edge(wedge)], axis=1)  # (512, 441)
    bheads = jnp.concatenate([sym_adj(badj), bnode, sym_edge(bedge)], axis=1)  # (1, 441)
    wheads = jnp.pad(wheads, ((0, 0), (0, HEADS_PAD - HEADS_DIM)))             # lane-dense
    bheads = jnp.pad(bheads, ((0, 0), (0, HEADS_PAD - HEADS_DIM)))

    # pack all small vectors into one (16, 512) blob (one resident DMA)
    vecs = jnp.zeros((VEC_ROWS, VEC_COLS), jnp.float32)
    for r, v in ((R_W1, w1f), (R_B1, b1f), (R_T1, t1),
                 (R_B2, b2f), (R_T2, t2), (R_B3, b3),
                 (R_WG, wg), (R_BG, bg), (R_BMS, bms),
                 (R_DB1, db1f), (R_DB2, db2f), (R_DB3, db3f), (R_BH, bheads)):
        v = v.reshape(-1)
        vecs = vecs.at[r, : v.shape[0]].set(v)

    bf16 = jnp.bfloat16
    return dict(
        w2=w2f,
        w3=w3.astype(bf16), wms=wms.astype(bf16),
        dw1=dw1f.astype(bf16), dw2=dw2f.astype(bf16),
        dw3=dw3f.astype(bf16), wh=wheads.astype(bf16),
        vecs=vecs,
    )


# ----------------------------------------------------------------------------- dense inputs (hoisted out of the hot path)
def _dense_inputs(z_atoms, edge_index, batch_idx, num_graphs):
    """Densify the GCN normalization and the scatter-sum pooling for ONE step."""
    N = z_atoms.shape[0]
    B = num_graphs
    row = jnp.concatenate([edge_index[0], jnp.arange(N, dtype=edge_index.dtype)])
    col = jnp.concatenate([edge_index[1], jnp.arange(N, dtype=edge_index.dtype)])
    adj = jnp.zeros((N, N), jnp.float32).at[row, col].add(1.0)
    deg = adj.sum(axis=0)                                       # degree(col)
    dinv = jnp.where(deg > 0, jax.lax.rsqrt(deg), 0.0)          # inf -> 0
    a_norm = dinv[:, None] * adj.T * dinv[None, :]              # out = a_norm @ x
    pool = (batch_idx[None, :] == jnp.arange(B)[:, None]).astype(jnp.float32)
    x0 = z_atoms.astype(jnp.float32)[:, None]
    x2 = jnp.concatenate([x0, jnp.ones_like(x0)], axis=1)       # (N, 2) = [x0 | 1]
    return a_norm, x2, pool


# ----------------------------------------------------------------------------- wrapper
@jax.jit
def graphvae_forward(prep, a_stack, x2_stack, pool_stack, eps_stack):
    """a_stack (G,N,N), x2_stack (G,N,2), pool_stack (G,B,N), eps_stack (G,B,128)."""
    G, N, _ = a_stack.shape
    Bq = pool_stack.shape[1]

    inputs = (a_stack, x2_stack, pool_stack, eps_stack,
              prep["w2"], prep["w3"], prep["wms"],
              prep["dw1"], prep["dw2"], prep["dw3"], prep["wh"], prep["vecs"])

    step3 = lambda g: (g, 0, 0)          # per-step activation tiles (pipelined)
    const2 = lambda g: (0, 0)            # weights: constant block -> VMEM-resident

    in_specs = [
        pl.BlockSpec((1, N, N), step3),
        pl.BlockSpec((1, N, 2), step3),
        pl.BlockSpec((1, Bq, N), step3),
        pl.BlockSpec((1, Bq, LATENT), step3),
        pl.BlockSpec(prep["w2"].shape, const2),
        pl.BlockSpec(prep["w3"].shape, const2),
        pl.BlockSpec(prep["wms"].shape, const2),
        pl.BlockSpec(prep["dw1"].shape, const2),
        pl.BlockSpec(prep["dw2"].shape, const2),
        pl.BlockSpec(prep["dw3"].shape, const2),
        pl.BlockSpec(prep["wh"].shape, const2),
        pl.BlockSpec(prep["vecs"].shape, const2),
    ]
    out_specs = (
        pl.BlockSpec((1, Bq, 2 * LATENT), step3),
        pl.BlockSpec((1, Bq, HEADS_PAD), step3),
    )

    flops_step = 2 * (N * N * 2 + N * 32 * 64 + N * N * 64 + N * 64 * 128
                      + Bq * N * 128 + Bq * 128 * 256
                      + Bq * (128 * 128 + 128 * 256 + 256 * 512 + 512 * 512))
    in_bytes = sum(int(x.size) * x.dtype.itemsize for x in inputs)
    out_bytes = G * Bq * (2 * LATENT + HEADS_PAD) * 4

    ms, heads = pl.pallas_call(
        graphvae_kernel,
        grid=(G,),
        out_shape=(
            jax.ShapeDtypeStruct((G, Bq, 2 * LATENT), jnp.float32),   # [loc | log_std]
            jax.ShapeDtypeStruct((G, Bq, HEADS_PAD), jnp.float32),    # [adj|node|edge|pad]
        ),
        in_specs=in_specs,
        out_specs=out_specs,
        compiler_params=pltpu.CompilerParams(
            dimension_semantics=("parallel",)),
        cost_estimate=pl.CostEstimate(
            flops=G * flops_step,
            transcendentals=G * Bq * LATENT,
            bytes_accessed=in_bytes + out_bytes),
    )(*inputs)

    ms = ms.reshape(G * Bq, 2 * LATENT)
    heads = heads.reshape(G * Bq, HEADS_PAD)
    loc = ms[:, :LATENT]
    log_std = ms[:, LATENT:]    # raw log-std head output (the module's "scale" return)
    adj = heads[:, :N_ADJ].reshape(-1, MAX_NODES, MAX_NODES)
    node = heads[:, N_ADJ:N_ADJ + N_NODE].reshape(-1, MAX_NODES, NODE_CLASSES)
    edge = heads[:, N_ADJ + N_NODE:HEADS_DIM].reshape(-1, MAX_NODES, MAX_NODES, EDGE_CLASSES)
    return adj, node, edge, loc, log_std


# ----------------------------------------------------------------------------- unfused reference (direct port of the PyTorch module, eval mode, f32)
@partial(jax.jit, static_argnames=("num_graphs",))
def torch_reference_forward(params, z_atoms, edge_index, batch_idx, eps, num_graphs):
    (w1, b1, g1, be1, m1, v1,
     w2, b2, g2, be2, m2, v2,
     w3, b3,
     wg, bg, wm, bm, ws, bs,
     dw1, db1, dg1, dbe1, dm1, dv1,
     dw2, db2, dg2, dbe2, dm2, dv2,
     dw3, db3, dg3, dbe3, dm3, dv3,
     wadj, badj, wnode, bnode, wedge, bedge) = params
    hi = jax.lax.Precision.HIGHEST

    def bn(x, g, be, m, v):
        return (x - m) / jnp.sqrt(v + BN_EPS) * g + be

    a_norm, x2, pool = _dense_inputs(z_atoms, edge_index, batch_idx, num_graphs)
    x = x2[:, 0:1]
    h = jnp.dot(a_norm, jnp.dot(x, w1, precision=hi) + b1, precision=hi)
    h = jnp.maximum(bn(h, g1, be1, m1, v1), 0.0)        # dropout: identity (eval)
    h = jnp.dot(a_norm, jnp.dot(h, w2, precision=hi) + b2, precision=hi)
    h = jnp.maximum(bn(h, g2, be2, m2, v2), 0.0)
    h = jnp.maximum(jnp.dot(h, w3, precision=hi) + b3, 0.0)
    attn = jnp.sum(h * wg, axis=-1, keepdims=True) + bg
    pooled = jnp.dot(pool, h * attn, precision=hi)
    loc = jnp.dot(pooled, wm, precision=hi) + bm
    log_std = jnp.dot(pooled, ws, precision=hi) + bs
    z = loc + jnp.exp(log_std) * eps
    d = jnp.maximum(bn(jnp.dot(z, dw1, precision=hi) + db1, dg1, dbe1, dm1, dv1), 0.0)
    d = jnp.maximum(bn(jnp.dot(d, dw2, precision=hi) + db2, dg2, dbe2, dm2, dv2), 0.0)
    d = jnp.maximum(bn(jnp.dot(d, dw3, precision=hi) + db3, dg3, dbe3, dm3, dv3), 0.0)
    B = num_graphs
    adj = (jnp.dot(d, wadj, precision=hi) + badj).reshape(B, MAX_NODES, MAX_NODES)
    node = (jnp.dot(d, wnode, precision=hi) + bnode).reshape(B, MAX_NODES, NODE_CLASSES)
    edge = (jnp.dot(d, wedge, precision=hi) + bedge).reshape(
        B, MAX_NODES, MAX_NODES, EDGE_CLASSES)
    adj = (adj + jnp.swapaxes(adj, 1, 2)) * 0.5
    edge = (edge + jnp.swapaxes(edge, 1, 2)) * 0.5
    return adj, node, edge, loc, log_std


# ----------------------------------------------------------------------------- main
if __name__ == "__main__":
    key = jax.random.PRNGKey(0)
    kp, kz, ke = jax.random.split(key, 3)

    raw_params = init_params(kp)
    prep = prepare_params(raw_params)

    # 4 grid steps x 16 graphs/step x 8 atoms/graph = 64 molecules, N=128 nodes/step
    G, Bq, npg = 4, 16, 8
    N = Bq * npg                                                        # 128 (lane-dense)

    z_atoms = jax.random.randint(kz, (G, N), 1, 10).astype(jnp.float32)  # atomic numbers
    eps = jax.random.normal(ke, (G, Bq, LATENT), jnp.float32)            # reparam noise

    # chain-bond topology (bidirectional), identical per step
    src, dst = [], []
    for g in range(Bq):
        base = g * npg
        for i in range(npg - 1):
            src += [base + i, base + i + 1]
            dst += [base + i + 1, base + i]
    edge_index = jnp.array([src, dst], dtype=jnp.int32)
    batch_idx = jnp.repeat(jnp.arange(Bq), npg)

    # densify adjacency / pooling ONCE per dataset batch (hoisted off the hot path)
    dense = [_dense_inputs(z_atoms[s], edge_index, batch_idx, Bq) for s in range(G)]
    a_stack = jnp.stack([d[0] for d in dense])
    x2_stack = jnp.stack([d[1] for d in dense])
    pool_stack = jnp.stack([d[2] for d in dense])

    outs = graphvae_forward(prep, a_stack, x2_stack, pool_stack, eps)
    adj, node, edge, loc, log_std = jax.block_until_ready(outs)

    total = G * Bq
    assert adj.shape == (total, MAX_NODES, MAX_NODES)
    assert node.shape == (total, MAX_NODES, NODE_CLASSES)
    assert edge.shape == (total, MAX_NODES, MAX_NODES, EDGE_CLASSES)
    assert loc.shape == (total, LATENT) and log_std.shape == (total, LATENT)
    for o in (adj, node, edge, loc, log_std):
        assert bool(jnp.all(jnp.isfinite(o)))

    # numerical check vs. an UNFUSED f32 port of the original PyTorch module
    refs = [torch_reference_forward(raw_params, z_atoms[s], edge_index, batch_idx,
                                    eps[s], Bq) for s in range(G)]
    ref = tuple(jnp.concatenate([r[i] for r in refs], axis=0) for i in range(5))

    names = ("adj", "node", "edge", "loc", "log_std")
    tols = (5e-2, 5e-2, 5e-2, 2e-2, 2e-2)          # decoder path is bf16, f32 accum
    for name, tol, got, want in zip(names, tols, (adj, node, edge, loc, log_std), ref):
        num = jnp.linalg.norm(got - want)
        den = jnp.linalg.norm(want) + 1e-6
        rel = float(num / den)
        assert rel < tol, f"{name}: kernel vs PyTorch-port mismatch, rel err {rel} >= {tol}"

    print("KERNEL_OK")
</pallas_src>

<mosaic_0001>
module attributes {stable_mosaic.version = 11 : i64} {
  func.func @graphvae_kernel(%arg0: i32, %arg1: memref<1x128x128xf32, #tpu.memory_space<vmem>>, %arg2: memref<1x128x2xf32, #tpu.memory_space<vmem>>, %arg3: memref<1x16x128xf32, #tpu.memory_space<vmem>>, %arg4: memref<1x16x128xf32, #tpu.memory_space<vmem>>, %arg5: memref<32x64xf32, #tpu.memory_space<vmem>>, %arg6: memref<64x128xbf16, #tpu.memory_space<vmem>>, %arg7: memref<128x256xbf16, #tpu.memory_space<vmem>>, %arg8: memref<128x128xbf16, #tpu.memory_space<vmem>>, %arg9: memref<128x256xbf16, #tpu.memory_space<vmem>>, %arg10: memref<256x512xbf16, #tpu.memory_space<vmem>>, %arg11: memref<512x512xbf16, #tpu.memory_space<vmem>>, %arg12: memref<16x512xf32, #tpu.memory_space<vmem>>, %arg13: memref<1x16x256xf32, #tpu.memory_space<vmem>>, %arg14: memref<1x16x512xf32, #tpu.memory_space<vmem>>) attributes {dimension_semantics = [#tpu.dimension_semantics<parallel>], iteration_bounds = array<i64: 4>, scalar_prefetch = 0 : i64, scratch_operands = 0 : i64, tpu.core_type = #tpu.core_type<tc>, window_params = [{transform_indices = @transform_0, window_bounds = array<i64: 1, 128, 128>}, {transform_indices = @transform_1, window_bounds = array<i64: 1, 128, 2>}, {transform_indices = @transform_2, window_bounds = array<i64: 1, 16, 128>}, {transform_indices = @transform_3, window_bounds = array<i64: 1, 16, 128>}, {pipeline_mode = #tpu.pipeline_mode<synchronous>, transform_indices = @transform_4, window_bounds = array<i64: 32, 64>}, {pipeline_mode = #tpu.pipeline_mode<synchronous>, transform_indices = @transform_5, window_bounds = array<i64: 64, 128>}, {pipeline_mode = #tpu.pipeline_mode<synchronous>, transform_indices = @transform_6, window_bounds = array<i64: 128, 256>}, {pipeline_mode = #tpu.pipeline_mode<synchronous>, transform_indices = @transform_7, window_bounds = array<i64: 128, 128>}, {pipeline_mode = #tpu.pipeline_mode<synchronous>, transform_indices = @transform_8, window_bounds = array<i64: 128, 256>}, {pipeline_mode = #tpu.pipeline_mode<synchronous>, transform_indices = @transform_9, window_bounds = array<i64: 256, 512>}, {pipeline_mode = #tpu.pipeline_mode<synchronous>, transform_indices = @transform_10, window_bounds = array<i64: 512, 512>}, {pipeline_mode = #tpu.pipeline_mode<synchronous>, transform_indices = @transform_11, window_bounds = array<i64: 16, 512>}, {transform_indices = @transform_12, window_bounds = array<i64: 1, 16, 256>}, {transform_indices = @transform_13, window_bounds = array<i64: 1, 16, 512>}]} {
    %c0 = arith.constant 0 : index
    %c0_0 = arith.constant 0 : index
    %c0_1 = arith.constant 0 : index
    %0 = vector.load %arg1[%c0, %c0_0, %c0_1] : memref<1x128x128xf32, #tpu.memory_space<vmem>>, vector<1x128x128xf32>
    %1 = vector.shape_cast %0 : vector<1x128x128xf32> to vector<128x128xf32>
    %c0_2 = arith.constant 0 : index
    %c0_3 = arith.constant 0 : index
    %c0_4 = arith.constant 0 : index
    %2 = vector.load %arg2[%c0_2, %c0_3, %c0_4] : memref<1x128x2xf32, #tpu.memory_space<vmem>>, vector<1x128x2xf32>
    %3 = vector.shape_cast %2 : vector<1x128x2xf32> to vector<128x2xf32>
    %cst = arith.constant dense<0.000000e+00> : vector<128x2xf32>
    %4 = tpu.matmul %1, %3, %cst {dimension_numbers = #tpu.dot_dimension_numbers<[1], [0], [0], [1], [0, 0, 1, 1], [], []>} : vector<128x128xf32>, vector<128x2xf32>, vector<128x2xf32> -> vector<128x2xf32>
    %5 = vector.extract_strided_slice %4 {offsets = [0, 0], sizes = [128, 1], strides = [1, 1]} : vector<128x2xf32> to vector<128x1xf32>
    %c0_5 = arith.constant 0 : index
    %c0_6 = arith.constant 0 : index
    %6 = vector.load %arg12[%c0_5, %c0_6] : memref<16x512xf32, #tpu.memory_space<vmem>>, vector<1x32xf32>
    %7 = vector.broadcast %5 : vector<128x1xf32> to vector<128x32xf32>
    %8 = vector.broadcast %6 : vector<1x32xf32> to vector<128x32xf32>
    %9 = arith.mulf %7, %8 : vector<128x32xf32>
    %10 = vector.extract_strided_slice %4 {offsets = [0, 1], sizes = [128, 1], strides = [1, 1]} : vector<128x2xf32> to vector<128x1xf32>
    %c1 = arith.constant 1 : index
    %c0_7 = arith.constant 0 : index
    %11 = vector.load %arg12[%c1, %c0_7] : memref<16x512xf32, #tpu.memory_space<vmem>>, vector<1x32xf32>
    %12 = vector.broadcast %10 : vector<128x1xf32> to vector<128x32xf32>
    %13 = vector.broadcast %11 : vector<1x32xf32> to vector<128x32xf32>
    %14 = arith.mulf %12, %13 : vector<128x32xf32>
    %15 = arith.addf %9, %14 : vector<128x32xf32>
    %c2 = arith.constant 2 : index
    %c0_8 = arith.constant 0 : index
    %16 = vector.load %arg12[%c2, %c0_8] : memref<16x512xf32, #tpu.memory_space<vmem>>, vector<1x32xf32>
    %17 = vector.broadcast %16 : vector<1x32xf32> to vector<128x32xf32>
    %18 = arith.addf %15, %17 : vector<128x32xf32>
    %cst_9 = arith.constant 0.000000e+00 : f32
    %19 = vector.broadcast %cst_9 : f32 to vector<128x32xf32>
    %20 = arith.maximumf %18, %19 : vector<128x32xf32>
    %c0_10 = arith.constant 0 : index
    %c0_11 = arith.constant 0 : index
    %21 = vector.load %arg5[%c0_10, %c0_11] : memref<32x64xf32, #tpu.memory_space<vmem>>, vector<32x64xf32>
    %cst_12 = arith.constant dense<0.000000e+00> : vector<128x64xf32>
    %22 = tpu.matmul %20, %21, %cst_12 {dimension_numbers = #tpu.dot_dimension_numbers<[1], [0], [0], [1], [0, 0, 1, 1], [], []>} : vector<128x32xf32>, vector<32x64xf32>, vector<128x64xf32> -> vector<128x64xf32>
    %c3 = arith.constant 3 : index
    %c0_13 = arith.constant 0 : index
    %23 = vector.load %arg12[%c3, %c0_13] : memref<16x512xf32, #tpu.memory_space<vmem>>, vector<1x64xf32>
    %24 = vector.broadcast %23 : vector<1x64xf32> to vector<128x64xf32>
    %25 = arith.addf %22, %24 : vector<128x64xf32>
    %cst_14 = arith.constant dense<0.000000e+00> : vector<128x64xf32>
    %26 = tpu.matmul %1, %25, %cst_14 {dimension_numbers = #tpu.dot_dimension_numbers<[1], [0], [0], [1], [0, 0, 1, 1], [], []>} : vector<128x128xf32>, vector<128x64xf32>, vector<128x64xf32> -> vector<128x64xf32>
    %c4 = arith.constant 4 : index
    %c0_15 = arith.constant 0 : index
    %27 = vector.load %arg12[%c4, %c0_15] : memref<16x512xf32, #tpu.memory_space<vmem>>, vector<1x64xf32>
    %28 = vector.broadcast %27 : vector<1x64xf32> to vector<128x64xf32>
    %29 = arith.addf %26, %28 : vector<128x64xf32>
    %cst_16 = arith.constant 0.000000e+00 : f32
    %30 = vector.broadcast %cst_16 : f32 to vector<128x64xf32>
    %31 = arith.maximumf %29, %30 : vector<128x64xf32>
    %32 = arith.truncf %31 : vector<128x64xf32> to vector<128x64xbf16>
    %c0_17 = arith.constant 0 : index
    %c0_18 = arith.constant 0 : index
    %33 = vector.load %arg6[%c0_17, %c0_18] : memref<64x128xbf16, #tpu.memory_space<vmem>>, vector<64x128xbf16>
    %cst_19 = arith.constant dense<0.000000e+00> : vector<128x128xf32>
    %34 = tpu.matmul %32, %33, %cst_19 {dimension_numbers = #tpu.dot_dimension_numbers<[1], [0], [0], [1], [0, 0, 1, 1], [], []>} : vector<128x64xbf16>, vector<64x128xbf16>, vector<128x128xf32> -> vector<128x128xf32>
    %c5 = arith.constant 5 : index
    %c0_20 = arith.constant 0 : index
    %35 = vector.load %arg12[%c5, %c0_20] : memref<16x512xf32, #tpu.memory_space<vmem>>, vector<1x128xf32>
    %36 = vector.broadcast %35 : vector<1x128xf32> to vector<128x128xf32>
    %37 = arith.addf %34, %36 : vector<128x128xf32>
    %cst_21 = arith.constant 0.000000e+00 : f32
    %38 = vector.broadcast %cst_21 : f32 to vector<128x128xf32>
    %39 = arith.maximumf %37, %38 : vector<128x128xf32>
    %c6 = arith.constant 6 : index
    %c0_22 = arith.constant 0 : index
    %40 = vector.load %arg12[%c6, %c0_22] : memref<16x512xf32, #tpu.memory_space<vmem>>, vector<1x128xf32>
    %41 = vector.broadcast %40 : vector<1x128xf32> to vector<128x128xf32>
    %42 = arith.mulf %39, %41 : vector<128x128xf32>
    %cst_23 = arith.constant dense<0.000000e+00> : vector<128xf32>
    %43 = vector.multi_reduction <add>, %42, %cst_23 [1] : vector<128x128xf32> to vector<128xf32>
    %44 = vector.shape_cast %43 : vector<128xf32> to vector<128x1xf32>
    %c7 = arith.constant 7 : index
    %c0_24 = arith.constant 0 : index
    %45 = vector.load %arg12[%c7, %c0_24] : memref<16x512xf32, #tpu.memory_space<vmem>>, vector<1x1xf32>
    %46 = vector.broadcast %45 : vector<1x1xf32> to vector<128x1xf32>
    %47 = arith.addf %44, %46 : vector<128x1xf32>
    %c0_25 = arith.constant 0 : index
    %c0_26 = arith.constant 0 : index
    %c0_27 = arith.constant 0 : index
    %48 = vector.load %arg3[%c0_25, %c0_26, %c0_27] : memref<1x16x128xf32, #tpu.memory_space<vmem>>, vector<1x16x128xf32>
    %49 = vector.shape_cast %48 : vector<1x16x128xf32> to vector<16x128xf32>
    %50 = vector.broadcast %47 : vector<128x1xf32> to vector<128x128xf32>
    %51 = arith.mulf %39, %50 : vector<128x128xf32>
    %cst_28 = arith.constant dense<0.000000e+00> : vector<16x128xf32>
    %52 = tpu.matmul %49, %51, %cst_28 {dimension_numbers = #tpu.dot_dimension_numbers<[1], [0], [0], [1], [0, 0, 1, 1], [], []>} : vector<16x128xf32>, vector<128x128xf32>, vector<16x128xf32> -> vector<16x128xf32>
    %53 = arith.truncf %52 : vector<16x128xf32> to vector<16x128xbf16>
    %c0_29 = arith.constant 0 : index
    %c0_30 = arith.constant 0 : index
    %54 = vector.load %arg7[%c0_29, %c0_30] : memref<128x256xbf16, #tpu.memory_space<vmem>>, vector<128x256xbf16>
    %cst_31 = arith.constant dense<0.000000e+00> : vector<16x256xf32>
    %55 = tpu.matmul %53, %54, %cst_31 {dimension_numbers = #tpu.dot_dimension_numbers<[1], [0], [0], [1], [0, 0, 1, 1], [], []>} : vector<16x128xbf16>, vector<128x256xbf16>, vector<16x256xf32> -> vector<16x256xf32>
    %c8 = arith.constant 8 : index
    %c0_32 = arith.constant 0 : index
    %56 = vector.load %arg12[%c8, %c0_32] : memref<16x512xf32, #tpu.memory_space<vmem>>, vector<1x256xf32>
    %57 = vector.broadcast %56 : vector<1x256xf32> to vector<16x256xf32>
    %58 = arith.addf %55, %57 : vector<16x256xf32>
    %c0_33 = arith.constant 0 : index
    %c0_34 = arith.constant 0 : index
    %c0_35 = arith.constant 0 : index
    %59 = vector.load %arg13[%c0_33, %c0_34, %c0_35] : memref<1x16x256xf32, #tpu.memory_space<vmem>>, vector<1x16x256xf32>
    %60 = vector.shape_cast %59 : vector<1x16x256xf32> to vector<16x256xf32>
    %61 = vector.shape_cast %58 : vector<16x256xf32> to vector<1x16x256xf32>
    tpu.vector_store %arg13[%c0_33, %c0_34, %c0_35], %61 {strides = array<i32>} : memref<1x16x256xf32, #tpu.memory_space<vmem>>, vector<1x16x256xf32>,
    %62 = vector.extract_strided_slice %58 {offsets = [0, 0], sizes = [16, 128], strides = [1, 1]} : vector<16x256xf32> to vector<16x128xf32>
    %63 = vector.extract_strided_slice %58 {offsets = [0, 128], sizes = [16, 128], strides = [1, 1]} : vector<16x256xf32> to vector<16x128xf32>
    %64 = math.exp %63 : vector<16x128xf32>
    %c0_36 = arith.constant 0 : index
    %c0_37 = arith.constant 0 : index
    %c0_38 = arith.constant 0 : index
    %65 = vector.load %arg4[%c0_36, %c0_37, %c0_38] : memref<1x16x128xf32, #tpu.memory_space<vmem>>, vector<1x16x128xf32>
    %66 = vector.shape_cast %65 : vector<1x16x128xf32> to vector<16x128xf32>
    %67 = arith.mulf %64, %66 : vector<16x128xf32>
    %68 = arith.addf %62, %67 : vector<16x128xf32>
    %69 = arith.truncf %68 : vector<16x128xf32> to vector<16x128xbf16>
    %c0_39 = arith.constant 0 : index
    %c0_40 = arith.constant 0 : index
    %70 = vector.load %arg8[%c0_39, %c0_40] : memref<128x128xbf16, #tpu.memory_space<vmem>>, vector<128x128xbf16>
    %cst_41 = arith.constant dense<0.000000e+00> : vector<16x128xf32>
    %71 = tpu.matmul %69, %70, %cst_41 {dimension_numbers = #tpu.dot_dimension_numbers<[1], [0], [0], [1], [0, 0, 1, 1], [], []>} : vector<16x128xbf16>, vector<128x128xbf16>, vector<16x128xf32> -> vector<16x128xf32>
    %c9 = arith.constant 9 : index
    %c0_42 = arith.constant 0 : index
    %72 = vector.load %arg12[%c9, %c0_42] : memref<16x512xf32, #tpu.memory_space<vmem>>, vector<1x128xf32>
    %73 = vector.broadcast %72 : vector<1x128xf32> to vector<16x128xf32>
    %74 = arith.addf %71, %73 : vector<16x128xf32>
    %cst_43 = arith.constant 0.000000e+00 : f32
    %75 = vector.broadcast %cst_43 : f32 to vector<16x128xf32>
    %76 = arith.maximumf %74, %75 : vector<16x128xf32>
    %77 = arith.truncf %76 : vector<16x128xf32> to vector<16x128xbf16>
    %c0_44 = arith.constant 0 : index
    %c0_45 = arith.constant 0 : index
    %78 = vector.load %arg9[%c0_44, %c0_45] : memref<128x256xbf16, #tpu.memory_space<vmem>>, vector<128x256xbf16>
    %cst_46 = arith.constant dense<0.000000e+00> : vector<16x256xf32>
    %79 = tpu.matmul %77, %78, %cst_46 {dimension_numbers = #tpu.dot_dimension_numbers<[1], [0], [0], [1], [0, 0, 1, 1], [], []>} : vector<16x128xbf16>, vector<128x256xbf16>, vector<16x256xf32> -> vector<16x256xf32>
    %c10 = arith.constant 10 : index
    %c0_47 = arith.constant 0 : index
    %80 = vector.load %arg12[%c10, %c0_47] : memref<16x512xf32, #tpu.memory_space<vmem>>, vector<1x256xf32>
    %81 = vector.broadcast %80 : vector<1x256xf32> to vector<16x256xf32>
    %82 = arith.addf %79, %81 : vector<16x256xf32>
    %cst_48 = arith.constant 0.000000e+00 : f32
    %83 = vector.broadcast %cst_48 : f32 to vector<16x256xf32>
    %84 = arith.maximumf %82, %83 : vector<16x256xf32>
    %85 = arith.truncf %84 : vector<16x256xf32> to vector<16x256xbf16>
    %c0_49 = arith.constant 0 : index
    %c0_50 = arith.constant 0 : index
    %86 = vector.load %arg10[%c0_49, %c0_50] : memref<256x512xbf16, #tpu.memory_space<vmem>>, vector<256x512xbf16>
    %cst_51 = arith.constant dense<0.000000e+00> : vector<16x512xf32>
    %87 = tpu.matmul %85, %86, %cst_51 {dimension_numbers = #tpu.dot_dimension_numbers<[1], [0], [0], [1], [0, 0, 1, 1], [], []>} : vector<16x256xbf16>, vector<256x512xbf16>, vector<16x512xf32> -> vector<16x512xf32>
    %c11 = arith.constant 11 : index
    %c0_52 = arith.constant 0 : index
    %88 = vector.load %arg12[%c11, %c0_52] : memref<16x512xf32, #tpu.memory_space<vmem>>, vector<1x512xf32>
    %89 = vector.broadcast %88 : vector<1x512xf32> to vector<16x512xf32>
    %90 = arith.addf %87, %89 : vector<16x512xf32>
    %cst_53 = arith.constant 0.000000e+00 : f32
    %91 = vector.broadcast %cst_53 : f32 to vector<16x512xf32>
    %92 = arith.maximumf %90, %91 : vector<16x512xf32>
    %93 = arith.truncf %92 : vector<16x512xf32> to vector<16x512xbf16>
    %c0_54 = arith.constant 0 : index
    %c0_55 = arith.constant 0 : index
    %94 = vector.load %arg11[%c0_54, %c0_55] : memref<512x512xbf16, #tpu.memory_space<vmem>>, vector<512x512xbf16>
    %cst_56 = arith.constant dense<0.000000e+00> : vector<16x512xf32>
    %95 = tpu.matmul %93, %94, %cst_56 {dimension_numbers = #tpu.dot_dimension_numbers<[1], [0], [0], [1], [0, 0, 1, 1], [], []>} : vector<16x512xbf16>, vector<512x512xbf16>, vector<16x512xf32> -> vector<16x512xf32>
    %c12 = arith.constant 12 : index
    %c0_57 = arith.constant 0 : index
    %96 = vector.load %arg12[%c12, %c0_57] : memref<16x512xf32, #tpu.memory_space<vmem>>, vector<1x512xf32>
    %97 = vector.broadcast %96 : vector<1x512xf32> to vector<16x512xf32>
    %98 = arith.addf %95, %97 : vector<16x512xf32>
    %c0_58 = arith.constant 0 : index
    %c0_59 = arith.constant 0 : index
    %c0_60 = arith.constant 0 : index
    %99 = vector.load %arg14[%c0_58, %c0_59, %c0_60] : memref<1x16x512xf32, #tpu.memory_space<vmem>>, vector<1x16x512xf32>
    %100 = vector.shape_cast %99 : vector<1x16x512xf32> to vector<16x512xf32>
    %101 = vector.shape_cast %98 : vector<16x512xf32> to vector<1x16x512xf32>
    tpu.vector_store %arg14[%c0_58, %c0_59, %c0_60], %101 {strides = array<i32>} : memref<1x16x512xf32, #tpu.memory_space<vmem>>, vector<1x16x512xf32>,
    return
  }
  func.func @transform_0(%arg0: i32) -> (i32, i32, i32) {
    %c0_i32 = arith.constant 0 : i32
    %c0_i32_0 = arith.constant 0 : i32
    %c0_i32_1 = arith.constant 0 : i32
    return %arg0, %c0_i32, %c0_i32_0 : i32, i32, i32
  }
  func.func @transform_1(%arg0: i32) -> (i32, i32, i32) {
    %c0_i32 = arith.constant 0 : i32
    %c0_i32_0 = arith.constant 0 : i32
    %c0_i32_1 = arith.constant 0 : i32
    return %arg0, %c0_i32, %c0_i32_0 : i32, i32, i32
  }
  func.func @transform_2(%arg0: i32) -> (i32, i32, i32) {
    %c0_i32 = arith.constant 0 : i32
    %c0_i32_0 = arith.constant 0 : i32
    %c0_i32_1 = arith.constant 0 : i32
    return %arg0, %c0_i32, %c0_i32_0 : i32, i32, i32
  }
  func.func @transform_3(%arg0: i32) -> (i32, i32, i32) {
    %c0_i32 = arith.constant 0 : i32
    %c0_i32_0 = arith.constant 0 : i32
    %c0_i32_1 = arith.constant 0 : i32
    return %arg0, %c0_i32, %c0_i32_0 : i32, i32, i32
  }
  func.func @transform_4(%arg0: i32) -> (i32, i32) {
    %c0_i32 = arith.constant 0 : i32
    %c0_i32_0 = arith.constant 0 : i32
    %c0_i32_1 = arith.constant 0 : i32
    return %c0_i32, %c0_i32_0 : i32, i32
  }
  func.func @transform_5(%arg0: i32) -> (i32, i32) {
    %c0_i32 = arith.constant 0 : i32
    %c0_i32_0 = arith.constant 0 : i32
    %c0_i32_1 = arith.constant 0 : i32
    return %c0_i32, %c0_i32_0 : i32, i32
  }
  func.func @transform_6(%arg0: i32) -> (i32, i32) {
    %c0_i32 = arith.constant 0 : i32
    %c0_i32_0 = arith.constant 0 : i32
    %c0_i32_1 = arith.constant 0 : i32
    return %c0_i32, %c0_i32_0 : i32, i32
  }
  func.func @transform_7(%arg0: i32) -> (i32, i32) {
    %c0_i32 = arith.constant 0 : i32
    %c0_i32_0 = arith.constant 0 : i32
    %c0_i32_1 = arith.constant 0 : i32
    return %c0_i32, %c0_i32_0 : i32, i32
  }
  func.func @transform_8(%arg0: i32) -> (i32, i32) {
    %c0_i32 = arith.constant 0 : i32
    %c0_i32_0 = arith.constant 0 : i32
    %c0_i32_1 = arith.constant 0 : i32
    return %c0_i32, %c0_i32_0 : i32, i32
  }
  func.func @transform_9(%arg0: i32) -> (i32, i32) {
    %c0_i32 = arith.constant 0 : i32
    %c0_i32_0 = arith.constant 0 : i32
    %c0_i32_1 = arith.constant 0 : i32
    return %c0_i32, %c0_i32_0 : i32, i32
  }
  func.func @transform_10(%arg0: i32) -> (i32, i32) {
    %c0_i32 = arith.constant 0 : i32
    %c0_i32_0 = arith.constant 0 : i32
    %c0_i32_1 = arith.constant 0 : i32
    return %c0_i32, %c0_i32_0 : i32, i32
  }
  func.func @transform_11(%arg0: i32) -> (i32, i32) {
    %c0_i32 = arith.constant 0 : i32
    %c0_i32_0 = arith.constant 0 : i32
    %c0_i32_1 = arith.constant 0 : i32
    return %c0_i32, %c0_i32_0 : i32, i32
  }
  func.func @transform_12(%arg0: i32) -> (i32, i32, i32) {
    %c0_i32 = arith.constant 0 : i32
    %c0_i32_0 = arith.constant 0 : i32
    %c0_i32_1 = arith.constant 0 : i32
    return %arg0, %c0_i32, %c0_i32_0 : i32, i32, i32
  }
  func.func @transform_13(%arg0: i32) -> (i32, i32, i32) {
    %c0_i32 = arith.constant 0 : i32
    %c0_i32_0 = arith.constant 0 : i32
    %c0_i32_1 = arith.constant 0 : i32
    return %arg0, %c0_i32, %c0_i32_0 : i32, i32, i32
  }
}

</mosaic_0001>

<bundles_post_ra>
// kernel: graphvae_forward.1
= control target key start
LH: loop header
LB: loop body
LE: loop exit
PB: predicated region body
PF: predicated region fallthrough
CT: control target
= control target key end

     0   :  { %s6375_s0 = inlined_call_operand.vmem [shape: f32[4,128,128], index: 0, kind: input, shape index: {}]   ;;  %s6376_s1 = inlined_call_operand.vmem [shape: f32[4,128,2], index: 1, kind: input, shape index: {}]   ;;  %s6377_s2 = inlined_call_operand.hbm [shape: f32[4,16,128], index: 2, kind: input, shape index: {}]   ;;  %s6378_s3 = inlined_call_operand.hbm [shape: f32[4,16,128], index: 3, kind: input, shape index: {}]   ;;  %s6379_s4 = inlined_call_operand.vmem [shape: f32[32,64], index: 4, kind: input, shape index: {}]   ;;  %s6380_s5 = inlined_call_operand.hbm [shape: bf16[64,128], index: 5, kind: input, shape index: {}]   ;;  %s6381_s6 = inlined_call_operand.hbm [shape: bf16[128,256], index: 6, kind: input, shape index: {}]   ;;  %s6382_s7 = inlined_call_operand.hbm [shape: bf16[128,128], index: 7, kind: input, shape index: {}]   ;;  %s6383_s8 = inlined_call_operand.hbm [shape: bf16[128,256], index: 8, kind: input, shape index: {}]   ;;  %s6384_s9 = inlined_call_operand.hbm [shape: bf16[256,512], index: 9, kind: input, shape index: {}]   ;;  %s6385_s10 = inlined_call_operand.hbm [shape: bf16[512,512], index: 10, kind: input, shape index: {}]   ;;  %s6386_s11 = inlined_call_operand.hbm [shape: f32[16,512], index: 11, kind: input, shape index: {}]   ;;  %s6387_s12 = inlined_call_operand.vmem [shape: f32[4,16,256], index: 12, kind: output, shape index: {0}]   ;;  %s6388_s13 = inlined_call_operand.vmem [shape: f32[4,16,512], index: 13, kind: output, shape index: {1}]  }
   0x1   :  { %6400 = sst [smem:[#allocation22_spill]] %s6375_s0 }
   0x2   :  { %6401 = sst [smem:[#allocation23_spill]] %s6376_s1 }
   0x3   :  { %6402 = sst [smem:[#allocation24_spill]] %s6377_s2 }
   0x4   :  { %6403 = sst [smem:[#allocation25_spill]] %s6379_s4 }
   0x5   :  { %6404 = sst [smem:[#allocation26_spill]] %s6380_s5 }
   0x6   :  { %6405 = sst [smem:[#allocation27_spill]] %s6387_s12 }
   0x7   :  { %6406 = sst [smem:[#allocation28_spill]] %s6388_s13 }
   0x8   :  { %19 = vsyncpa [#allocation3], 0 }
   0x9   :  { %21 = vsyncpa [#allocation3 + $0x1], 0 }
   0xa   :  { %22 = vsyncpa [#allocation5], 0 }
   0xb   :  { %24 = vsyncpa [#allocation5 + $0x1], 0 }
   0xc   :  { %25 = vsyncpa [#allocation8], 0 }
   0xd   :  { %26 = vsyncpa [#allocation11], 0 }
   0xe   :  { %27 = vsyncpa [#allocation14], 0  ;;  %s5619_s25 = smov 0   ;;  %s5621_s26 = smov 0  }
   0xf   :  { %s5623_s27 = smov 0   ;;  %s5625_s28 = smov 0  }
  0x10 LB: > { %s5528_s29 = smov [#allocation6]   ;;  %s5640_s14 = sadd.s32 4294967295, %s5526_s28   ;;  %s5526_s28 = sphi %s5625_s28, %s6438_s28   ;;  %s5522_s27 = sphi %s5623_s27, %s6437_s27   ;;  %s5518_s26 = sphi %s5621_s26, %s6436_s26   ;;  %s5514_s25 = sphi %s5619_s25, %s6435_s25  }
  0x11   : > { %s377_s30 = sshll.u32 %s5528_s29, 4  ;;  %p3964_p0 = scmp.ge.s32.totalorder %s5526_s28, 1  ;;  %s5645_s30 = int_to_ptr.vmem [resolvable:$true] %s377_s30 }
  0x12   : > { %p6391_p1 = scmp.eq.s32.totalorder %s5640_s14, 0  ;;  %p362_p2 = scmp.lt.s32.totalorder %s5526_s28, 5 }
  0x13   : > { %s5529_s16 = smov [#allocation7]   ;;  %s5530_s19 = smov [#allocation10]  }
  0x14   : > { %p5647_p3 = pnand %p3964_p0, %p362_p2  ;;  %s390_s17 = sshll.u32 %s5529_s16, 4  ;;  %s5659_s17 = int_to_ptr.vmem [resolvable:$true] %s390_s17 }
  0x15   : > { %s5661_s20 = sshll.u32 %s5530_s19, 4  ;;  %s6409_s5 = sld [smem:[#allocation26_spill]]  ;;  %s417_s20 = int_to_ptr.vmem [resolvable:$true] %s5661_s20 }
  0x16   : > { %s6407_s15 = scalar_select %p5647_p3, 1, 0 }
  0x17   : > { %p4763_p4 = pneg %p5647_p3 }
  0x19   : > { %p5655_p5 = pnand %p4763_p4, %p6391_p1 }
  0x1b   : > { %s5216_s23 = scalar_lea.hbm %s6409_s5, 512  ;;  %p5671_p7 = pneg %p5655_p5 }
  0x1c   : > { %p5217_p6 = scmp.ne.s32.totalorder %s6409_s5, %s5216_s23  ;;  %p5223_p10 = scmp.lt.u32.totalorder %s5216_s23, %s6409_s5 }
  0x1e   : > { %p5219_p8 = pnand %p5671_p7, %p5217_p6 }
  0x20   : > { %p5220_p9 = pneg %p5219_p8 }
  0x22   : > { %p5225_p11 = pnand %p5223_p10, %p5220_p9 }
  0x24   : > { %5228 = shalt.err (!%p5225_p11)
}
  0x25   : > { %s5229_s21 = scalar_lea.vmem %s5645_s30, 512  ;;  %p5237_p2 = scmp.lt.s32.totalorder %s5645_s30, %s5645_s30 }
  0x26   : > { %p5230_p12 = scmp.ne.s32.totalorder %s5645_s30, %s5229_s21  ;;  %p5238_p4 = scmp.lt.s32.totalorder %s5229_s21, %s5229_s21 }
  0x28   : > { %p5232_p13 = pnand %p5230_p12, %p5671_p7  ;;  %p5239_p6 = por %p5238_p4, %p5237_p2 }
  0x2a   : > { %p5233_p0 = pneg %p5232_p13 }
  0x2c   : > { %p5240_p8 = pnand %p5239_p6, %p5233_p0 }
  0x2e   : > { %5243 = shalt.err (!%p5240_p8)
}
  0x2f   : > { %s6390_s22 = smov 64   ;;  %s6393_s13 = smov 4  }
  0x30   : > { %4766 = dma.hbm_to_vmem [thread:$0]  (!%p5655_p5), %s6409_s5, 512, %s5645_s30, [#allocation5], %s6390_s22, %s6390_s22, %s6393_s13  }
  0x31   : > { %s5244_s21 = scalar_lea.hbm %s6381_s6, 2048 }
  0x32   : > { %p5245_p9 = scmp.ne.s32.totalorder %s6381_s6, %s5244_s21  ;;  %p5251_p12 = scmp.lt.u32.totalorder %s5244_s21, %s6381_s6 }
  0x34   : > { %p5247_p10 = pnand %p5245_p9, %p5671_p7 }
  0x36   : > { %p5248_p11 = pneg %p5247_p10 }
  0x38   : > { %p5253_p13 = pnand %p5251_p12, %p5248_p11 }
  0x3a   : > { %5256 = shalt.err (!%p5253_p13)
}
  0x3b   : > { %s5257_s30 = scalar_lea.vmem %s5659_s17, 2048  ;;  %p5265_p6 = scmp.lt.s32.totalorder %s5659_s17, %s5659_s17 }
  0x3c   : > { %p5258_p0 = scmp.ne.s32.totalorder %s5659_s17, %s5257_s30  ;;  %p5266_p8 = scmp.lt.s32.totalorder %s5257_s30, %s5257_s30 }
  0x3e   : > { %p5260_p2 = pnand %p5258_p0, %p5671_p7  ;;  %p5267_p9 = por %p5266_p8, %p5265_p6 }
  0x40   : > { %p5261_p4 = pneg %p5260_p2 }
  0x42   : > { %p5268_p10 = pnand %p5267_p9, %p5261_p4 }
  0x44   : > { %5271 = shalt.err (!%p5268_p10)
}
  0x45   : > { %s6394_s4 = smov 128   ;;  %s6396_s0 = smov 8  }
  0x46   : > { %4769 = dma.hbm_to_vmem [thread:$0]  (!%p5655_p5), %s6381_s6, 2048, %s5659_s17, [#allocation8], %s6394_s4, %s6394_s4, %s6396_s0  }
  0x47   : > { %s5272_s29 = scalar_lea.hbm %s6383_s8, 2048 }
  0x48   : > { %p5273_p11 = scmp.ne.s32.totalorder %s6383_s8, %s5272_s29  ;;  %p5279_p0 = scmp.lt.u32.totalorder %s5272_s29, %s6383_s8 }
  0x4a   : > { %p5275_p12 = pnand %p5273_p11, %p5671_p7 }
  0x4c   : > { %p5276_p13 = pneg %p5275_p12 }
  0x4e   : > { %p5281_p2 = pnand %p5279_p0, %p5276_p13 }
  0x50   : > { %5284 = shalt.err (!%p5281_p2)
}
  0x51   : > { %s5285_s1 = scalar_lea.vmem %s417_s20, 2048  ;;  %p5293_p9 = scmp.lt.s32.totalorder %s417_s20, %s417_s20 }
  0x52   : > { %p5286_p4 = scmp.ne.s32.totalorder %s417_s20, %s5285_s1  ;;  %p5294_p10 = scmp.lt.s32.totalorder %s5285_s1, %s5285_s1 }
  0x54   : > { %p5288_p6 = pnand %p5286_p4, %p5671_p7  ;;  %p5295_p1 = por %p5294_p10, %p5293_p9 }
  0x56   : > { %p5289_p8 = pneg %p5288_p6 }
  0x58   : > { %p5296_p3 = pnand %p5295_p1, %p5289_p8 }
  0x5a   : > { %5299 = shalt.err (!%p5296_p3)
}
  0x5b   : > { %4775 = dma.hbm_to_vmem [thread:$0]  (!%p5655_p5), %s6383_s8, 2048, %s417_s20, [#allocation11], %s6394_s4, %s6394_s4, %s6396_s0  }
  0x5c   : > { %s5535_s12 = smov [#allocation13]   ;;  %s5536_s24 = smov [#allocation9]  }
  0x5d   : > { %s442_s23 = sshll.u32 %s5535_s12, 4  ;;  %s403_s29 = sshll.u32 %s5536_s24, 4  ;;  %s443_s23 = int_to_ptr.vmem [resolvable:$true] %s442_s23  ;;  %s404_s29 = int_to_ptr.vmem [resolvable:$true] %s403_s29 }
  0x5e   : > { %s5300_s30 = scalar_lea.hbm %s6385_s10, 16384 }
  0x5f   : > { %p5301_p1 = scmp.ne.s32.totalorder %s6385_s10, %s5300_s30  ;;  %p5307_p12 = scmp.lt.u32.totalorder %s5300_s30, %s6385_s10 }
  0x61   : > { %p5303_p3 = pnand %p5301_p1, %p5671_p7 }
  0x63   : > { %p5304_p11 = pneg %p5303_p3 }
  0x65   : > { %p5309_p13 = pnand %p5307_p12, %p5304_p11 }
  0x67   : > { %5312 = shalt.err (!%p5309_p13)
}
  0x68   : > { %s5313_s20 = scalar_lea.vmem %s443_s23, 16384  ;;  %p5321_p6 = scmp.lt.s32.totalorder %s443_s23, %s443_s23 }
  0x69   : > { %p5314_p0 = scmp.ne.s32.totalorder %s443_s23, %s5313_s20  ;;  %p5322_p8 = scmp.lt.s32.totalorder %s5313_s20, %s5313_s20 }
  0x6b   : > { %p5316_p2 = pnand %p5314_p0, %p5671_p7  ;;  %p5323_p9 = por %p5322_p8, %p5321_p6 }
  0x6d   : > { %p5317_p4 = pneg %p5316_p2 }
  0x6f   : > { %p5324_p10 = pnand %p5323_p9, %p5317_p4 }
  0x71   : > { %5327 = shalt.err (!%p5324_p10)
}
  0x72   : > { %s6398_s13 = smov 256   ;;  %s6399_s22 = smov 16  }
  0x73   : > { %4781 = dma.hbm_to_vmem [thread:$0]  (!%p5655_p5), %s6385_s10, 16384, %s443_s23, [#allocation14], %s6398_s13, %s6398_s13, %s6399_s22  }
  0x74   : > { %s5328_s21 = scalar_lea.hbm %s6382_s7, 1024 }
  0x75   : > { %p5329_p1 = scmp.ne.s32.totalorder %s6382_s7, %s5328_s21  ;;  %p5335_p12 = scmp.lt.u32.totalorder %s5328_s21, %s6382_s7 }
  0x77   : > { %p5331_p3 = pnand %p5329_p1, %p5671_p7 }
  0x79   : > { %p5332_p11 = pneg %p5331_p3 }
  0x7b   : > { %p5337_p13 = pnand %p5335_p12, %p5332_p11 }
  0x7d   : > { %5340 = shalt.err (!%p5337_p13)
}
  0x7e   : > { %s5341_s5 = scalar_lea.vmem %s404_s29, 1024  ;;  %p5349_p6 = scmp.lt.s32.totalorder %s404_s29, %s404_s29 }
  0x7f   : > { %p5342_p0 = scmp.ne.s32.totalorder %s404_s29, %s5341_s5  ;;  %p5350_p8 = scmp.lt.s32.totalorder %s5341_s5, %s5341_s5 }
  0x81   : > { %p5344_p2 = pnand %p5342_p0, %p5671_p7  ;;  %p5351_p9 = por %p5350_p8, %p5349_p6 }
  0x83   : > { %p5345_p4 = pneg %p5344_p2 }
  0x85   : > { %p5352_p10 = pnand %p5351_p9, %p5345_p4 }
  0x87   : > { %5355 = shalt.err (!%p5352_p10)
}
  0x88   : > { %s6411_s23 = smov 4   ;;  %s6412_s12 = smov 64  }
  0x89   : > { %4772 = dma.hbm_to_vmem [thread:$0]  (!%p5655_p5), %s6382_s7, 1024, %s404_s29, [#allocation8], %s6412_s12, %s6412_s12, %s6411_s23  }
  0x8a   : > { %s5539_s21 = smov [#allocation12]   ;;  %s5540_s1 = smov [#allocation15]  }
  0x8b   : > { %s429_s30 = sshll.u32 %s5539_s21, 4  ;;  %s455_s17 = sshll.u32 %s5540_s1, 4  ;;  %s430_s30 = int_to_ptr.vmem [resolvable:$true] %s429_s30  ;;  %s456_s17 = int_to_ptr.vmem [resolvable:$true] %s455_s17 }
  0x8c   : > { %s5356_s4 = scalar_lea.hbm %s6384_s9, 8192 }
  0x8d   : > { %p5357_p1 = scmp.ne.s32.totalorder %s6384_s9, %s5356_s4  ;;  %p5363_p12 = scmp.lt.u32.totalorder %s5356_s4, %s6384_s9 }
  0x8f   : > { %p5359_p3 = pnand %p5357_p1, %p5671_p7 }
  0x91   : > { %p5360_p11 = pneg %p5359_p3 }
  0x93   : > { %p5365_p13 = pnand %p5363_p12, %p5360_p11 }
  0x95   : > { %5368 = shalt.err (!%p5365_p13)
}
  0x96   : > { %s5369_s29 = scalar_lea.vmem %s430_s30, 8192  ;;  %p5377_p6 = scmp.lt.s32.totalorder %s430_s30, %s430_s30 }
  0x97   : > { %p5370_p0 = scmp.ne.s32.totalorder %s430_s30, %s5369_s29  ;;  %p5378_p8 = scmp.lt.s32.totalorder %s5369_s29, %s5369_s29 }
  0x99   : > { %p5372_p2 = pnand %p5370_p0, %p5671_p7  ;;  %p5379_p9 = por %p5378_p8, %p5377_p6 }
  0x9b   : > { %p5373_p4 = pneg %p5372_p2 }
  0x9d   : > { %p5380_p10 = pnand %p5379_p9, %p5373_p4 }
  0x9f   : > { %5383 = shalt.err (!%p5380_p10)
}
  0xa0   : > { %s6413_s0 = smov 16   ;;  %s6414_s13 = smov 256  }
  0xa1   : > { %4778 = dma.hbm_to_vmem [thread:$0]  (!%p5655_p5), %s6384_s9, 8192, %s430_s30, [#allocation11], %s6414_s13, %s6414_s13, %s6413_s0  }
  0xa2   : > { %s5384_s19 = scalar_lea.hbm %s6386_s11, 1024 }
  0xa3   : > { %p5385_p1 = scmp.ne.s32.totalorder %s6386_s11, %s5384_s19  ;;  %p5391_p12 = scmp.lt.u32.totalorder %s5384_s19, %s6386_s11 }
  0xa5   : > { %p5387_p3 = pnand %p5385_p1, %p5671_p7 }
  0xa7   : > { %p5388_p11 = pneg %p5387_p3 }
  0xa9   : > { %p5393_p13 = pnand %p5391_p12, %p5388_p11 }
  0xab   : > { %5396 = shalt.err (!%p5393_p13)
}
  0xac   : > { %s5397_s24 = scalar_lea.vmem %s456_s17, 1024  ;;  %p5405_p6 = scmp.lt.s32.totalorder %s456_s17, %s456_s17 }
  0xad   : > { %p5398_p0 = scmp.ne.s32.totalorder %s456_s17, %s5397_s24  ;;  %p5406_p8 = scmp.lt.s32.totalorder %s5397_s24, %s5397_s24 }
  0xaf   : > { %p5400_p2 = pnand %p5398_p0, %p5671_p7  ;;  %p5407_p9 = por %p5406_p8, %p5405_p6 }
  0xb1   : > { %p5401_p4 = pneg %p5400_p2 }
  0xb3   : > { %p5408_p10 = pnand %p5407_p9, %p5401_p4 }
  0xb5   : > { %5411 = shalt.err (!%p5408_p10)
}
  0xb6   : > { %s5541_s30 = smov 512   ;;  %s5542_s16 = smov 32  }
  0xb7   : > { %4784 = dma.hbm_to_vmem [thread:$0]  (!%p5655_p5), %s6386_s11, 1024, %s456_s17, [#allocation14], %s5541_s30, %s5541_s30, %s5542_s16  }
  0xb8   : > { %s5825_s13 = sadd.s32 1, %s5526_s28   ;;  %s92_s4 = sadd.s32 1, %s5522_s27 }
  0xb9   : > { %s89_s22 = ssub.s32 %s5526_s28, %s5825_s13  ;;  %p99_p1 = scmp.ne.s32.totalorder %s5522_s27, %s5518_s26 }
  0xba   : > { %p90_p7 = scmp.eq.s32.totalorder %s89_s22, 0  ;;  %p100_p3 = scmp.eq.s32.totalorder %s5526_s28, 0 }
  0xbb   : > { %p105_p11 = scmp.ne.s32.totalorder %s5518_s26, %s5514_s25  ;;  %p6415_p13 = scmp.eq.s32.totalorder %s5640_s14, 0 }
  0xbc   : > { %s5836_s23 = scalar_select %p90_p7, %s5522_s27, %s92_s4  }
  0xbd   : > { %p101_p12 = por %p100_p3, %p99_p1  ;;  %p5840_p0 = por %p6415_p13, %p105_p11 }
  0xbe   : > { %p4799_p2 = scmp.lt.s32.totalorder %s5526_s28, 4  ;;  %s485_s18 = sand.u32 1, %s5522_s27  }
  0xbf   : > { %s3973_s17 = sshll.u32 %s485_s18, 4  ;;  %s4259_s19 = sshll.u32 %s5526_s28, 8 }
  0xc0   : > { %s6417_s2 = sld [smem:[#allocation24_spill]]  ;;  %s489_s25 = scalar_lea.vmem [#allocation2], %s3973_s17 }
  0xc1   : > { %s496_s5 = sshll.u32 %s489_s25, 4  ;;  %p5854_p5 = pnand %p4799_p2, %p101_p12  ;;  %s5852_s5 = int_to_ptr.vmem [resolvable:$true] %s496_s5 }
  0xc2   : > { %s5861_s29 = scalar_lea.hbm %s6378_s3, %s4259_s19  ;;  %s510_s0 = scalar_lea.vmem [#allocation4], %s3973_s17 }
  0xc3   : > { %s5863_s22 = sshll.u32 %s510_s0, 4  ;;  %s5865_s4 = scalar_lea.sflag [#allocation3], %s485_s18  ;;  %s5897_s22 = int_to_ptr.vmem [resolvable:$true] %s5863_s22 }
  0xc4   : > { %p5414_p6 = pneg %p5854_p5 }
  0xc6   : > { %s5850_s20 = scalar_lea.hbm %s6417_s2, %s4259_s19  ;;  %s5417_s30 = scalar_lea.hbm %s6417_s2, 1024 }
  0xc7   : > { %s5412_s21 = scalar_lea.hbm %s5850_s20, 256  ;;  %p5418_p10 = scmp.lt.u32.totalorder %s5850_s20, %s6417_s2 }
  0xc8   : > { %p5413_p4 = scmp.ne.s32.totalorder %s5850_s20, %s5412_s21  ;;  %p5419_p7 = scmp.lt.u32.totalorder %s5417_s30, %s5412_s21 }
  0xc9   : > { %p5421_p3 = scmp.lt.u32.totalorder %s5412_s21, %s5850_s20 }
  0xca   : > { %p5415_p8 = pnand %p5414_p6, %p5413_p4  ;;  %p5420_p1 = por %p5419_p7, %p5418_p10 }
  0xcc   : > { %p5416_p9 = pneg %p5415_p8  ;;  %p5422_p11 = por %p5421_p3, %p5420_p1 }
  0xce   : > { %p5423_p12 = pnand %p5422_p11, %p5416_p9 }
  0xd0   : > { %5426 = shalt.err (!%p5423_p12)
}
  0xd1   : > { %s5427_s18 = scalar_lea.vmem %s5852_s5, 256  ;;  %s5543_s17 = smov [#allocation2]  }
  0xd2   : > { %p5428_p13 = scmp.ne.s32.totalorder %s5852_s5, %s5427_s18  ;;  %s5432_s0 = sshll.u32 %s5543_s17, 4  ;;  %s5433_s0 = int_to_ptr.vmem [resolvable:$false] %s5432_s0 }
  0xd3   : > { %s5434_s1 = scalar_lea.vmem %s5433_s0, 512  ;;  %p5435_p8 = scmp.lt.s32.totalorder %s5852_s5, %s5433_s0 }
  0xd4   : > { %p5430_p2 = pnand %p5428_p13, %p5414_p6  ;;  %p5436_p10 = scmp.lt.s32.totalorder %s5434_s1, %s5427_s18 }
  0xd6   : > { %p5431_p4 = pneg %p5430_p2  ;;  %p5437_p7 = por %p5436_p10, %p5435_p8 }
  0xd8   : > { %p5438_p1 = pnand %p5437_p7, %p5431_p4 }
  0xda   : > { %5441 = shalt.err (!%p5438_p1)
}
  0xdb   : > { %s6419_s21 = smov 8   ;;  %s6420_s25 = smov 128  }
  0xdc   : > { %4788 = dma.hbm_to_vmem [thread:$0]  (!%p5854_p5), %s5850_s20, 256, %s5852_s5, %s5865_s4, %s6420_s25, %s6420_s25, %s6419_s21  }
  0xdd   : > { %s506_s30 = sand.u32 1, %s5526_s28   ;;  %s5442_s19 = scalar_lea.hbm %s5861_s29, 256 }
  0xde   : > { %s5900_s16 = scalar_lea.sflag [#allocation5], %s506_s30  ;;  %p5443_p9 = scmp.ne.s32.totalorder %s5861_s29, %s5442_s19 }
  0xdf   : > { %s5447_s0 = scalar_lea.hbm %s6378_s3, 1024  ;;  %p5448_p12 = scmp.lt.u32.totalorder %s5861_s29, %s6378_s3 }
  0xe0   : > { %p5445_p3 = pnand %p5443_p9, %p5414_p6  ;;  %p5449_p13 = scmp.lt.u32.totalorder %s5447_s0, %s5442_s19 }
  0xe1   : > { %p5451_p4 = scmp.lt.u32.totalorder %s5442_s19, %s5861_s29 }
  0xe2   : > { %p5446_p11 = pneg %p5445_p3  ;;  %p5450_p2 = por %p5449_p13, %p5448_p12 }
  0xe4   : > { %p5452_p8 = por %p5451_p4, %p5450_p2 }
  0xe6   : > { %p5453_p10 = pnand %p5452_p8, %p5446_p11 }
  0xe8   : > { %5456 = shalt.err (!%p5453_p10)
}
  0xe9   : > { %s5457_s28 = scalar_lea.vmem %s5897_s22, 256  ;;  %s5544_s20 = smov [#allocation4]  }
  0xea   : > { %p5458_p7 = scmp.ne.s32.totalorder %s5897_s22, %s5457_s28  ;;  %s5462_s5 = sshll.u32 %s5544_s20, 4  ;;  %s5463_s5 = int_to_ptr.vmem [resolvable:$false] %s5462_s5 }
  0xeb   : > { %s5464_s2 = scalar_lea.vmem %s5463_s5, 512  ;;  %p5465_p3 = scmp.lt.s32.totalorder %s5897_s22, %s5463_s5 }
  0xec   : > { %p5460_p1 = pnand %p5458_p7, %p5414_p6  ;;  %p5466_p12 = scmp.lt.s32.totalorder %s5464_s2, %s5457_s28 }
  0xee   : > { %p5461_p9 = pneg %p5460_p1  ;;  %p5467_p13 = por %p5466_p12, %p5465_p3 }
  0xf0   : > { %p5468_p2 = pnand %p5467_p13, %p5461_p9 }
  0xf2   : > { %5471 = shalt.err (!%p5468_p2)
}
  0xf3   : > { %4791 = dma.hbm_to_vmem [thread:$0]  (!%p5854_p5), %s5861_s29, 256, %s5897_s22, %s5900_s16, %s6420_s25, %s6420_s25, %s6419_s21  }
  0xf4   : > { %p6421_p6 = scmp.ne.s32.totalorder %s6407_s15, 0 }
  0xf5   : > { %s531_s4 = sand.u32 (!%p6421_p6), 1, %s5518_s26  }
  0xf6   : > { %529 = sbr.rel (%p6421_p6) target bundleno = 3107 (0xc23), region = 68  ;;  %s5932_s30 = sshll.u32 (!%p6421_p6), %s531_s4, 4 }
  0xf7   : > { %s532_s19 = scalar_lea.sflag (!%p6421_p6), [#allocation3], %s531_s4  ;;  %s535_s18 = scalar_lea.vmem (!%p6421_p6), [#allocation2], %s5932_s30 }
  0xfd   : > { %5489 = dma.done.wait (%p5840_p0), %s532_s19, 256  }
  0xfe   : > { %5491 = vsyncadd (%p5840_p0), %s532_s19, 4294967040  ;;  %s540_s24 = sand.u32 1, %s5640_s14   ;;  %s544_s15 = scalar_lea.vmem [#allocation4], %s5932_s30 }
  0xff   : > { %s541_s29 = scalar_lea.sflag [#allocation5], %s540_s24 }
 0x100   : > { %5493 = dma.done.wait (%p5840_p0), %s541_s29, 256  }
 0x101   : > { %5495 = vsyncadd (%p5840_p0), %s541_s29, 4294967040  ;;  %p6422_p5 = scmp.eq.s32.totalorder %s5640_s14, 0 }
 0x103   : > { %5497 = dma.done.wait (%p6422_p5), [#allocation5], 512   ;;  %p6423_p11 = pmov %p6422_p5 }
 0x104   : > { %p6424_p4 = pmov %p6422_p5 }
 0x105   : > { %5499 = vsyncadd (%p6423_p11), [#allocation5], 4294966784 }
 0x106   : > { %5501 = dma.done.wait (%p6424_p4), [#allocation8], 3072   ;;  %p6425_p8 = pmov %p6424_p4 }
 0x107   : > { %p6426_p10 = pmov %p6424_p4 }
 0x108   : > { %5503 = vsyncadd (%p6425_p8), [#allocation8], 4294964224 }
 0x109   : > { %5505 = dma.done.wait (%p6426_p10), [#allocation11], 10240   ;;  %p6427_p7 = pmov %p6424_p4 }
 0x10a   : > { %p6428_p0 = pmov %p6424_p4 }
 0x10b   : > { %5507 = vsyncadd (%p6427_p7), [#allocation11], 4294957056 }
 0x10c   : > { %5509 = dma.done.wait (%p6428_p0), [#allocation14], 17408   ;;  %p6429_p1 = pmov %p6428_p0 }
 0x10d   : > { %p635_p9 = scmp.lt.s32.totalorder %s5640_s14, 3  ;;  %v5545_v0 = vmov 0   ;;  %s6430_s25 = sld [smem:[#allocation23_spill]]  ;;  %v5546_v44 = vmov 1   ;;  %vm1065_vm0 = vcmask 261120   ;;  %vm1462_vm1 = vcmask 523264  }
 0x10e   : > { %5511 = vsyncadd (%p6429_p1), [#allocation14], 4294949888  ;;  %4858 = vset.pattern.permute.xlu1 %v5545_v0  ;;  %4860 = vset.pattern.permute.xlu0 %v5545_v0  ;;  %s6431_s1 = sld [smem:[#allocation22_spill]]  ;;  %s6432_s2 = sld [smem:[#allocation25_spill]]  ;;  %vm5548_vm2 = vmmov 0  }
 0x10f   : > { %s6440_s14 = smov (!%p635_p9, %s5640_s14), 3 }
 0x110   : > { %s4261_s12 = sshll.u32 %s6440_s14, 7  ;;  %s4264_s30 = sshll.u32 %s6440_s14, 6 }
 0x113   : > { %s5971_s16 = scalar_lea.vmem %s6430_s25, %s4261_s12 }
 0x114   : > { %v672_v1 = vld [vmem:[%s5971_s16] sm:$0xff]  ;;  %v673_v2 = vld [vmem:[%s5971_s16 + $0x8] sm:$0xff]  ;;  %v674_v3 = vld [vmem:[%s5971_s16 + $0x10] sm:$0xff]  ;;  %s5982_s28 = scalar_lea.vmem %s6431_s1, %s4261_s12  ;;  %s6434_s1 = sld [smem:[#allocation28_spill]] }
 0x115   : > { %v4611_v4 = vpack.c.bf16 %v673_v2, %v672_v1  ;;  %v675_v5 = vld [vmem:[%s5971_s16 + $0x18] sm:$0xff]  ;;  %v676_v7 = vld [vmem:[%s5971_s16 + $0x20] sm:$0xff]  ;;  %v677_v8 = vld [vmem:[%s5971_s16 + $0x28] sm:$0xff] }
 0x116   : > { %v4615_v6 = vpack.c.bf16 %v675_v5, %v674_v3  ;;  %v4619_v9 = vpack.c.bf16 %v677_v8, %v676_v7  ;;  %v5985_v10 = vld [vmem:[%s5982_s28] sm:$0xff]  ;;  %v678_v11 = vld [vmem:[%s5971_s16 + $0x30] sm:$0xff]  ;;  %v679_v12 = vld [vmem:[%s5971_s16 + $0x38] sm:$0xff] }
 0x117   : > { %4612 = vmatprep.subr.bf16.mxu0 %v4611_v4  ;;  %4420 = vmatprep.mubr.f32.mxu0 %v5985_v10  ;;  %v4623_v13 = vpack.c.bf16 %v679_v12, %v678_v11  ;;  %v680_v14 = vld [vmem:[%s5971_s16 + $0x40] sm:$0xff]  ;;  %v681_v15 = vld [vmem:[%s5971_s16 + $0x48] sm:$0xff]  ;;  %v682_v16 = vld [vmem:[%s5971_s16 + $0x50] sm:$0xff] }
 0x118   : > { %4614 = vmatpush3.bf16.msra.mxu0 %v4611_v4  ;;  %v683_v17 = vld [vmem:[%s5971_s16 + $0x58] sm:$0xff]  ;;  %v4627_v18 = vpack.c.bf16 %v681_v15, %v680_v14  ;;  %v684_v19 = vld [vmem:[%s5971_s16 + $0x60] sm:$0xff]  ;;  %v685_v20 = vld [vmem:[%s5971_s16 + $0x68] sm:$0xff] }
 0x119   : > { %4616 = vmatprep.subr.bf16.mxu0 %v4615_v6  ;;  %v4631_v21 = vpack.c.bf16 %v683_v17, %v682_v16  ;;  %v686_v22 = vld [vmem:[%s5971_s16 + $0x70] sm:$0xff]  ;;  %v687_v23 = vld [vmem:[%s5971_s16 + $0x78] sm:$0xff]  ;;  %v4635_v24 = vpack.c.bf16 %v685_v20, %v684_v19  ;;  %v5999_v26 = vld [vmem:[%s5982_s28 + $0x8] sm:$0xff]  ;;  %s6433_s16 = sld [smem:[#allocation27_spill]] }
 0x11a   : > { %v4639_v25 = vpack.c.bf16 %v687_v23, %v686_v22  ;;  %v6002_v27 = vld [vmem:[%s5982_s28 + $0x10] sm:$0xff]  ;;  %v6005_v28 = vld [vmem:[%s5982_s28 + $0x18] sm:$0xff]  ;;  %v6009_v29 = vld [vmem:[%s5982_s28 + $0x20] sm:$0xff] }
 0x11b   : > { %v6013_v30 = vld [vmem:[%s5982_s28 + $0x28] sm:$0xff]  ;;  %v6017_v31 = vld [vmem:[%s5982_s28 + $0x30] sm:$0xff]  ;;  %v6021_v32 = vld [vmem:[%s5982_s28 + $0x38] sm:$0xff] }
 0x11c   : > { %4618 = vmatpush3.bf16.msra.mxu0 %v4615_v6  ;;  %v6025_v33 = vld [vmem:[%s5982_s28 + $0x40] sm:$0xff]  ;;  %v6029_v34 = vld [vmem:[%s5982_s28 + $0x48] sm:$0xff]  ;;  %v6033_v35 = vld [vmem:[%s5982_s28 + $0x50] sm:$0xff] }
 0x11d   : > { %4620 = vmatprep.subr.bf16.mxu0 %v4619_v9  ;;  %v6037_v36 = vld [vmem:[%s5982_s28 + $0x58] sm:$0xff]  ;;  %v6041_v37 = vld [vmem:[%s5982_s28 + $0x60] sm:$0xff]  ;;  %v6045_v38 = vld [vmem:[%s5982_s28 + $0x68] sm:$0xff] }
 0x11e   : > { %v6049_v39 = vld [vmem:[%s5982_s28 + $0x70] sm:$0xff]  ;;  %v6053_v40 = vld [vmem:[%s5982_s28 + $0x78] sm:$0xff]  ;;  %v1060_v46 = vld [vmem:[%s6432_s2] sm:$0xff]  ;;  %s654_s28 = scalar_lea.vmem %s6434_s1, %s4264_s30 }
 0x11f   : > { %v1061_v47 = vld [vmem:[%s6432_s2 + $0x8] sm:$0xff]  ;;  %v1062_v51 = vld [vmem:[%s6432_s2 + $0x10] sm:$0xff]  ;;  %v1063_v52 = vld [vmem:[%s6432_s2 + $0x18] sm:$0xff] }
 0x120   : > { %4622 = vmatpush3.bf16.msra.mxu0 %v4619_v9  ;;  %v4643_v48 = vpack.c.bf16 %v1061_v47, %v1060_v46  ;;  %v4647_v53 = vpack.c.bf16 %v1063_v52, %v1062_v51  ;;  %v6072_v3 = vld [vmem:[#allocation15] ss:$0 sm:$0xff]  ;;  %v6074_v4 = vld [vmem:[#allocation15 + $0x1] ss:$0 sm:$0xff]  ;;  %v6079_v11 = vld [vmem:[#allocation15 + $0x2] ss:$0 sm:$0xff] }
 0x121   : > { %4624 = vmatprep.subr.bf16.mxu0 %v4623_v13 }
 0x122   : > { %4644 = vmatprep.subr.bf16.mxu1 %v4643_v48 }
 0x123   : > { %4646 = vmatpush3.bf16.msra.mxu1 %v4643_v48 }
 0x124   : > { %4626 = vmatpush3.bf16.msra.mxu0 %v4623_v13  ;;  %4648 = vmatprep.subr.bf16.mxu1 %v4647_v53 }
 0x125   : > { %4628 = vmatprep.subr.bf16.mxu0 %v4627_v18 }
 0x127   : > { %4650 = vmatpush3.bf16.msra.mxu1 %v4647_v53 }
 0x128   : > { %4630 = vmatpush3.bf16.msra.mxu0 %v4627_v18 }
 0x129   : > { %4632 = vmatprep.subr.bf16.mxu0 %v4631_v21 }
 0x12c   : > { %4634 = vmatpush3.bf16.msra.mxu0 %v4631_v21 }
 0x12d   : > { %4636 = vmatprep.subr.bf16.mxu0 %v4635_v24 }
 0x130   : > { %4638 = vmatpush3.bf16.msra.mxu0 %v4635_v24 }
 0x131   : > { %4640 = vmatprep.subr.bf16.mxu0 %v4639_v25 }
 0x134   : > { %4642 = vmatpush3.bf16.msra.mxu0 %v4639_v25 }
 0x137   : > { %4421 = vmatmul.mubr.f32.vlgmr.msra.gmra.mrb[0].mxu0 %v5999_v26 }
 0x138   : > { %4423 = vmatprep.mubr.f32.mxu0 %v6002_v27 }
 0x13b   : > { %4424 = vmatmul.mubr.f32.gmra.mrb[2].mxu0 %v6005_v28 }
 0x13c   : > { %4426 = vmatprep.mubr.f32.mxu0 %v6009_v29 }
 0x13f   : > { %4427 = vmatmul.mubr.f32.gmra.mrb[4].mxu0 %v6013_v30 }
 0x140   : > { %4429 = vmatprep.mubr.f32.mxu0 %v6017_v31 }
 0x143   : > { %4430 = vmatmul.mubr.f32.gmra.mrb[6].mxu0 %v6021_v32 }
 0x144   : > { %4432 = vmatprep.mubr.f32.mxu0 %v6025_v33 }
 0x147   : > { %4433 = vmatmul.mubr.f32.gmra.mrb[8].mxu0 %v6029_v34 }
 0x148   : > { %4435 = vmatprep.mubr.f32.mxu0 %v6033_v35 }
 0x14b   : > { %4436 = vmatmul.mubr.f32.gmra.mrb[10].mxu0 %v6037_v36 }
 0x14c   : > { %4438 = vmatprep.mubr.f32.mxu0 %v6041_v37 }
 0x14f   : > { %4439 = vmatmul.mubr.f32.gmra.mrb[12].mxu0 %v6045_v38 }
 0x150   : > { %4441 = vmatprep.mubr.f32.mxu0 %v6049_v39 }
 0x153   : > { %4442 = vmatmul.mubr.f32.gmra.mrb[14].mxu0 %v6053_v40 }
 0x20a   : > { %v4422_v41 = vpop.f32.mrb[0].mxu0 }
 0x20b   : > { %841 = vperm.xlu1 %4858, %v4422_v41   ;;  %v754_v42 = vpop.f32.mrb[1].mxu0 }
 0x20c   : > { %836 = vperm.xlu0 %4860, %v754_v42  }
 0x20e   : > { %v4425_v43 = vpop.f32.mrb[2].mxu0 }
 0x20f   : > { %4859 = vset.pattern.permute.xlu1 %v5546_v44  ;;  %v764_v45 = vpop.f32.mrb[3].mxu0 }
 0x210   : > { %936 = vperm.xlu1 %4859, %v4422_v41   ;;  %4861 = vset.pattern.permute.xlu0 %v5546_v44 }
 0x211   : > { %932 = vperm.xlu0 %4861, %v754_v42  }
 0x212   : > { %v4428_v49 = vpop.f32.mrb[4].mxu0 }
 0x213   : > { %v774_v50 = vpop.f32.mrb[5].mxu0 }
 0x214   : > { %4862 = vset.pattern.permute.xlu1 %v5545_v0 }
 0x215   : > { %944 = vperm.xlu0 %4861, %v4425_v43   ;;  %851 = vperm.xlu1 %4862, %v4425_v43  }
 0x216   : > { %v4431_v54 = vpop.f32.mrb[6].mxu0 }
 0x217   : > { %v784_v55 = vpop.f32.mrb[7].mxu0 }
 0x219   : > { %940 = vperm.xlu0 %4861, %v764_v45   ;;  %846 = vperm.xlu1 %4862, %v764_v45  }
 0x21a   : > { %v4434_v56 = vpop.f32.mrb[8].mxu0 }
 0x21b   : > { %v794_v57 = vpop.f32.mrb[9].mxu0 }
 0x21d   : > { %952 = vperm.xlu0 %4861, %v4428_v49   ;;  %861 = vperm.xlu1 %4862, %v4428_v49  }
 0x21e   : > { %v4437_v58 = vpop.f32.mrb[10].mxu0 }
 0x21f   : > { %v804_v59 = vpop.f32.mrb[11].mxu0 }
 0x221   : > { %948 = vperm.xlu0 %4861, %v774_v50   ;;  %856 = vperm.xlu1 %4862, %v774_v50  }
 0x222   : > { %v4440_v60 = vpop.f32.mrb[12].mxu0 }
 0x223   : > { %v814_v61 = vpop.f32.mrb[13].mxu0 }
 0x225   : > { %960 = vperm.xlu0 %4861, %v4431_v54   ;;  %871 = vperm.xlu1 %4862, %v4431_v54  }
 0x226   : > { %v4443_v62 = vpop.f32.mrb[14].mxu0 }
 0x227   : > { %v824_v63 = vpop.f32.mrb[15].mxu0 }
 0x229   : > { %956 = vperm.xlu0 %4861, %v784_v55   ;;  %866 = vperm.xlu1 %4862, %v784_v55  }
 0x22d   : > { %968 = vperm.xlu0 %4861, %v4434_v56   ;;  %881 = vperm.xlu1 %4862, %v4434_v56  }
 0x231   : > { %964 = vperm.xlu0 %4861, %v794_v57   ;;  %876 = vperm.xlu1 %4862, %v794_v57  }
 0x235   : > { %976 = vperm.xlu0 %4861, %v4437_v58   ;;  %891 = vperm.xlu1 %4862, %v4437_v58  }
 0x239   : > { %972 = vperm.xlu0 %4861, %v804_v59   ;;  %886 = vperm.xlu1 %4862, %v804_v59  }
 0x23d   : > { %984 = vperm.xlu0 %4861, %v4440_v60   ;;  %901 = vperm.xlu1 %4862, %v4440_v60  }
 0x241   : > { %980 = vperm.xlu0 %4861, %v814_v61   ;;  %896 = vperm.xlu1 %4862, %v814_v61  }
 0x245   : > { %988 = vperm.xlu0 %4861, %v824_v63   ;;  %906 = vperm.xlu1 %4862, %v824_v63  }
 0x249   : > { %992 = vperm.xlu0 %4861, %v4443_v62   ;;  %911 = vperm.xlu1 %4862, %v4443_v62  }
 0x24d   : > { %4863 = vset.pattern.permute.xlu0 %v5545_v0 }
 0x28a   : > { %v842_v1 = vpop.permute.xlu1 %841 }
 0x28b   : > { %v837_v2 = vpop.permute.xlu0 %836  ;;  %v915_v6 = vmul.f32 %v842_v1, %v6072_v3 }
 0x28c   : > { %v914_v9 = vmul.f32 %v837_v2, %v6072_v3 }
 0x28f   : > { %v937_v5 = vpop.permute.xlu1 %936 }
 0x290   : > { %v996_v7 = vmul.f32 %v937_v5, %v6074_v4  ;;  %v933_v8 = vpop.permute.xlu0 %932 }
 0x291   : > { %v995_v12 = vmul.f32 %v933_v8, %v6074_v4 }
 0x292   : > { %v1012_v13 = vadd.f32 %v996_v7, %v915_v6 }
 0x293   : > { %v1011_v14 = vadd.f32 %v995_v12, %v914_v9 }
 0x294   : > { %v1029_v15 = vadd.f32 %v6079_v11, %v1012_v13  ;;  %v945_v16 = vpop.permute.xlu0 %944  ;;  %v852_v17 = vpop.permute.xlu1 %851 }
 0x295   : > { %v998_v18 = vmul.f32 %v945_v16, %v6074_v4  ;;  %v917_v19 = vmul.f32 %v852_v17, %v6072_v3  ;;  %v1028_v20 = vadd.f32 %v6079_v11, %v1011_v14 }
 0x296   : > { %v1045_v22 = vmax.f32 %v1029_v15, 0.0 }
 0x297   : > { %v1044_v21 = vmax.f32 %v1028_v20, 0.0  ;;  %v1014_v23 = vadd.f32 %v998_v18, %v917_v19 }
 0x298   : > { %v941_v24 = vpop.permute.xlu0 %940  ;;  %v847_v25 = vpop.permute.xlu1 %846 }
 0x299   : > { %v997_v41 = vmul.f32 %v941_v24, %v6074_v4  ;;  %v916_v42 = vmul.f32 %v847_v25, %v6072_v3  ;;  %4452 = vmatprep.mubr.msk.f32.mxu1 %vm1065_vm0, %v1044_v21  ;;  %v1031_v44 = vadd.f32 %v6079_v11, %v1014_v23 }
 0x29a   : > { %4453 = vmatmul.mubr.msk.f32.vlgmr.msra.gmra.mrb[0].mxu1 %vm1065_vm0, %v1045_v22 }
 0x29b   : > { %v1013_v43 = vadd.f32 %v997_v41, %v916_v42  ;;  %v1047_v51 = vmax.f32 %v1031_v44, 0.0 }
 0x29c   : > { %v953_v45 = vpop.permute.xlu0 %952  ;;  %v862_v46 = vpop.permute.xlu1 %861 }
 0x29d   : > { %v1030_v47 = vadd.f32 %v6079_v11, %v1013_v43  ;;  %v1000_v48 = vmul.f32 %v953_v45, %v6074_v4  ;;  %v919_v49 = vmul.f32 %v862_v46, %v6072_v3 }
 0x29f   : > { %v1046_v50 = vmax.f32 %v1030_v47, 0.0  ;;  %v1016_v52 = vadd.f32 %v1000_v48, %v919_v49 }
 0x2a0   : > { %v949_v53 = vpop.permute.xlu0 %948  ;;  %v857_v54 = vpop.permute.xlu1 %856 }
 0x2a1   : > { %v999_v55 = vmul.f32 %v949_v53, %v6074_v4  ;;  %v918_v56 = vmul.f32 %v857_v54, %v6072_v3  ;;  %4455 = vmatprep.mubr.msk.f32.mxu1 %vm1065_vm0, %v1046_v50  ;;  %v1033_v58 = vadd.f32 %v6079_v11, %v1016_v52 }
 0x2a2   : > { %4456 = vmatmul.mubr.msk.f32.gmra.mrb[2].mxu1 %vm1065_vm0, %v1047_v51 }
 0x2a3   : > { %v1015_v57 = vadd.f32 %v999_v55, %v918_v56  ;;  %v1049_v2 = vmax.f32 %v1033_v58, 0.0 }
 0x2a4   : > { %v961_v59 = vpop.permute.xlu0 %960  ;;  %v872_v60 = vpop.permute.xlu1 %871 }
 0x2a5   : > { %v1032_v61 = vadd.f32 %v6079_v11, %v1015_v57  ;;  %v1002_v62 = vmul.f32 %v961_v59, %v6074_v4  ;;  %v921_v63 = vmul.f32 %v872_v60, %v6072_v3 }
 0x2a7   : > { %v1048_v1 = vmax.f32 %v1032_v61, 0.0  ;;  %v1018_v5 = vadd.f32 %v1002_v62, %v921_v63 }
 0x2a8   : > { %v957_v6 = vpop.permute.xlu0 %956  ;;  %v867_v7 = vpop.permute.xlu1 %866 }
 0x2a9   : > { %v1001_v8 = vmul.f32 %v957_v6, %v6074_v4  ;;  %v920_v9 = vmul.f32 %v867_v7, %v6072_v3  ;;  %4458 = vmatprep.mubr.msk.f32.mxu1 %vm1065_vm0, %v1048_v1  ;;  %v1035_v13 = vadd.f32 %v6079_v11, %v1018_v5 }
 0x2aa   : > { %4459 = vmatmul.mubr.msk.f32.gmra.mrb[4].mxu1 %vm1065_vm0, %v1049_v2 }
 0x2ab   : > { %v1017_v12 = vadd.f32 %v1001_v8, %v920_v9  ;;  %v1051_v20 = vmax.f32 %v1035_v13, 0.0 }
 0x2ac   : > { %v969_v14 = vpop.permute.xlu0 %968  ;;  %v882_v15 = vpop.permute.xlu1 %881 }
 0x2ad   : > { %v1034_v16 = vadd.f32 %v6079_v11, %v1017_v12  ;;  %v1004_v17 = vmul.f32 %v969_v14, %v6074_v4  ;;  %v923_v18 = vmul.f32 %v882_v15, %v6072_v3 }
 0x2af   : > { %v1050_v19 = vmax.f32 %v1034_v16, 0.0  ;;  %v1020_v21 = vadd.f32 %v1004_v17, %v923_v18 }
 0x2b0   : > { %v965_v22 = vpop.permute.xlu0 %964  ;;  %v877_v23 = vpop.permute.xlu1 %876 }
 0x2b1   : > { %v1003_v24 = vmul.f32 %v965_v22, %v6074_v4  ;;  %v922_v25 = vmul.f32 %v877_v23, %v6072_v3  ;;  %4461 = vmatprep.mubr.msk.f32.mxu1 %vm1065_vm0, %v1050_v19  ;;  %v1037_v42 = vadd.f32 %v6079_v11, %v1020_v21 }
 0x2b2   : > { %4462 = vmatmul.mubr.msk.f32.gmra.mrb[6].mxu1 %vm1065_vm0, %v1051_v20 }
 0x2b3   : > { %v1019_v41 = vadd.f32 %v1003_v24, %v922_v25  ;;  %v1053_v49 = vmax.f32 %v1037_v42, 0.0 }
 0x2b4   : > { %v977_v43 = vpop.permute.xlu0 %976  ;;  %v892_v44 = vpop.permute.xlu1 %891 }
 0x2b5   : > { %v1036_v45 = vadd.f32 %v6079_v11, %v1019_v41  ;;  %v1006_v46 = vmul.f32 %v977_v43, %v6074_v4  ;;  %v925_v47 = vmul.f32 %v892_v44, %v6072_v3  ;;  %v4864_v44 = vld [vmem:[#allocation6] sm:$0xff]  }
 0x2b6   : > { %4532 = vmatprep.subr.bf16.mxu0 %v4864_v44 }
 0x2b7   : > { %v1052_v48 = vmax.f32 %v1036_v45, 0.0  ;;  %v1022_v50 = vadd.f32 %v1006_v46, %v925_v47  ;;  %v4865_v45 = vld [vmem:[#allocation6 + $0x8] sm:$0xff]   ;;  %4533 = vmatpush3.bf16.msra.mxu0 %v4864_v44 }
 0x2b8   : > { %v973_v51 = vpop.permute.xlu0 %972  ;;  %v887_v52 = vpop.permute.xlu1 %886  ;;  %4534 = vmatprep.subr.bf16.mxu0 %v4865_v45 }
 0x2b9   : > { %v1005_v53 = vmul.f32 %v973_v51, %v6074_v4  ;;  %v924_v54 = vmul.f32 %v887_v52, %v6072_v3  ;;  %4464 = vmatprep.mubr.msk.f32.mxu1 %vm1065_vm0, %v1052_v48  ;;  %v1039_v56 = vadd.f32 %v6079_v11, %v1022_v50 }
 0x2ba   : > { %4465 = vmatmul.mubr.msk.f32.gmra.mrb[8].mxu1 %vm1065_vm0, %v1053_v49 }
 0x2bb   : > { %v1021_v55 = vadd.f32 %v1005_v53, %v924_v54  ;;  %v1055_v63 = vmax.f32 %v1039_v56, 0.0  ;;  %4535 = vmatpush3.bf16.msra.mxu0 %v4865_v45 }
 0x2bc   : > { %v985_v57 = vpop.permute.xlu0 %984  ;;  %v902_v58 = vpop.permute.xlu1 %901 }
 0x2bd   : > { %v1038_v59 = vadd.f32 %v6079_v11, %v1021_v55  ;;  %v1008_v60 = vmul.f32 %v985_v57, %v6074_v4  ;;  %v927_v61 = vmul.f32 %v902_v58, %v6072_v3 }
 0x2bf   : > { %v1054_v62 = vmax.f32 %v1038_v59, 0.0  ;;  %v1024_v1 = vadd.f32 %v1008_v60, %v927_v61 }
 0x2c0   : > { %v981_v2 = vpop.permute.xlu0 %980  ;;  %v897_v5 = vpop.permute.xlu1 %896 }
 0x2c1   : > { %v1007_v6 = vmul.f32 %v981_v2, %v6074_v4  ;;  %v926_v7 = vmul.f32 %v897_v5, %v6072_v3  ;;  %4467 = vmatprep.mubr.msk.f32.mxu1 %vm1065_vm0, %v1054_v62  ;;  %v1041_v9 = vadd.f32 %v6079_v11, %v1024_v1 }
 0x2c2   : > { %4468 = vmatmul.mubr.msk.f32.gmra.mrb[10].mxu1 %vm1065_vm0, %v1055_v63 }
 0x2c3   : > { %v1023_v8 = vadd.f32 %v1007_v6, %v926_v7  ;;  %v1057_v19 = vmax.f32 %v1041_v9, 0.0 }
 0x2c4   : > { %v989_v12 = vpop.permute.xlu0 %988  ;;  %v907_v13 = vpop.permute.xlu1 %906 }
 0x2c5   : > { %v1040_v14 = vadd.f32 %v6079_v11, %v1023_v8  ;;  %v1009_v15 = vmul.f32 %v989_v12, %v6074_v4  ;;  %v928_v16 = vmul.f32 %v907_v13, %v6072_v3 }
 0x2c7   : > { %v1056_v17 = vmax.f32 %v1040_v14, 0.0  ;;  %v1025_v18 = vadd.f32 %v1009_v15, %v928_v16 }
 0x2c8   : > { %v993_v20 = vpop.permute.xlu0 %992  ;;  %v912_v21 = vpop.permute.xlu1 %911 }
 0x2c9   : > { %v1042_v22 = vadd.f32 %v6079_v11, %v1025_v18  ;;  %v1010_v23 = vmul.f32 %v993_v20, %v6074_v4  ;;  %v929_v24 = vmul.f32 %v912_v21, %v6072_v3  ;;  %4470 = vmatprep.mubr.msk.f32.mxu1 %vm1065_vm0, %v1056_v17  ;;  %v4866_v3 = vld [vmem:[#allocation6 + $0x10] sm:$0xff]   ;;  %v1064_v4 = vld [vmem:[#allocation15 + $0x3] ss:$0 sm:$0xff] }
 0x2ca   : > { %4471 = vmatmul.mubr.msk.f32.gmra.mrb[12].mxu1 %vm1065_vm0, %v1057_v19  ;;  %4536 = vmatprep.subr.bf16.mxu0 %v4866_v3 }
 0x2cb   : > { %v1058_v25 = vmax.f32 %v1042_v22, 0.0  ;;  %v1026_v41 = vadd.f32 %v1010_v23, %v929_v24  ;;  %4537 = vmatpush3.bf16.msra.mxu0 %v4866_v3 }
 0x2cd   : > { %v1043_v42 = vadd.f32 %v6079_v11, %v1026_v41  ;;  %4473 = vmatprep.mubr.msk.f32.mxu1 %vm1065_vm0, %v1058_v25 }
 0x2cf   : > { %v1059_v43 = vmax.f32 %v1043_v42, 0.0 }
 0x2d1   : > { %4474 = vmatmul.mubr.msk.f32.gmra.mrb[14].mxu1 %vm1065_vm0, %v1059_v43 }
 0x2d2   : > { %4508 = vmatprep.mubr.f32.mxu1 %v5985_v10 }
 0x36d   : > { %v4454_v46 = vpop.f32.mrb[0].mxu1 }
 0x36e   : > { %v1186_v47 = vadd.f32 %v4454_v46, %v1064_v4  ;;  %v1180_v11 = vpop.f32.mrb[1].mxu1 }
 0x36f   : > { %v1181_v48 = vadd.f32 %v1180_v11, %v1064_v4 }
 0x371   : > { %v4651_v49 = vpack.c.bf16 %v1186_v47, %v1181_v48 }
 0x373   : > { %4652 = vmatprep.subr.bf16.mxu1 %v4651_v49 }
 0x374   : > { %4654 = vmatpush3.bf16.msra.mxu1 %v4651_v49 }
 0x375   : > { %v4457_v50 = vpop.f32.mrb[2].mxu1 }
 0x376   : > { %v1196_v51 = vadd.f32 %v4457_v50, %v1064_v4  ;;  %v1190_v10 = vpop.f32.mrb[3].mxu1 }
 0x377   : > { %v1191_v52 = vadd.f32 %v1190_v10, %v1064_v4 }
 0x379   : > { %v4655_v53 = vpack.c.bf16 %v1196_v51, %v1191_v52 }
 0x37b   : > { %4656 = vmatprep.subr.bf16.mxu1 %v4655_v53 }
 0x37c   : > { %4658 = vmatpush3.bf16.msra.mxu1 %v4655_v53 }
 0x37d   : > { %v4460_v54 = vpop.f32.mrb[4].mxu1 }
 0x37e   : > { %v1206_v55 = vadd.f32 %v4460_v54, %v1064_v4  ;;  %v1200_v56 = vpop.f32.mrb[5].mxu1 }
 0x37f   : > { %v1201_v57 = vadd.f32 %v1200_v56, %v1064_v4 }
 0x381   : > { %v4659_v58 = vpack.c.bf16 %v1206_v55, %v1201_v57 }
 0x383   : > { %4660 = vmatprep.subr.bf16.mxu1 %v4659_v58 }
 0x384   : > { %4662 = vmatpush3.bf16.msra.mxu1 %v4659_v58 }
 0x385   : > { %v4463_v59 = vpop.f32.mrb[6].mxu1 }
 0x386   : > { %v1216_v60 = vadd.f32 %v4463_v59, %v1064_v4  ;;  %v1210_v61 = vpop.f32.mrb[7].mxu1 }
 0x387   : > { %v1211_v62 = vadd.f32 %v1210_v61, %v1064_v4 }
 0x389   : > { %v4663_v63 = vpack.c.bf16 %v1216_v60, %v1211_v62 }
 0x38b   : > { %4664 = vmatprep.subr.bf16.mxu1 %v4663_v63 }
 0x38c   : > { %4666 = vmatpush3.bf16.msra.mxu1 %v4663_v63 }
 0x38d   : > { %v4466_v1 = vpop.f32.mrb[8].mxu1 }
 0x38e   : > { %v1226_v2 = vadd.f32 %v4466_v1, %v1064_v4  ;;  %v1220_v5 = vpop.f32.mrb[9].mxu1 }
 0x38f   : > { %v1221_v6 = vadd.f32 %v1220_v5, %v1064_v4 }
 0x391   : > { %v4667_v7 = vpack.c.bf16 %v1226_v2, %v1221_v6 }
 0x393   : > { %4668 = vmatprep.subr.bf16.mxu1 %v4667_v7 }
 0x394   : > { %4670 = vmatpush3.bf16.msra.mxu1 %v4667_v7 }
 0x395   : > { %v4469_v8 = vpop.f32.mrb[10].mxu1 }
 0x396   : > { %v1236_v9 = vadd.f32 %v4469_v8, %v1064_v4  ;;  %v1230_v12 = vpop.f32.mrb[11].mxu1 }
 0x397   : > { %v1231_v13 = vadd.f32 %v1230_v12, %v1064_v4 }
 0x399   : > { %v4671_v14 = vpack.c.bf16 %v1236_v9, %v1231_v13 }
 0x39b   : > { %4672 = vmatprep.subr.bf16.mxu1 %v4671_v14 }
 0x39c   : > { %4674 = vmatpush3.bf16.msra.mxu1 %v4671_v14 }
 0x39d   : > { %v4472_v15 = vpop.f32.mrb[12].mxu1 }
 0x39e   : > { %v1246_v16 = vadd.f32 %v4472_v15, %v1064_v4  ;;  %v1240_v17 = vpop.f32.mrb[13].mxu1 }
 0x39f   : > { %v1241_v18 = vadd.f32 %v1240_v17, %v1064_v4 }
 0x3a1   : > { %v4675_v19 = vpack.c.bf16 %v1246_v16, %v1241_v18 }
 0x3a3   : > { %4676 = vmatprep.subr.bf16.mxu1 %v4675_v19 }
 0x3a4   : > { %v4475_v20 = vpop.f32.mrb[14].mxu1  ;;  %4678 = vmatpush3.bf16.msra.mxu1 %v4675_v19 }
 0x3a5   : > { %v1256_v21 = vadd.f32 %v4475_v20, %v1064_v4  ;;  %v1250_v22 = vpop.f32.mrb[15].mxu1  ;;  %v6167_v20 = vld [vmem:[#allocation15 + $0x5] ss:$0 sm:$0xff] }
 0x3a6   : > { %v1251_v23 = vadd.f32 %v1250_v22, %v1064_v4 }
 0x3a8   : > { %v4679_v24 = vpack.c.bf16 %v1256_v21, %v1251_v23 }
 0x3aa   : > { %4680 = vmatprep.subr.bf16.mxu1 %v4679_v24 }
 0x3ab   : > { %4682 = vmatpush3.bf16.msra.mxu1 %v4679_v24 }
 0x3ae   : > { %4509 = vmatmul.mubr.f32.vlgmr.msra.gmra.mrb[16].mxu1 %v5999_v26  ;;  %v4867_v26 = vld [vmem:[#allocation6 + $0x18] sm:$0xff]  }
 0x3af   : > { %4511 = vmatprep.mubr.f32.mxu1 %v6002_v27  ;;  %4538 = vmatprep.subr.bf16.mxu0 %v4867_v26  ;;  %v1259_v27 = vld [vmem:[#allocation15 + $0x4] ss:$0 sm:$0xff] }
 0x3b0   : > { %4539 = vmatpush3.bf16.msra.mxu0 %v4867_v26 }
 0x3b2   : > { %4512 = vmatmul.mubr.f32.gmra.mrb[18].mxu1 %v6005_v28 }
 0x3b3   : > { %4514 = vmatprep.mubr.f32.mxu1 %v6009_v29 }
 0x3b6   : > { %4515 = vmatmul.mubr.f32.gmra.mrb[20].mxu1 %v6013_v30 }
 0x3b7   : > { %4517 = vmatprep.mubr.f32.mxu1 %v6017_v31 }
 0x3ba   : > { %4518 = vmatmul.mubr.f32.gmra.mrb[22].mxu1 %v6021_v32 }
 0x3bb   : > { %4520 = vmatprep.mubr.f32.mxu1 %v6025_v33 }
 0x3be   : > { %4521 = vmatmul.mubr.f32.gmra.mrb[24].mxu1 %v6029_v34 }
 0x3bf   : > { %4523 = vmatprep.mubr.f32.mxu1 %v6033_v35 }
 0x3c2   : > { %4524 = vmatmul.mubr.f32.gmra.mrb[26].mxu1 %v6037_v36 }
 0x3c3   : > { %4526 = vmatprep.mubr.f32.mxu1 %v6041_v37 }
 0x3c6   : > { %4527 = vmatmul.mubr.f32.gmra.mrb[28].mxu1 %v6045_v38 }
 0x3c7   : > { %4529 = vmatprep.mubr.f32.mxu1 %v6049_v39 }
 0x3ca   : > { %4530 = vmatmul.mubr.f32.gmra.mrb[30].mxu1 %v6053_v40 }
 0x481   : > { %v4510_v28 = vpop.f32.mrb[16].mxu1 }
 0x482   : > { %v1332_v29 = vadd.f32 %v4510_v28, %v1259_v27  ;;  %v1326_v30 = vpop.f32.mrb[17].mxu1 }
 0x483   : > { %v1327_v31 = vadd.f32 %v1326_v30, %v1259_v27 }
 0x484   : > { %v1406_v32 = vmax.f32 %v1332_v29, 0.0  ;;  %v6178_v29 = vld [vmem:[#allocation15 + $0x6] ss:$0 sm:$0xff] }
 0x485   : > { %v1405_v33 = vmax.f32 %v1327_v31, 0.0  ;;  %v4513_v34 = vpop.f32.mrb[18].mxu1 }
 0x486   : > { %v1342_v35 = vadd.f32 %v4513_v34, %v1259_v27  ;;  %v1336_v36 = vpop.f32.mrb[19].mxu1 }
 0x487   : > { %v1421_v37 = vpack.c.bf16 %v1406_v32, %v1405_v33  ;;  %v1337_v38 = vadd.f32 %v1336_v36, %v1259_v27 }
 0x488   : > { %v1408_v25 = vmax.f32 %v1342_v35, 0.0 }
 0x489   : > { %v1407_v39 = vmax.f32 %v1337_v38, 0.0  ;;  %4540 = vmatprep.mubr.msk.bf16.mxu0 %vm1462_vm1, %v1421_v37  ;;  %v4516_v40 = vpop.f32.mrb[20].mxu1 }
 0x48a   : > { %v1352_v41 = vadd.f32 %v4516_v40, %v1259_v27  ;;  %v1346_v42 = vpop.f32.mrb[21].mxu1 }
 0x48b   : > { %v1422_v43 = vpack.c.bf16 %v1408_v25, %v1407_v39  ;;  %v1347_v44 = vadd.f32 %v1346_v42, %v1259_v27 }
 0x48c   : > { %v1410_v45 = vmax.f32 %v1352_v41, 0.0 }
 0x48d   : > { %v1409_v3 = vmax.f32 %v1347_v44, 0.0  ;;  %v4519_v4 = vpop.f32.mrb[22].mxu1  ;;  %4541 = vmatmul.mubr.msk.bf16.vlgmr.msra.gmra.mrb[16].mxu0 %vm1462_vm1, %v1422_v43 }
 0x48e   : > { %v1362_v46 = vadd.f32 %v4519_v4, %v1259_v27  ;;  %v1356_v47 = vpop.f32.mrb[23].mxu1 }
 0x48f   : > { %v1423_v11 = vpack.c.bf16 %v1410_v45, %v1409_v3  ;;  %v1357_v48 = vadd.f32 %v1356_v47, %v1259_v27 }
 0x490   : > { %v1412_v49 = vmax.f32 %v1362_v46, 0.0 }
 0x491   : > { %v1411_v50 = vmax.f32 %v1357_v48, 0.0  ;;  %v4522_v51 = vpop.f32.mrb[24].mxu1  ;;  %4544 = vmatprep.mubr.msk.bf16.mxu0 %vm1462_vm1, %v1423_v11 }
 0x492   : > { %v1372_v10 = vadd.f32 %v4522_v51, %v1259_v27  ;;  %v1366_v52 = vpop.f32.mrb[25].mxu1 }
 0x493   : > { %v1424_v53 = vpack.c.bf16 %v1412_v49, %v1411_v50  ;;  %v1367_v54 = vadd.f32 %v1366_v52, %v1259_v27 }
 0x494   : > { %v1414_v55 = vmax.f32 %v1372_v10, 0.0 }
 0x495   : > { %v1413_v56 = vmax.f32 %v1367_v54, 0.0  ;;  %v4525_v57 = vpop.f32.mrb[26].mxu1  ;;  %4545 = vmatmul.mubr.msk.bf16.gmra.mrb[20].mxu0 %vm1462_vm1, %v1424_v53 }
 0x496   : > { %v1382_v58 = vadd.f32 %v4525_v57, %v1259_v27  ;;  %v1376_v59 = vpop.f32.mrb[27].mxu1 }
 0x497   : > { %v1425_v60 = vpack.c.bf16 %v1414_v55, %v1413_v56  ;;  %v1377_v61 = vadd.f32 %v1376_v59, %v1259_v27 }
 0x498   : > { %v1416_v62 = vmax.f32 %v1382_v58, 0.0 }
 0x499   : > { %v1415_v63 = vmax.f32 %v1377_v61, 0.0  ;;  %v4528_v1 = vpop.f32.mrb[28].mxu1  ;;  %4548 = vmatprep.mubr.msk.bf16.mxu0 %vm1462_vm1, %v1425_v60 }
 0x49a   : > { %v1392_v2 = vadd.f32 %v4528_v1, %v1259_v27  ;;  %v1386_v5 = vpop.f32.mrb[29].mxu1 }
 0x49b   : > { %v1426_v6 = vpack.c.bf16 %v1416_v62, %v1415_v63  ;;  %v1387_v7 = vadd.f32 %v1386_v5, %v1259_v27 }
 0x49c   : > { %v1418_v8 = vmax.f32 %v1392_v2, 0.0 }
 0x49d   : > { %v1417_v9 = vmax.f32 %v1387_v7, 0.0  ;;  %v4531_v12 = vpop.f32.mrb[30].mxu1  ;;  %4549 = vmatmul.mubr.msk.bf16.gmra.mrb[24].mxu0 %vm1462_vm1, %v1426_v6 }
 0x49e   : > { %v1402_v13 = vadd.f32 %v4531_v12, %v1259_v27  ;;  %v1396_v14 = vpop.f32.mrb[31].mxu1 }
 0x49f   : > { %v1427_v15 = vpack.c.bf16 %v1418_v8, %v1417_v9  ;;  %v1397_v16 = vadd.f32 %v1396_v14, %v1259_v27 }
 0x4a0   : > { %v1420_v17 = vmax.f32 %v1402_v13, 0.0 }
 0x4a1   : > { %v1419_v18 = vmax.f32 %v1397_v16, 0.0  ;;  %4552 = vmatprep.mubr.msk.bf16.mxu0 %vm1462_vm1, %v1427_v15 }
 0x4a3   : > { %v1428_v19 = vpack.c.bf16 %v1420_v17, %v1419_v18 }
 0x4a5   : > { %4553 = vmatmul.mubr.msk.bf16.gmra.mrb[28].mxu0 %vm1462_vm1, %v1428_v19 }
 0x4a6   : > { %1981 = vmatprep.mubr.bf16.mxu0 %v5545_v0 }
 0x560   : > { %v4542_v21 = vpop.f32.mrb[16].mxu0 }
 0x561   : > { %v1521_v22 = vpop.f32.mrb[17].mxu0  ;;  %v6173_v26 = vadd.f32 %v4542_v21, %v6167_v20 }
 0x562   : > { %v6170_v23 = vadd.f32 %v1521_v22, %v6167_v20  ;;  %v4543_v24 = vpop.f32.mrb[18].mxu0 }
 0x563   : > { %v6176_v27 = vadd.f32 %v4543_v24, %v6167_v20  ;;  %v1524_v28 = vpop.f32.mrb[19].mxu0  ;;  %v1586_v35 = vmax.f32 %v6173_v26, 0.0  ;;  %v1649_v24 = vld [vmem:[#allocation15 + $0x7] ss:$0 sm:$0xff] }
 0x564   : > { %v1584_v30 = vmax.f32 %v6170_v23, 0.0  ;;  %v6182_v31 = vadd.f32 %v1524_v28, %v6167_v20 }
 0x565   : > { %v1587_v32 = vmax.f32 %v6176_v27, 0.0  ;;  %v1603_v42 = vmul.f32 %v6178_v29, %v1586_v35 }
 0x566   : > { %v1585_v33 = vmax.f32 %v6182_v31, 0.0  ;;  %v1601_v34 = vmul.f32 %v6178_v29, %v1584_v30 }
 0x567   : > { %v1604_v40 = vmul.f32 %v6178_v29, %v1587_v32 }
 0x568   : > { %v4546_v36 = vpop.f32.mrb[20].mxu0  ;;  %1617 = vadd.xlane.f32.xlu1 %v1601_v34  ;;  %v1602_v37 = vmul.f32 %v6178_v29, %v1585_v33 }
 0x569   : > { %v1537_v38 = vpop.f32.mrb[21].mxu0  ;;  %v6203_v43 = vadd.f32 %v4546_v36, %v6167_v20 }
 0x56a   : > { %v6194_v25 = vadd.f32 %v1537_v38, %v6167_v20  ;;  %v4547_v39 = vpop.f32.mrb[22].mxu0  ;;  %1619 = vadd.xlane.f32.xlu0 %v1602_v37 }
 0x56b   : > { %v1540_v41 = vpop.f32.mrb[23].mxu0  ;;  %v6207_v45 = vadd.f32 %v4547_v39, %v6167_v20  ;;  %v1590_v47 = vmax.f32 %v6203_v43, 0.0 }
 0x56c   : > { %v1588_v44 = vmax.f32 %v6194_v25, 0.0  ;;  %v6210_v3 = vadd.f32 %v1540_v41, %v6167_v20  ;;  %1623 = vadd.xlane.f32.xlu1 %v1604_v40 }
 0x56d   : > { %v1591_v11 = vmax.f32 %v6207_v45, 0.0  ;;  %v1607_v57 = vmul.f32 %v6178_v29, %v1590_v47 }
 0x56e   : > { %v1589_v4 = vmax.f32 %v6210_v3, 0.0  ;;  %1621 = vadd.xlane.f32.xlu0 %v1603_v42  ;;  %v1605_v46 = vmul.f32 %v6178_v29, %v1588_v44 }
 0x56f   : > { %v1608_v58 = vmul.f32 %v6178_v29, %v1591_v11 }
 0x570   : > { %v4550_v48 = vpop.f32.mrb[24].mxu0  ;;  %v1606_v49 = vmul.f32 %v6178_v29, %v1589_v4 }
 0x571   : > { %v6222_v50 = vadd.f32 %v4550_v48, %v6167_v20  ;;  %v1553_v51 = vpop.f32.mrb[25].mxu0 }
 0x572   : > { %v6225_v10 = vadd.f32 %v1553_v51, %v6167_v20  ;;  %v4551_v52 = vpop.f32.mrb[26].mxu0  ;;  %1625 = vadd.xlane.f32.xlu0 %v1605_v46  ;;  %1627 = vadd.xlane.f32.xlu1 %v1606_v49 }
 0x573   : > { %v6228_v53 = vadd.f32 %v4551_v52, %v6167_v20  ;;  %v1556_v54 = vpop.f32.mrb[27].mxu0  ;;  %v1594_v59 = vmax.f32 %v6222_v50, 0.0 }
 0x574   : > { %v1592_v55 = vmax.f32 %v6225_v10, 0.0  ;;  %v6232_v56 = vadd.f32 %v1556_v54, %v6167_v20 }
 0x575   : > { %v1595_v60 = vmax.f32 %v6228_v53, 0.0  ;;  %v1611_v5 = vmul.f32 %v6178_v29, %v1594_v59 }
 0x576   : > { %v1593_v61 = vmax.f32 %v6232_v56, 0.0  ;;  %1629 = vadd.xlane.f32.xlu0 %v1607_v57  ;;  %1631 = vadd.xlane.f32.xlu1 %v1608_v58  ;;  %v1609_v62 = vmul.f32 %v6178_v29, %v1592_v55 }
 0x577   : > { %v1612_v9 = vmul.f32 %v6178_v29, %v1595_v60 }
 0x578   : > { %v4554_v63 = vpop.f32.mrb[28].mxu0  ;;  %v1610_v1 = vmul.f32 %v6178_v29, %v1593_v61 }
 0x579   : > { %v1569_v2 = vpop.f32.mrb[29].mxu0  ;;  %v6253_v6 = vadd.f32 %v4554_v63, %v6167_v20 }
 0x57a   : > { %v6256_v7 = vadd.f32 %v1569_v2, %v6167_v20  ;;  %v4555_v8 = vpop.f32.mrb[30].mxu0  ;;  %1635 = vadd.xlane.f32.xlu1 %v1610_v1  ;;  %1633 = vadd.xlane.f32.xlu0 %v1609_v62 }
 0x57b   : > { %v6262_v12 = vadd.f32 %v4555_v8, %v6167_v20  ;;  %v1572_v13 = vpop.f32.mrb[31].mxu0  ;;  %v1598_v16 = vmax.f32 %v6253_v6, 0.0 }
 0x57c   : > { %v1596_v14 = vmax.f32 %v6256_v7, 0.0  ;;  %v6266_v15 = vadd.f32 %v1572_v13, %v6167_v20  ;;  %v4891_v7 = vld [vmem:[#allocation7 + $0x74] ss:$8 sps:$4 sm:$0xff]  }
 0x57d   : > { %v1599_v17 = vmax.f32 %v6262_v12, 0.0  ;;  %v1615_v22 = vmul.f32 %v6178_v29, %v1598_v16  ;;  %v4893_v12 = vld [vmem:[#allocation9 + $0x8] sm:$0xff]  }
 0x57e   : > { %v1597_v18 = vmax.f32 %v6266_v15, 0.0  ;;  %1639 = vadd.xlane.f32.xlu1 %v1612_v9  ;;  %1637 = vadd.xlane.f32.xlu0 %v1611_v5  ;;  %v1613_v19 = vmul.f32 %v6178_v29, %v1596_v14  ;;  %v1667_v15 = vld [vmem:[%s535_s18 + $0x8] sm:$0xff] }
 0x57f   : > { %v1616_v20 = vmul.f32 %v6178_v29, %v1599_v17 }
 0x580   : > { %v1614_v21 = vmul.f32 %v6178_v29, %v1597_v18 }
 0x582   : > { %1643 = vadd.xlane.f32.xlu1 %v1614_v21  ;;  %1641 = vadd.xlane.f32.xlu0 %v1613_v19 }
 0x586   : > { %1647 = vadd.xlane.f32.xlu1 %v1616_v20  ;;  %1645 = vadd.xlane.f32.xlu0 %v1615_v22 }
 0x5f5   : > { %v1618_v28 = vpop.xlane.xlu1 %1617 }
 0x5f6   : > { %v1650_v34 = vadd.f32 %v1649_v24, %v1618_v28 }
 0x5f7   : > { %v1620_v36 = vpop.xlane.xlu0 %1619 }
 0x5f8   : > { %1670 = vperm.xlu0 %4863, %v1650_v34   ;;  %v1651_v48 = vadd.f32 %v1649_v24, %v1620_v36  ;;  %v1666_v36 = vld [vmem:[%s535_s18] sm:$0xff]  ;;  %s4263_s18 = sshll.u32 %s6440_s14, 5 }
 0x5f9   : > { %v1624_v37 = vpop.xlane.xlu1 %1623  ;;  %4588 = vmatprep.mubr.f32.mxu1 %v1666_v36  ;;  %v5547_v36 = vmov 0.0   ;;  %s649_s17 = scalar_lea.vmem %s6433_s16, %s4263_s18 }
 0x5fa   : > { %v1653_v42 = vadd.f32 %v1649_v24, %v1624_v37  ;;  %v4868_v37 = vld [vmem:[#allocation7] ss:$8 sps:$4 sm:$0xff]  }
 0x5fb   : > { %v1622_v38 = vpop.xlane.xlu0 %1621 }
 0x5fc   : > { %v1652_v39 = vadd.f32 %v1649_v24, %v1622_v38  ;;  %v4870_v38 = vld [vmem:[#allocation7 + $0x4] ss:$8 sps:$4 sm:$0xff]  }
 0x5fd   : > { %1949 = vmatprep.subr.bf16.mxu0 %v4870_v38  ;;  %v4895_v38 = vld [vmem:[#allocation9 + $0x18] sm:$0xff]  }
 0x5fe   : > { %1680 = vperm.xlu1 %4862, %v1652_v39   ;;  %v4873_v39 = vld [vmem:[#allocation7 + $0x14] ss:$8 sps:$4 sm:$0xff]   ;;  %1950 = vmatpush1.bf16.msra.mxu0 %v4868_v37 }
 0x5ff   : > { %v1626_v40 = vpop.xlane.xlu0 %1625  ;;  %v1628_v41 = vpop.xlane.xlu1 %1627  ;;  %1951 = vmatprep.subr.bf16.mxu0 %v4873_v39  ;;  %v4894_v37 = vld [vmem:[#allocation9 + $0x10] sm:$0xff]   ;;  %v4896_v39 = vld [vmem:[#allocation9 + $0x20] sm:$0xff]  }
 0x600   : > { %v1654_v57 = vadd.f32 %v1649_v24, %v1626_v40  ;;  %v1655_v1 = vadd.f32 %v1649_v24, %v1628_v41  ;;  %v4871_v40 = vld [vmem:[#allocation7 + $0x10] ss:$8 sps:$4 sm:$0xff]   ;;  %v4876_v41 = vld [vmem:[#allocation7 + $0x24] ss:$8 sps:$4 sm:$0xff]  }
 0x602   : > { %1685 = vperm.xlu1 %4862, %v1653_v42   ;;  %1952 = vmatpush1.bf16.msra.mxu0 %v4871_v40  ;;  %v4874_v42 = vld [vmem:[#allocation7 + $0x20] ss:$8 sps:$4 sm:$0xff]  }
 0x603   : > { %v1632_v46 = vpop.xlane.xlu1 %1631  ;;  %v1630_v49 = vpop.xlane.xlu0 %1629  ;;  %1953 = vmatprep.subr.bf16.mxu0 %v4876_v41  ;;  %v4897_v40 = vld [vmem:[#allocation9 + $0x28] sm:$0xff]   ;;  %v4898_v41 = vld [vmem:[#allocation9 + $0x30] sm:$0xff]  }
 0x604   : > { %v1656_v51 = vadd.f32 %v1649_v24, %v1630_v49  ;;  %v1657_v8 = vadd.f32 %v1649_v24, %v1632_v46  ;;  %v4879_v46 = vld [vmem:[#allocation7 + $0x34] ss:$8 sps:$4 sm:$0xff]   ;;  %v4880_v49 = vld [vmem:[#allocation7 + $0x40] ss:$8 sps:$4 sm:$0xff]  }
 0x606   : > { %1675 = vperm.xlu1 %4862, %v1651_v48   ;;  %1954 = vmatpush1.bf16.msra.mxu0 %v4874_v42  ;;  %v4877_v48 = vld [vmem:[#allocation7 + $0x30] ss:$8 sps:$4 sm:$0xff]  }
 0x607   : > { %v1636_v29 = vpop.xlane.xlu1 %1635  ;;  %v1634_v62 = vpop.xlane.xlu0 %1633  ;;  %1955 = vmatprep.subr.bf16.mxu0 %v4879_v46  ;;  %v4899_v42 = vld [vmem:[#allocation9 + $0x38] sm:$0xff]   ;;  %v4902_v46 = vld [vmem:[#allocation10 + $0x4] ss:$8 sps:$4 sm:$0xff]  }
 0x608   : > { %v1659_v52 = vadd.f32 %v1649_v24, %v1636_v29  ;;  %v1658_v19 = vadd.f32 %v1649_v24, %v1634_v62  ;;  %v4885_v29 = vld [vmem:[#allocation7 + $0x54] ss:$8 sps:$4 sm:$0xff]  }
 0x60a   : > { %1700 = vperm.xlu1 %4862, %v1656_v51   ;;  %1715 = vperm.xlu0 %4863, %v1659_v52   ;;  %v4883_v51 = vld [vmem:[#allocation7 + $0x50] ss:$8 sps:$4 sm:$0xff]   ;;  %v4888_v52 = vld [vmem:[#allocation7 + $0x64] ss:$8 sps:$4 sm:$0xff]  }
 0x60b   : > { %v1640_v54 = vpop.xlane.xlu1 %1639  ;;  %v1638_v13 = vpop.xlane.xlu0 %1637  ;;  %1956 = vmatpush1.bf16.msra.mxu0 %v4877_v48  ;;  %v4905_v48 = vld [vmem:[#allocation10 + $0x14] ss:$8 sps:$4 sm:$0xff]  }
 0x60c   : > { %v1661_v58 = vadd.f32 %v1649_v24, %v1640_v54  ;;  %v1660_v20 = vadd.f32 %v1649_v24, %v1638_v13  ;;  %v4886_v54 = vld [vmem:[#allocation7 + $0x60] ss:$8 sps:$4 sm:$0xff]  }
 0x60e   : > { %1690 = vperm.xlu1 %4862, %v1654_v57   ;;  %1725 = vperm.xlu0 %4863, %v1661_v58  }
 0x60f   : > { %v1644_v63 = vpop.xlane.xlu1 %1643  ;;  %v1642_v21 = vpop.xlane.xlu0 %1641 }
 0x610   : > { %v1663_v2 = vadd.f32 %v1649_v24, %v1644_v63  ;;  %v1662_v22 = vadd.f32 %v1649_v24, %v1642_v21 }
 0x612   : > { %1695 = vperm.xlu1 %4862, %v1655_v1   ;;  %1735 = vperm.xlu0 %4863, %v1663_v2  }
 0x613   : > { %v1648_v5 = vpop.xlane.xlu1 %1647  ;;  %v1646_v28 = vpop.xlane.xlu0 %1645 }
 0x614   : > { %v1665_v9 = vadd.f32 %v1649_v24, %v1648_v5  ;;  %v1664_v34 = vadd.f32 %v1649_v24, %v1646_v28  ;;  %v4882_v24 = vld [vmem:[#allocation7 + $0x44] ss:$8 sps:$4 sm:$0xff]  }
 0x615   : > { %1957 = vmatprep.subr.bf16.mxu0 %v4882_v24  ;;  %v4903_v24 = vld [vmem:[#allocation10 + $0x10] ss:$8 sps:$4 sm:$0xff]  }
 0x616   : > { %1705 = vperm.xlu1 %4862, %v1657_v8   ;;  %1745 = vperm.xlu0 %4863, %v1665_v9  }
 0x617   : > { %1958 = vmatpush1.bf16.msra.mxu0 %v4880_v49  ;;  %v4908_v49 = vld [vmem:[#allocation10 + $0x24] ss:$8 sps:$4 sm:$0xff]  }
 0x618   : > { %1959 = vmatprep.subr.bf16.mxu0 %v4885_v29  ;;  %v4906_v29 = vld [vmem:[#allocation10 + $0x20] ss:$8 sps:$4 sm:$0xff]  }
 0x61a   : > { %1710 = vperm.xlu1 %4862, %v1658_v19  }
 0x61b   : > { %1960 = vmatpush1.bf16.msra.mxu0 %v4883_v51  ;;  %v4911_v51 = vld [vmem:[#allocation10 + $0x34] ss:$8 sps:$4 sm:$0xff]  }
 0x61c   : > { %1961 = vmatprep.subr.bf16.mxu0 %v4888_v52  ;;  %v4909_v52 = vld [vmem:[#allocation10 + $0x30] ss:$8 sps:$4 sm:$0xff]  }
 0x61e   : > { %1720 = vperm.xlu1 %4862, %v1660_v20  }
 0x61f   : > { %1962 = vmatpush1.bf16.msra.mxu0 %v4886_v54  ;;  %v4914_v54 = vld [vmem:[#allocation10 + $0x44] ss:$8 sps:$4 sm:$0xff]  }
 0x620   : > { %1963 = vmatprep.subr.bf16.mxu0 %v4891_v7  ;;  %v4942_v7 = vld [vmem:[#allocation12 + $0x60] ss:$16 sps:$4 sm:$0xff]  }
 0x622   : > { %1730 = vperm.xlu1 %4862, %v1662_v22  }
 0x626   : > { %1740 = vperm.xlu1 %4862, %v1664_v34  }
 0x677   : > { %v1671_v62 = vpop.permute.xlu0 %1670 }
 0x678   : > { %v1748_v1 = vmul.f32 %v1671_v62, %v1584_v30  ;;  %v4915_v62 = vld [vmem:[#allocation10 + $0x50] ss:$8 sps:$4 sm:$0xff]  }
 0x67d   : > { %v1681_v57 = vpop.permute.xlu1 %1680 }
 0x67e   : > { %v1750_v8 = vmul.f32 %v1681_v57, %v1586_v35  ;;  %v4912_v57 = vld [vmem:[#allocation10 + $0x40] ss:$8 sps:$4 sm:$0xff]  }
 0x681   : > { %v1686_v58 = vpop.permute.xlu1 %1685 }
 0x682   : > { %v1751_v2 = vmul.f32 %v1686_v58, %v1587_v32  ;;  %v4917_v58 = vld [vmem:[#allocation10 + $0x54] ss:$8 sps:$4 sm:$0xff]  }
 0x684   : > { %v4687_v19 = vpack.c.bf16 %v1751_v2, %v1750_v8 }
 0x685   : > { %v1676_v63 = vpop.permute.xlu1 %1675 }
 0x686   : > { %v1749_v5 = vmul.f32 %v1676_v63, %v1585_v33  ;;  %v1859_v63 = vlaneseq }
 0x688   : > { %v4683_v9 = vpack.c.bf16 %v1749_v5, %v1748_v1  ;;  %v6320_v1 = vshrl.u32 %v1859_v63, 7  ;;  %v1857_v5 = vld [vmem:[#allocation15 + $0x20] ss:$8 sm:$0x3] }
 0x689   : > { %v1701_v13 = vpop.permute.xlu1 %1700  ;;  %v1716_v20 = vpop.permute.xlu0 %1715 }
 0x68a   : > { %4684 = vmatprep.subr.bf16.mxu1 %v4683_v9  ;;  %v1754_v26 = vmul.f32 %v1701_v13, %v1590_v47  ;;  %v1757_v25 = vmul.f32 %v1716_v20, %v1593_v61  ;;  %v6323_v2 = vsub.s32 0, %v6320_v1  ;;  %v6326_v8 = vsub.s32 1, %v6320_v1 }
 0x68b   : > { %4686 = vmatpush3.bf16.msra.mxu1 %v4683_v9 }
 0x68c   : > { %4688 = vmatprep.subr.bf16.mxu1 %v4687_v19  ;;  %v1862_v9 = vrot.slane %v1857_v5, %v6323_v2  ;;  %v1866_v13 = vrot.slane %v1857_v5, %v6326_v8 }
 0x68d   : > { %v1691_v21 = vpop.permute.xlu1 %1690  ;;  %v1726_v35 = vpop.permute.xlu0 %1725 }
 0x68e   : > { %v1752_v27 = vmul.f32 %v1691_v21, %v1588_v44  ;;  %v1759_v45 = vmul.f32 %v1726_v35, %v1595_v60  ;;  %v2000_v35 = vld [vmem:[%s544_s15] sm:$0xff] }
 0x68f   : > { %4690 = vmatpush3.bf16.msra.mxu1 %v4687_v19 }
 0x691   : > { %v1696_v23 = vpop.permute.xlu1 %1695 }
 0x692   : > { %v1753_v30 = vmul.f32 %v1696_v23, %v1589_v4  ;;  %v1736_v4 = vpop.permute.xlu0 %1735 }
 0x693   : > { %v1761_v10 = vmul.f32 %v1736_v4, %v1597_v18  ;;  %v4892_v18 = vld [vmem:[#allocation9] sm:$0xff]  }
 0x694   : > { %v4691_v31 = vpack.c.bf16 %v1753_v30, %v1752_v27 }
 0x695   : > { %v1706_v32 = vpop.permute.xlu1 %1705 }
 0x696   : > { %v1755_v33 = vmul.f32 %v1706_v32, %v1591_v11  ;;  %4692 = vmatprep.subr.bf16.mxu1 %v4691_v31  ;;  %v1746_v61 = vpop.permute.xlu0 %1745 }
 0x697   : > { %4694 = vmatpush3.bf16.msra.mxu1 %v4691_v31  ;;  %v1763_v50 = vmul.f32 %v1746_v61, %v1599_v17  ;;  %v4926_v61 = vld [vmem:[#allocation12 + $0x4] ss:$16 sps:$4 sm:$0xff]  }
 0x698   : > { %v4695_v22 = vpack.c.bf16 %v1755_v33, %v1754_v26 }
 0x699   : > { %v1711_v28 = vpop.permute.xlu1 %1710 }
 0x69a   : > { %v1756_v44 = vmul.f32 %v1711_v28, %v1592_v55  ;;  %4696 = vmatprep.subr.bf16.mxu1 %v4695_v22  ;;  %v2001_v28 = vld [vmem:[%s544_s15 + $0x8] sm:$0xff] }
 0x69b   : > { %4698 = vmatpush3.bf16.msra.mxu1 %v4695_v22 }
 0x69c   : > { %v4699_v3 = vpack.c.bf16 %v1757_v25, %v1756_v44 }
 0x69d   : > { %v1721_v43 = vpop.permute.xlu1 %1720 }
 0x69e   : > { %v1758_v47 = vmul.f32 %v1721_v43, %v1594_v59  ;;  %4700 = vmatprep.subr.bf16.mxu1 %v4699_v3 }
 0x69f   : > { %4702 = vmatpush3.bf16.msra.mxu1 %v4699_v3 }
 0x6a0   : > { %v4703_v11 = vpack.c.bf16 %v1759_v45, %v1758_v47  ;;  %v4920_v47 = vld [vmem:[#allocation10 + $0x64] ss:$8 sps:$4 sm:$0xff]  }
 0x6a1   : > { %v1731_v56 = vpop.permute.xlu1 %1730 }
 0x6a2   : > { %v1760_v55 = vmul.f32 %v1731_v56, %v1596_v14  ;;  %4704 = vmatprep.subr.bf16.mxu1 %v4703_v11  ;;  %v4889_v14 = vld [vmem:[#allocation7 + $0x70] ss:$8 sps:$4 sm:$0xff]   ;;  %v4923_v56 = vld [vmem:[#allocation10 + $0x74] ss:$8 sps:$4 sm:$0xff]  }
 0x6a3   : > { %4706 = vmatpush3.bf16.msra.mxu1 %v4703_v11  ;;  %1964 = vmatpush1.bf16.msra.mxu0 %v4889_v14  ;;  %v4918_v11 = vld [vmem:[#allocation10 + $0x60] ss:$8 sps:$4 sm:$0xff]   ;;  %v4950_v14 = vld [vmem:[#allocation12 + $0x84] ss:$16 sps:$4 sm:$0xff]  }
 0x6a4   : > { %v4707_v34 = vpack.c.bf16 %v1761_v10, %v1760_v55  ;;  %2225 = vmatprep.subr.bf16.mxu0 %v4902_v46  ;;  %v4921_v10 = vld [vmem:[#allocation10 + $0x70] ss:$8 sps:$4 sm:$0xff]   ;;  %v4992_v46 = vld [vmem:[#allocation12 + $0x164] ss:$16 sps:$4 sm:$0xff]  }
 0x6a5   : > { %v1741_v53 = vpop.permute.xlu1 %1740  ;;  %v4924_v55 = vld [vmem:[#allocation12] ss:$16 sps:$4 sm:$0xff]  }
 0x6a6   : > { %v1762_v59 = vmul.f32 %v1741_v53, %v1598_v16  ;;  %4708 = vmatprep.subr.bf16.mxu1 %v4707_v34  ;;  %v4932_v53 = vld [vmem:[#allocation12 + $0x24] ss:$16 sps:$4 sm:$0xff]  }
 0x6a7   : > { %4710 = vmatpush3.bf16.msra.mxu1 %v4707_v34  ;;  %v4929_v34 = vld [vmem:[#allocation12 + $0xc] ss:$16 sps:$4 sm:$0xff]  }
 0x6a8   : > { %v4711_v60 = vpack.c.bf16 %v1763_v50, %v1762_v59  ;;  %v4930_v50 = vld [vmem:[#allocation12 + $0x20] ss:$16 sps:$4 sm:$0xff]   ;;  %v4938_v59 = vld [vmem:[#allocation12 + $0x44] ss:$16 sps:$4 sm:$0xff]  }
 0x6aa   : > { %4712 = vmatprep.subr.bf16.mxu1 %v4711_v60 }
 0x6ab   : > { %4714 = vmatpush3.bf16.msra.mxu1 %v4711_v60  ;;  %v4936_v60 = vld [vmem:[#allocation12 + $0x40] ss:$16 sps:$4 sm:$0xff]  }
 0x6ac   : > { %4591 = vmatprep.subr.bf16.mxu1 %v5547_v36 }
 0x6ae   : > { %4589 = vmatmul.mubr.f32.vlgmr.msra.gmra.mrb[32].mxu1 %v1667_v15  ;;  %v4944_v15 = vld [vmem:[#allocation12 + $0x64] ss:$16 sps:$4 sm:$0xff]  }
 0x6af   : > { %4592 = vmatpush3.bf16.msra.mxu1 %v4892_v18  ;;  %4607 = vmatprep.mubr.msk.bf16.mxu1 %vm5548_vm2, %v5547_v36  ;;  %v4948_v18 = vld [vmem:[#allocation12 + $0x80] ss:$16 sps:$4 sm:$0xff]  }
 0x6b0   : > { %4593 = vmatprep.subr.bf16.mxu1 %v5547_v36 }
 0x6b3   : > { %4594 = vmatpush3.bf16.msra.mxu1 %v4893_v12  ;;  %v4954_v12 = vld [vmem:[#allocation12 + $0xa0] ss:$16 sps:$4 sm:$0xff]  }
 0x6b4   : > { %4595 = vmatprep.subr.bf16.mxu1 %v5547_v36 }
 0x6b7   : > { %4596 = vmatpush3.bf16.msra.mxu1 %v4894_v37  ;;  %v4966_v37 = vld [vmem:[#allocation12 + $0xe0] ss:$16 sps:$4 sm:$0xff]  }
 0x6b8   : > { %4597 = vmatprep.subr.bf16.mxu1 %v5547_v36 }
 0x6bb   : > { %4598 = vmatpush3.bf16.msra.mxu1 %v4895_v38  ;;  %v4974_v38 = vld [vmem:[#allocation12 + $0x104] ss:$16 sps:$4 sm:$0xff]  }
 0x6bc   : > { %4599 = vmatprep.subr.bf16.mxu1 %v5547_v36 }
 0x6bf   : > { %4600 = vmatpush3.bf16.msra.mxu1 %v4896_v39  ;;  %v4972_v39 = vld [vmem:[#allocation12 + $0x100] ss:$16 sps:$4 sm:$0xff]  }
 0x6c0   : > { %4601 = vmatprep.subr.bf16.mxu1 %v5547_v36 }
 0x6c3   : > { %4602 = vmatpush3.bf16.msra.mxu1 %v4897_v40  ;;  %v4980_v40 = vld [vmem:[#allocation12 + $0x124] ss:$16 sps:$4 sm:$0xff]  }
 0x6c4   : > { %4603 = vmatprep.subr.bf16.mxu1 %v5547_v36 }
 0x6c7   : > { %4604 = vmatpush3.bf16.msra.mxu1 %v4898_v41  ;;  %v4978_v41 = vld [vmem:[#allocation12 + $0x120] ss:$16 sps:$4 sm:$0xff]  }
 0x6c8   : > { %4605 = vmatprep.subr.bf16.mxu1 %v5547_v36  ;;  %v4956_v36 = vld [vmem:[#allocation12 + $0xa4] ss:$16 sps:$4 sm:$0xff]  }
 0x6cb   : > { %4606 = vmatpush3.bf16.msra.mxu1 %v4899_v42  ;;  %v4986_v42 = vld [vmem:[#allocation12 + $0x144] ss:$16 sps:$4 sm:$0xff]  }
 0x6cc   : > { %2681 = vmatprep.subr.bf16.mxu1 %v4926_v61  ;;  %v5001_v61 = vld [vmem:[#allocation12 + $0x18c] ss:$16 sps:$4 sm:$0xff]  }
 0x781   : > { %v4590_v6 = vpop.f32.mrb[32].mxu1 }
 0x782   : > { %v1830_v16 = vpop.f32.mrb[33].mxu1 }
 0x783   : > { %v1839_v17 = vpack.c.bf16 %v4590_v6, %v1830_v16  ;;  %v4962_v6 = vld [vmem:[#allocation12 + $0xc4] ss:$16 sps:$4 sm:$0xff]   ;;  %v4960_v16 = vld [vmem:[#allocation12 + $0xc0] ss:$16 sps:$4 sm:$0xff]  }
 0x785   : > { %1982 = vmatmul.mubr.bf16.vlgmr.msra.gmra.mrb[32].mxu0 %v1839_v17  ;;  %v4968_v17 = vld [vmem:[#allocation12 + $0xe4] ss:$16 sps:$4 sm:$0xff]  }
 0x786   : > { %2257 = vmatprep.mubr.bf16.mxu0 %v5545_v0  ;;  %v4900_v0 = vld [vmem:[#allocation10] ss:$8 sps:$4 sm:$0xff]  }
 0x787   : > { %2226 = vmatpush1.bf16.msra.mxu0 %v4900_v0  ;;  %v4984_v0 = vld [vmem:[#allocation12 + $0x140] ss:$16 sps:$4 sm:$0xff]  }
 0x788   : > { %2227 = vmatprep.subr.bf16.mxu0 %v4905_v48  ;;  %v4990_v48 = vld [vmem:[#allocation12 + $0x160] ss:$16 sps:$4 sm:$0xff]  }
 0x78b   : > { %2228 = vmatpush1.bf16.msra.mxu0 %v4903_v24  ;;  %v4998_v24 = vld [vmem:[#allocation12 + $0x184] ss:$16 sps:$4 sm:$0xff]  }
 0x78c   : > { %2229 = vmatprep.subr.bf16.mxu0 %v4908_v49  ;;  %v4996_v49 = vld [vmem:[#allocation12 + $0x180] ss:$16 sps:$4 sm:$0xff]  }
 0x78f   : > { %2230 = vmatpush1.bf16.msra.mxu0 %v4906_v29  ;;  %v5004_v29 = vld [vmem:[#allocation12 + $0x1a4] ss:$16 sps:$4 sm:$0xff]  }
 0x790   : > { %2231 = vmatprep.subr.bf16.mxu0 %v4911_v51  ;;  %v5002_v51 = vld [vmem:[#allocation12 + $0x1a0] ss:$16 sps:$4 sm:$0xff]  }
 0x793   : > { %2232 = vmatpush1.bf16.msra.mxu0 %v4909_v52  ;;  %v2023_v52 = vld [vmem:[#allocation15 + $0x21] ss:$0 sm:$0xff] }
 0x794   : > { %2233 = vmatprep.subr.bf16.mxu0 %v4914_v54 }
 0x797   : > { %2234 = vmatpush1.bf16.msra.mxu0 %v4912_v57 }
 0x798   : > { %2235 = vmatprep.subr.bf16.mxu0 %v4917_v58 }
 0x79b   : > { %2236 = vmatpush1.bf16.msra.mxu0 %v4915_v62 }
 0x79c   : > { %2237 = vmatprep.subr.bf16.mxu0 %v4920_v47  ;;  %v4981_v47 = vld [vmem:[#allocation12 + $0x128] ss:$16 sps:$4 sm:$0xff]  }
 0x79f   : > { %2238 = vmatpush1.bf16.msra.mxu0 %v4918_v11  ;;  %v4989_v11 = vld [vmem:[#allocation12 + $0x14c] ss:$16 sps:$4 sm:$0xff]  }
 0x7a0   : > { %2239 = vmatprep.subr.bf16.mxu0 %v4923_v56  ;;  %v4987_v56 = vld [vmem:[#allocation12 + $0x148] ss:$16 sps:$4 sm:$0xff]  }
 0x7a3   : > { %2240 = vmatpush1.bf16.msra.mxu0 %v4921_v10  ;;  %v4995_v10 = vld [vmem:[#allocation12 + $0x16c] ss:$16 sps:$4 sm:$0xff]  }
 0x7a4   : > { %2724 = vmatprep.subr.bf16.mxu0 %v4929_v34  ;;  %v4999_v34 = vld [vmem:[#allocation12 + $0x188] ss:$16 sps:$4 sm:$0xff]  }
 0x858   : > { %v1983_v19 = vpop.f32.mrb[32].mxu0 }
 0x859   : > { %v1984_v21 = vadd.f32 %v1983_v19, %v1862_v9  ;;  %v1985_v20 = vpop.f32.mrb[33].mxu0  ;;  %v4927_v19 = vld [vmem:[#allocation12 + $0x8] ss:$16 sps:$4 sm:$0xff]  }
 0x85a   : > { %v1986_v23 = vadd.f32 %v1985_v20, %v1866_v13  ;;  %v1987_v27 = vpop.f32.mrb[34].mxu0  ;;  %v4935_v20 = vld [vmem:[#allocation12 + $0x2c] ss:$16 sps:$4 sm:$0xff]  }
 0x85b   : > { %1992 = vst [vmem:[%s649_s17] sm:$0xff] %v1984_v21  ;;  %v1988_v30 = vadd.f32 %v1987_v27, %v1862_v9  ;;  %v1989_v31 = vpop.f32.mrb[35].mxu0  ;;  %v4941_v27 = vld [vmem:[#allocation12 + $0x4c] ss:$16 sps:$4 sm:$0xff]  }
 0x85c   : > { %1993 = vst [vmem:[%s649_s17 + $0x8] sm:$0xff] %v1986_v23  ;;  %v1996_v32 = vmul.f32 1.442695, %v1986_v23  ;;  %v1990_v26 = vadd.f32 %v1989_v31, %v1866_v13  ;;  %v4933_v23 = vld [vmem:[#allocation12 + $0x28] ss:$16 sps:$4 sm:$0xff]  }
 0x85d   : > { %1994 = vst [vmem:[%s649_s17 + $0x10] sm:$0xff] %v1988_v30  ;;  %v4947_v31 = vld [vmem:[#allocation12 + $0x6c] ss:$16 sps:$4 sm:$0xff]  }
 0x85e   : > { %5212 = vpow2.f32 %v1996_v32  ;;  %1995 = vst [vmem:[%s649_s17 + $0x18] sm:$0xff] %v1990_v26  ;;  %v1998_v33 = vmul.f32 1.442695, %v1990_v26  ;;  %v4945_v32 = vld [vmem:[#allocation12 + $0x68] ss:$16 sps:$4 sm:$0xff]  }
 0x85f   : > { %v4953_v26 = vld [vmem:[#allocation12 + $0x8c] ss:$16 sps:$4 sm:$0xff]  }
 0x860   : > { %5214 = vpow2.f32 %v1998_v33  ;;  %v4951_v33 = vld [vmem:[#allocation12 + $0x88] ss:$16 sps:$4 sm:$0xff]  }
 0x868   : > { %v5213_v22 = vpop.eup %5212 }
 0x869   : > { %v2002_v25 = vmul.f32 %v5213_v22, %v2000_v35  ;;  %v4959_v35 = vld [vmem:[#allocation12 + $0xac] ss:$16 sps:$4 sm:$0xff]   ;;  %v4957_v22 = vld [vmem:[#allocation12 + $0xa8] ss:$16 sps:$4 sm:$0xff]  }
 0x86a   : > { %v5215_v44 = vpop.eup %5214 }
 0x86b   : > { %v2003_v3 = vmul.f32 %v5215_v44, %v2001_v28  ;;  %v2004_v4 = vadd.f32 %v2002_v25, %v1984_v21  ;;  %v4965_v28 = vld [vmem:[#allocation12 + $0xcc] ss:$16 sps:$4 sm:$0xff]   ;;  %v4963_v25 = vld [vmem:[#allocation12 + $0xc8] ss:$16 sps:$4 sm:$0xff]  }
 0x86c   : > { %v4971_v44 = vld [vmem:[#allocation12 + $0xec] ss:$16 sps:$4 sm:$0xff]  }
 0x86d   : > { %v2005_v43 = vadd.f32 %v2003_v3, %v1988_v30  ;;  %v4939_v30 = vld [vmem:[#allocation12 + $0x48] ss:$16 sps:$4 sm:$0xff]  }
 0x86e   : > { %v4969_v3 = vld [vmem:[#allocation12 + $0xe8] ss:$16 sps:$4 sm:$0xff]  }
 0x86f   : > { %v2006_v45 = vpack.c.bf16 %v2005_v43, %v2004_v4  ;;  %v4977_v4 = vld [vmem:[#allocation12 + $0x10c] ss:$16 sps:$4 sm:$0xff]   ;;  %v4975_v43 = vld [vmem:[#allocation12 + $0x108] ss:$16 sps:$4 sm:$0xff]  }
 0x871   : > { %4608 = vmatmul.mubr.bf16.vlgmr.msra.gmra.mrb[36].mxu1 %v2006_v45  ;;  %v4983_v45 = vld [vmem:[#allocation12 + $0x12c] ss:$16 sps:$4 sm:$0xff]  }
 0x872   : > { %2682 = vmatpush1.bf16.msra.mxu1 %v4924_v55  ;;  %v4993_v55 = vld [vmem:[#allocation12 + $0x168] ss:$16 sps:$4 sm:$0xff]  }
 0x873   : > { %2683 = vmatprep.subr.bf16.mxu1 %v4932_v53  ;;  %v5007_v53 = vld [vmem:[#allocation12 + $0x1ac] ss:$16 sps:$4 sm:$0xff]  }
 0x876   : > { %2684 = vmatpush1.bf16.msra.mxu1 %v4930_v50  ;;  %v5005_v50 = vld [vmem:[#allocation12 + $0x1a8] ss:$16 sps:$4 sm:$0xff]  }
 0x877   : > { %2685 = vmatprep.subr.bf16.mxu1 %v4938_v59  ;;  %v5010_v59 = vld [vmem:[#allocation12 + $0x1c4] ss:$16 sps:$4 sm:$0xff]  }
 0x87a   : > { %2686 = vmatpush1.bf16.msra.mxu1 %v4936_v60  ;;  %v5013_v60 = vld [vmem:[#allocation12 + $0x1cc] ss:$16 sps:$4 sm:$0xff]  }
 0x87b   : > { %2687 = vmatprep.subr.bf16.mxu1 %v4944_v15  ;;  %v5008_v15 = vld [vmem:[#allocation12 + $0x1c0] ss:$16 sps:$4 sm:$0xff]  }
 0x87e   : > { %2688 = vmatpush1.bf16.msra.mxu1 %v4942_v7  ;;  %v5011_v7 = vld [vmem:[#allocation12 + $0x1c8] ss:$16 sps:$4 sm:$0xff]  }
 0x87f   : > { %2689 = vmatprep.subr.bf16.mxu1 %v4950_v14  ;;  %v5016_v14 = vld [vmem:[#allocation12 + $0x1e4] ss:$16 sps:$4 sm:$0xff]  }
 0x882   : > { %2690 = vmatpush1.bf16.msra.mxu1 %v4948_v18  ;;  %v5019_v18 = vld [vmem:[#allocation12 + $0x1ec] ss:$16 sps:$4 sm:$0xff]  }
 0x883   : > { %2691 = vmatprep.subr.bf16.mxu1 %v4956_v36  ;;  %v5014_v36 = vld [vmem:[#allocation12 + $0x1e0] ss:$16 sps:$4 sm:$0xff]  }
 0x886   : > { %2692 = vmatpush1.bf16.msra.mxu1 %v4954_v12  ;;  %v5017_v12 = vld [vmem:[#allocation12 + $0x1e8] ss:$16 sps:$4 sm:$0xff]  }
 0x887   : > { %2693 = vmatprep.subr.bf16.mxu1 %v4962_v6  ;;  %v5022_v6 = vld [vmem:[#allocation13 + $0x4] ss:$16 sps:$4 sm:$0xff]  }
 0x88a   : > { %2694 = vmatpush1.bf16.msra.mxu1 %v4960_v16  ;;  %v5025_v16 = vld [vmem:[#allocation13 + $0xc] ss:$16 sps:$4 sm:$0xff]  }
 0x88b   : > { %2695 = vmatprep.subr.bf16.mxu1 %v4968_v17  ;;  %v2133_v17 = vld [vmem:[#allocation15 + $0x22] ss:$8 sm:$0x3] }
 0x88e   : > { %2696 = vmatpush1.bf16.msra.mxu1 %v4966_v37  ;;  %v2138_v37 = vrot.slane %v2133_v17, %v6323_v2 }
 0x88f   : > { %2697 = vmatprep.subr.bf16.mxu1 %v4974_v38  ;;  %v2142_v38 = vrot.slane %v2133_v17, %v6326_v8  ;;  %v5086_v17 = vld [vmem:[#allocation13 + $0x160] ss:$16 sps:$4 sm:$0xff]  }
 0x892   : > { %2698 = vmatpush1.bf16.msra.mxu1 %v4972_v39 }
 0x893   : > { %2699 = vmatprep.subr.bf16.mxu1 %v4980_v40 }
 0x896   : > { %2700 = vmatpush1.bf16.msra.mxu1 %v4978_v41 }
 0x897   : > { %2701 = vmatprep.subr.bf16.mxu1 %v4986_v42 }
 0x89a   : > { %2702 = vmatpush1.bf16.msra.mxu1 %v4984_v0 }
 0x89b   : > { %2703 = vmatprep.subr.bf16.mxu1 %v4992_v46 }
 0x89e   : > { %2704 = vmatpush1.bf16.msra.mxu1 %v4990_v48 }
 0x89f   : > { %2705 = vmatprep.subr.bf16.mxu1 %v4998_v24 }
 0x8a2   : > { %2706 = vmatpush1.bf16.msra.mxu1 %v4996_v49 }
 0x8a3   : > { %2707 = vmatprep.subr.bf16.mxu1 %v5004_v29 }
 0x8a6   : > { %2708 = vmatpush1.bf16.msra.mxu1 %v5002_v51 }
 0x8a7   : > { %2709 = vmatprep.subr.bf16.mxu1 %v5010_v59  ;;  %v5076_v59 = vld [vmem:[#allocation13 + $0x124] ss:$16 sps:$4 sm:$0xff]  }
 0x8aa   : > { %2710 = vmatpush1.bf16.msra.mxu1 %v5008_v15  ;;  %v5074_v15 = vld [vmem:[#allocation13 + $0x120] ss:$16 sps:$4 sm:$0xff]  }
 0x8ab   : > { %2711 = vmatprep.subr.bf16.mxu1 %v5016_v14  ;;  %v5082_v14 = vld [vmem:[#allocation13 + $0x144] ss:$16 sps:$4 sm:$0xff]  }
 0x8ae   : > { %2712 = vmatpush1.bf16.msra.mxu1 %v5014_v36  ;;  %v5080_v36 = vld [vmem:[#allocation13 + $0x140] ss:$16 sps:$4 sm:$0xff]  }
 0x8af   : > { %3570 = vmatprep.subr.bf16.mxu1 %v5022_v6  ;;  %v5088_v6 = vld [vmem:[#allocation13 + $0x164] ss:$16 sps:$4 sm:$0xff]  }
 0x944   : > { %v2106_v54 = vpop.f32.mrb[36].mxu1 }
 0x945   : > { %v2107_v57 = vadd.f32 %v2106_v54, %v2023_v52  ;;  %v4609_v58 = vpop.f32.mrb[37].mxu1 }
 0x946   : > { %v2109_v62 = vpop.f32.mrb[38].mxu1  ;;  %v5020_v58 = vld [vmem:[#allocation13] ss:$16 sps:$4 sm:$0xff]  }
 0x947   : > { %v2110_v63 = vadd.f32 %v2109_v62, %v2023_v52  ;;  %v4610_v5 = vpop.f32.mrb[39].mxu1  ;;  %v2113_v9 = vmax.f32 %v2107_v57, 0.0  ;;  %v5023_v62 = vld [vmem:[#allocation13 + $0x8] ss:$16 sps:$4 sm:$0xff]  }
 0x948   : > { %v5031_v5 = vld [vmem:[#allocation13 + $0x2c] ss:$16 sps:$4 sm:$0xff]  }
 0x949   : > { %v2114_v13 = vmax.f32 %v2110_v63, 0.0  ;;  %v5028_v63 = vld [vmem:[#allocation13 + $0x24] ss:$16 sps:$4 sm:$0xff]  }
 0x94b   : > { %v2115_v21 = vpack.c.bf16 %v2114_v13, %v2113_v9  ;;  %v5026_v9 = vld [vmem:[#allocation13 + $0x20] ss:$16 sps:$4 sm:$0xff]   ;;  %v5029_v13 = vld [vmem:[#allocation13 + $0x28] ss:$16 sps:$4 sm:$0xff]  }
 0x94d   : > { %2258 = vmatmul.mubr.bf16.vlgmr.msra.gmra.mrb[36].mxu0 %v2115_v21  ;;  %v5037_v21 = vld [vmem:[#allocation13 + $0x4c] ss:$16 sps:$4 sm:$0xff]  }
 0x94e   : > { %2725 = vmatpush1.bf16.msra.mxu0 %v4927_v19  ;;  %v5034_v19 = vld [vmem:[#allocation13 + $0x44] ss:$16 sps:$4 sm:$0xff]  }
 0x94f   : > { %2726 = vmatprep.subr.bf16.mxu0 %v4935_v20  ;;  %v5032_v20 = vld [vmem:[#allocation13 + $0x40] ss:$16 sps:$4 sm:$0xff]  }
 0x952   : > { %2727 = vmatpush1.bf16.msra.mxu0 %v4933_v23  ;;  %v5035_v23 = vld [vmem:[#allocation13 + $0x48] ss:$16 sps:$4 sm:$0xff]  }
 0x953   : > { %2728 = vmatprep.subr.bf16.mxu0 %v4941_v27  ;;  %v5040_v27 = vld [vmem:[#allocation13 + $0x64] ss:$16 sps:$4 sm:$0xff]  }
 0x956   : > { %2729 = vmatpush1.bf16.msra.mxu0 %v4939_v30  ;;  %v5043_v30 = vld [vmem:[#allocation13 + $0x6c] ss:$16 sps:$4 sm:$0xff]  }
 0x957   : > { %2730 = vmatprep.subr.bf16.mxu0 %v4947_v31  ;;  %v5038_v31 = vld [vmem:[#allocation13 + $0x60] ss:$16 sps:$4 sm:$0xff]  }
 0x95a   : > { %2731 = vmatpush1.bf16.msra.mxu0 %v4945_v32  ;;  %v5041_v32 = vld [vmem:[#allocation13 + $0x68] ss:$16 sps:$4 sm:$0xff]  }
 0x95b   : > { %2732 = vmatprep.subr.bf16.mxu0 %v4953_v26  ;;  %v5046_v26 = vld [vmem:[#allocation13 + $0x84] ss:$16 sps:$4 sm:$0xff]  }
 0x95e   : > { %2733 = vmatpush1.bf16.msra.mxu0 %v4951_v33  ;;  %v5049_v33 = vld [vmem:[#allocation13 + $0x8c] ss:$16 sps:$4 sm:$0xff]  }
 0x95f   : > { %2734 = vmatprep.subr.bf16.mxu0 %v4959_v35  ;;  %v5044_v35 = vld [vmem:[#allocation13 + $0x80] ss:$16 sps:$4 sm:$0xff]  }
 0x962   : > { %2735 = vmatpush1.bf16.msra.mxu0 %v4957_v22  ;;  %v5047_v22 = vld [vmem:[#allocation13 + $0x88] ss:$16 sps:$4 sm:$0xff]  }
 0x963   : > { %2736 = vmatprep.subr.bf16.mxu0 %v4965_v28  ;;  %v5052_v28 = vld [vmem:[#allocation13 + $0xa4] ss:$16 sps:$4 sm:$0xff]  }
 0x966   : > { %2737 = vmatpush1.bf16.msra.mxu0 %v4963_v25  ;;  %v5055_v25 = vld [vmem:[#allocation13 + $0xac] ss:$16 sps:$4 sm:$0xff]  }
 0x967   : > { %2738 = vmatprep.subr.bf16.mxu0 %v4971_v44  ;;  %v5050_v44 = vld [vmem:[#allocation13 + $0xa0] ss:$16 sps:$4 sm:$0xff]  }
 0x96a   : > { %2739 = vmatpush1.bf16.msra.mxu0 %v4969_v3  ;;  %v5053_v3 = vld [vmem:[#allocation13 + $0xa8] ss:$16 sps:$4 sm:$0xff]  }
 0x96b   : > { %2740 = vmatprep.subr.bf16.mxu0 %v4977_v4  ;;  %v5058_v4 = vld [vmem:[#allocation13 + $0xc4] ss:$16 sps:$4 sm:$0xff]  }
 0x96e   : > { %2741 = vmatpush1.bf16.msra.mxu0 %v4975_v43  ;;  %v5061_v43 = vld [vmem:[#allocation13 + $0xcc] ss:$16 sps:$4 sm:$0xff]  }
 0x96f   : > { %2742 = vmatprep.subr.bf16.mxu0 %v4983_v45  ;;  %v5056_v45 = vld [vmem:[#allocation13 + $0xc0] ss:$16 sps:$4 sm:$0xff]  }
 0x972   : > { %2743 = vmatpush1.bf16.msra.mxu0 %v4981_v47  ;;  %v5059_v47 = vld [vmem:[#allocation13 + $0xc8] ss:$16 sps:$4 sm:$0xff]  }
 0x973   : > { %2744 = vmatprep.subr.bf16.mxu0 %v4989_v11  ;;  %v5064_v11 = vld [vmem:[#allocation13 + $0xe4] ss:$16 sps:$4 sm:$0xff]  }
 0x976   : > { %2745 = vmatpush1.bf16.msra.mxu0 %v4987_v56  ;;  %v5067_v56 = vld [vmem:[#allocation13 + $0xec] ss:$16 sps:$4 sm:$0xff]  }
 0x977   : > { %2746 = vmatprep.subr.bf16.mxu0 %v4995_v10  ;;  %v5062_v10 = vld [vmem:[#allocation13 + $0xe0] ss:$16 sps:$4 sm:$0xff]  }
 0x97a   : > { %2747 = vmatpush1.bf16.msra.mxu0 %v4993_v55  ;;  %v5065_v55 = vld [vmem:[#allocation13 + $0xe8] ss:$16 sps:$4 sm:$0xff]  }
 0x97b   : > { %2748 = vmatprep.subr.bf16.mxu0 %v5001_v61  ;;  %v5070_v61 = vld [vmem:[#allocation13 + $0x104] ss:$16 sps:$4 sm:$0xff]  }
 0x97e   : > { %2749 = vmatpush1.bf16.msra.mxu0 %v4999_v34  ;;  %v5073_v34 = vld [vmem:[#allocation13 + $0x10c] ss:$16 sps:$4 sm:$0xff]  }
 0x97f   : > { %2750 = vmatprep.subr.bf16.mxu0 %v5007_v53  ;;  %v5068_v53 = vld [vmem:[#allocation13 + $0x100] ss:$16 sps:$4 sm:$0xff]  }
 0x982   : > { %2751 = vmatpush1.bf16.msra.mxu0 %v5005_v50  ;;  %v5071_v50 = vld [vmem:[#allocation13 + $0x108] ss:$16 sps:$4 sm:$0xff]  }
 0x983   : > { %2752 = vmatprep.subr.bf16.mxu0 %v5013_v60  ;;  %v5079_v60 = vld [vmem:[#allocation13 + $0x12c] ss:$16 sps:$4 sm:$0xff]  }
 0x986   : > { %2753 = vmatpush1.bf16.msra.mxu0 %v5011_v7  ;;  %v5077_v7 = vld [vmem:[#allocation13 + $0x128] ss:$16 sps:$4 sm:$0xff]  }
 0x987   : > { %2754 = vmatprep.subr.bf16.mxu0 %v5019_v18  ;;  %v5085_v18 = vld [vmem:[#allocation13 + $0x14c] ss:$16 sps:$4 sm:$0xff]  }
 0x98a   : > { %2755 = vmatpush1.bf16.msra.mxu0 %v5017_v12  ;;  %v5083_v12 = vld [vmem:[#allocation13 + $0x148] ss:$16 sps:$4 sm:$0xff]  }
 0x98b   : > { %3656 = vmatprep.subr.bf16.mxu0 %v5025_v16  ;;  %v5091_v16 = vld [vmem:[#allocation13 + $0x16c] ss:$16 sps:$4 sm:$0xff]  }
 0xa20   : > { %v2259_v39 = vpop.f32.mrb[36].mxu0 }
 0xa21   : > { %v2260_v40 = vadd.f32 %v2259_v39, %v2138_v37  ;;  %v2261_v41 = vpop.f32.mrb[37].mxu0  ;;  %v5097_v39 = vld [vmem:[#allocation13 + $0x18c] ss:$16 sps:$4 sm:$0xff]  }
 0xa22   : > { %v2262_v42 = vadd.f32 %v2261_v41, %v2142_v38  ;;  %v2263_v0 = vpop.f32.mrb[38].mxu0  ;;  %v5095_v41 = vld [vmem:[#allocation13 + $0x188] ss:$16 sps:$4 sm:$0xff]  }
 0xa23   : > { %v2264_v46 = vadd.f32 %v2263_v0, %v2138_v37  ;;  %v2265_v48 = vpop.f32.mrb[39].mxu0  ;;  %v2268_v49 = vmax.f32 %v2260_v40, 0.0  ;;  %v5089_v37 = vld [vmem:[#allocation13 + $0x168] ss:$16 sps:$4 sm:$0xff]   ;;  %v5092_v40 = vld [vmem:[#allocation13 + $0x180] ss:$16 sps:$4 sm:$0xff]  }
 0xa24   : > { %v2266_v24 = vadd.f32 %v2265_v48, %v2142_v38  ;;  %v2269_v51 = vmax.f32 %v2262_v42, 0.0  ;;  %v5094_v38 = vld [vmem:[#allocation13 + $0x184] ss:$16 sps:$4 sm:$0xff]   ;;  %v5103_v0 = vld [vmem:[#allocation13 + $0x1ac] ss:$16 sps:$4 sm:$0xff]  }
 0xa25   : > { %v2270_v29 = vmax.f32 %v2264_v46, 0.0  ;;  %v5100_v42 = vld [vmem:[#allocation13 + $0x1a4] ss:$16 sps:$4 sm:$0xff]   ;;  %v5098_v46 = vld [vmem:[#allocation13 + $0x1a0] ss:$16 sps:$4 sm:$0xff]  }
 0xa26   : > { %v2271_v52 = vmax.f32 %v2266_v24, 0.0  ;;  %v5101_v48 = vld [vmem:[#allocation13 + $0x1a8] ss:$16 sps:$4 sm:$0xff]   ;;  %v5106_v24 = vld [vmem:[#allocation13 + $0x1c4] ss:$16 sps:$4 sm:$0xff]  }
 0xa27   : > { %v2272_v54 = vpack.c.bf16 %v2270_v29, %v2268_v49  ;;  %v5109_v49 = vld [vmem:[#allocation13 + $0x1cc] ss:$16 sps:$4 sm:$0xff]   ;;  %v5104_v29 = vld [vmem:[#allocation13 + $0x1c0] ss:$16 sps:$4 sm:$0xff]  }
 0xa28   : > { %v2273_v57 = vpack.c.bf16 %v2271_v52, %v2269_v51  ;;  %v5107_v51 = vld [vmem:[#allocation13 + $0x1c8] ss:$16 sps:$4 sm:$0xff]   ;;  %v5112_v52 = vld [vmem:[#allocation13 + $0x1e4] ss:$16 sps:$4 sm:$0xff]  }
 0xa2a   : > { %2713 = vmatprep.mubr.bf16.mxu1 %v2273_v57  ;;  %2756 = vmatprep.mubr.bf16.mxu0 %v2273_v57  ;;  %v5110_v57 = vld [vmem:[#allocation13 + $0x1e0] ss:$16 sps:$4 sm:$0xff]  }
 0xa2b   : > { %2714 = vmatmul.mubr.bf16.vlgmr.msra.gmra.mrb[40].mxu1 %v2272_v54  ;;  %2757 = vmatmul.mubr.bf16.vlgmr.msra.gmra.mrb[40].mxu0 %v2272_v54  ;;  %v5115_v54 = vld [vmem:[#allocation13 + $0x1ec] ss:$16 sps:$4 sm:$0xff]  }
 0xa2c   : > { %3571 = vmatpush1.bf16.msra.mxu1 %v5020_v58  ;;  %3657 = vmatpush1.bf16.msra.mxu0 %v5023_v62  ;;  %v5113_v58 = vld [vmem:[#allocation13 + $0x1e8] ss:$16 sps:$4 sm:$0xff]   ;;  %v5118_v62 = vld [vmem:[#allocation13 + $0x204] ss:$16 sps:$4 sm:$0xff]  }
 0xa2d   : > { %3572 = vmatprep.subr.bf16.mxu1 %v5028_v63  ;;  %3658 = vmatprep.subr.bf16.mxu0 %v5031_v5  ;;  %v5121_v63 = vld [vmem:[#allocation13 + $0x20c] ss:$16 sps:$4 sm:$0xff]   ;;  %v2351_v5 = vsub.s32 2, %v6320_v1 }
 0xa30   : > { %3573 = vmatpush1.bf16.msra.mxu1 %v5026_v9  ;;  %3659 = vmatpush1.bf16.msra.mxu0 %v5029_v13  ;;  %v2339_v9 = vld [vmem:[#allocation15 + $0x23] ss:$8 sm:$0xf]  ;;  %v2355_v13 = vsub.s32 3, %v6320_v1 }
 0xa31   : > { %3574 = vmatprep.subr.bf16.mxu1 %v5034_v19  ;;  %3660 = vmatprep.subr.bf16.mxu0 %v5037_v21  ;;  %v2344_v19 = vrot.slane %v2339_v9, %v6323_v2  ;;  %v2352_v21 = vrot.slane %v2339_v9, %v2351_v5 }
 0xa34   : > { %3575 = vmatpush1.bf16.msra.mxu1 %v5032_v20  ;;  %3661 = vmatpush1.bf16.msra.mxu0 %v5035_v23  ;;  %v2348_v20 = vrot.slane %v2339_v9, %v6326_v8  ;;  %v2356_v23 = vrot.slane %v2339_v9, %v2355_v13  ;;  %v5160_v9 = vld [vmem:[#allocation13 + $0x2e4] ss:$16 sps:$4 sm:$0xff]  }
 0xa35   : > { %3576 = vmatprep.subr.bf16.mxu1 %v5040_v27  ;;  %3662 = vmatprep.subr.bf16.mxu0 %v5043_v30 }
 0xa38   : > { %3577 = vmatpush1.bf16.msra.mxu1 %v5038_v31  ;;  %3663 = vmatpush1.bf16.msra.mxu0 %v5041_v32 }
 0xa39   : > { %3578 = vmatprep.subr.bf16.mxu1 %v5046_v26  ;;  %3664 = vmatprep.subr.bf16.mxu0 %v5049_v33 }
 0xa3c   : > { %3579 = vmatpush1.bf16.msra.mxu1 %v5044_v35  ;;  %3665 = vmatpush1.bf16.msra.mxu0 %v5047_v22 }
 0xa3d   : > { %3580 = vmatprep.subr.bf16.mxu1 %v5052_v28  ;;  %3666 = vmatprep.subr.bf16.mxu0 %v5055_v25 }
 0xa40   : > { %3581 = vmatpush1.bf16.msra.mxu1 %v5050_v44  ;;  %3667 = vmatpush1.bf16.msra.mxu0 %v5053_v3 }
 0xa41   : > { %3582 = vmatprep.subr.bf16.mxu1 %v5058_v4  ;;  %3668 = vmatprep.subr.bf16.mxu0 %v5061_v43 }
 0xa44   : > { %3583 = vmatpush1.bf16.msra.mxu1 %v5056_v45  ;;  %3669 = vmatpush1.bf16.msra.mxu0 %v5059_v47 }
 0xa45   : > { %3584 = vmatprep.subr.bf16.mxu1 %v5064_v11  ;;  %3670 = vmatprep.subr.bf16.mxu0 %v5067_v56 }
 0xa48   : > { %3585 = vmatpush1.bf16.msra.mxu1 %v5062_v10  ;;  %3671 = vmatpush1.bf16.msra.mxu0 %v5065_v55 }
 0xa49   : > { %3586 = vmatprep.subr.bf16.mxu1 %v5070_v61  ;;  %3672 = vmatprep.subr.bf16.mxu0 %v5073_v34 }
 0xa4c   : > { %3587 = vmatpush1.bf16.msra.mxu1 %v5068_v53  ;;  %3673 = vmatpush1.bf16.msra.mxu0 %v5071_v50 }
 0xa4d   : > { %3588 = vmatprep.subr.bf16.mxu1 %v5076_v59  ;;  %3674 = vmatprep.subr.bf16.mxu0 %v5079_v60 }
 0xa50   : > { %3589 = vmatpush1.bf16.msra.mxu1 %v5074_v15  ;;  %3675 = vmatpush1.bf16.msra.mxu0 %v5077_v7 }
 0xa51   : > { %3590 = vmatprep.subr.bf16.mxu1 %v5082_v14  ;;  %3676 = vmatprep.subr.bf16.mxu0 %v5085_v18  ;;  %v5116_v14 = vld [vmem:[#allocation13 + $0x200] ss:$16 sps:$4 sm:$0xff]   ;;  %v5119_v18 = vld [vmem:[#allocation13 + $0x208] ss:$16 sps:$4 sm:$0xff]  }
 0xa54   : > { %3591 = vmatpush1.bf16.msra.mxu1 %v5080_v36  ;;  %3677 = vmatpush1.bf16.msra.mxu0 %v5083_v12  ;;  %v5124_v36 = vld [vmem:[#allocation13 + $0x224] ss:$16 sps:$4 sm:$0xff]   ;;  %v5127_v12 = vld [vmem:[#allocation13 + $0x22c] ss:$16 sps:$4 sm:$0xff]  }
 0xa55   : > { %3592 = vmatprep.subr.bf16.mxu1 %v5088_v6  ;;  %3678 = vmatprep.subr.bf16.mxu0 %v5091_v16  ;;  %v5122_v6 = vld [vmem:[#allocation13 + $0x220] ss:$16 sps:$4 sm:$0xff]   ;;  %v5125_v16 = vld [vmem:[#allocation13 + $0x228] ss:$16 sps:$4 sm:$0xff]  }
 0xa58   : > { %3593 = vmatpush1.bf16.msra.mxu1 %v5086_v17  ;;  %3679 = vmatpush1.bf16.msra.mxu0 %v5089_v37  ;;  %v5130_v17 = vld [vmem:[#allocation13 + $0x244] ss:$16 sps:$4 sm:$0xff]   ;;  %v5133_v37 = vld [vmem:[#allocation13 + $0x24c] ss:$16 sps:$4 sm:$0xff]  }
 0xa59   : > { %3594 = vmatprep.subr.bf16.mxu1 %v5094_v38  ;;  %3680 = vmatprep.subr.bf16.mxu0 %v5097_v39  ;;  %v5128_v38 = vld [vmem:[#allocation13 + $0x240] ss:$16 sps:$4 sm:$0xff]   ;;  %v5131_v39 = vld [vmem:[#allocation13 + $0x248] ss:$16 sps:$4 sm:$0xff]  }
 0xa5c   : > { %3595 = vmatpush1.bf16.msra.mxu1 %v5092_v40  ;;  %3681 = vmatpush1.bf16.msra.mxu0 %v5095_v41  ;;  %v5136_v40 = vld [vmem:[#allocation13 + $0x264] ss:$16 sps:$4 sm:$0xff]   ;;  %v5139_v41 = vld [vmem:[#allocation13 + $0x26c] ss:$16 sps:$4 sm:$0xff]  }
 0xa5d   : > { %3596 = vmatprep.subr.bf16.mxu1 %v5100_v42  ;;  %3682 = vmatprep.subr.bf16.mxu0 %v5103_v0  ;;  %v5134_v42 = vld [vmem:[#allocation13 + $0x260] ss:$16 sps:$4 sm:$0xff]   ;;  %v5137_v0 = vld [vmem:[#allocation13 + $0x268] ss:$16 sps:$4 sm:$0xff]  }
 0xa60   : > { %3597 = vmatpush1.bf16.msra.mxu1 %v5098_v46  ;;  %3683 = vmatpush1.bf16.msra.mxu0 %v5101_v48  ;;  %v5142_v46 = vld [vmem:[#allocation13 + $0x284] ss:$16 sps:$4 sm:$0xff]   ;;  %v5145_v48 = vld [vmem:[#allocation13 + $0x28c] ss:$16 sps:$4 sm:$0xff]  }
 0xa61   : > { %3598 = vmatprep.subr.bf16.mxu1 %v5106_v24  ;;  %3684 = vmatprep.subr.bf16.mxu0 %v5109_v49  ;;  %v5140_v24 = vld [vmem:[#allocation13 + $0x280] ss:$16 sps:$4 sm:$0xff]   ;;  %v5143_v49 = vld [vmem:[#allocation13 + $0x288] ss:$16 sps:$4 sm:$0xff]  }
 0xa64   : > { %3599 = vmatpush1.bf16.msra.mxu1 %v5104_v29  ;;  %3685 = vmatpush1.bf16.msra.mxu0 %v5107_v51  ;;  %v5148_v29 = vld [vmem:[#allocation13 + $0x2a4] ss:$16 sps:$4 sm:$0xff]   ;;  %v5151_v51 = vld [vmem:[#allocation13 + $0x2ac] ss:$16 sps:$4 sm:$0xff]  }
 0xa65   : > { %3600 = vmatprep.subr.bf16.mxu1 %v5112_v52  ;;  %3686 = vmatprep.subr.bf16.mxu0 %v5115_v54  ;;  %v5146_v52 = vld [vmem:[#allocation13 + $0x2a0] ss:$16 sps:$4 sm:$0xff]   ;;  %v5149_v54 = vld [vmem:[#allocation13 + $0x2a8] ss:$16 sps:$4 sm:$0xff]  }
 0xa68   : > { %3601 = vmatpush1.bf16.msra.mxu1 %v5110_v57  ;;  %3687 = vmatpush1.bf16.msra.mxu0 %v5113_v58  ;;  %v5154_v57 = vld [vmem:[#allocation13 + $0x2c4] ss:$16 sps:$4 sm:$0xff]   ;;  %v5157_v58 = vld [vmem:[#allocation13 + $0x2cc] ss:$16 sps:$4 sm:$0xff]  }
 0xa69   : > { %3613 = vmatprep.subr.bf16.mxu1 %v5118_v62  ;;  %3699 = vmatprep.subr.bf16.mxu0 %v5121_v63  ;;  %v5152_v62 = vld [vmem:[#allocation13 + $0x2c0] ss:$16 sps:$4 sm:$0xff]   ;;  %v5155_v63 = vld [vmem:[#allocation13 + $0x2c8] ss:$16 sps:$4 sm:$0xff]  }
 0xafe   : > { %v2715_v27 = vpop.f32.mrb[40].mxu1  ;;  %v2758_v30 = vpop.f32.mrb[40].mxu0 }
 0xaff   : > { %v2716_v31 = vadd.f32 %v2715_v27, %v2344_v19  ;;  %v2759_v32 = vadd.f32 %v2758_v30, %v2352_v21  ;;  %v2717_v26 = vpop.f32.mrb[41].mxu1  ;;  %v2760_v33 = vpop.f32.mrb[41].mxu0  ;;  %v5169_v27 = vld [vmem:[#allocation13 + $0x30c] ss:$16 sps:$4 sm:$0xff]   ;;  %v5164_v30 = vld [vmem:[#allocation13 + $0x300] ss:$16 sps:$4 sm:$0xff]  }
 0xb00   : > { %v2718_v35 = vadd.f32 %v2717_v26, %v2348_v20  ;;  %v2761_v22 = vadd.f32 %v2760_v33, %v2356_v23  ;;  %v2719_v28 = vpop.f32.mrb[42].mxu1  ;;  %v2762_v25 = vpop.f32.mrb[42].mxu0  ;;  %v5175_v26 = vld [vmem:[#allocation13 + $0x32c] ss:$16 sps:$4 sm:$0xff]   ;;  %v5170_v33 = vld [vmem:[#allocation13 + $0x320] ss:$16 sps:$4 sm:$0xff]  }
 0xb01   : > { %v2720_v44 = vadd.f32 %v2719_v28, %v2344_v19  ;;  %v2763_v3 = vadd.f32 %v2762_v25, %v2352_v21  ;;  %v2721_v4 = vpop.f32.mrb[43].mxu1  ;;  %v2764_v43 = vpop.f32.mrb[43].mxu0  ;;  %v2767_v11 = vmax.f32 %v2716_v31, 0.0  ;;  %v2769_v56 = vmax.f32 %v2759_v32, 0.0  ;;  %v5163_v19 = vld [vmem:[#allocation13 + $0x2ec] ss:$16 sps:$4 sm:$0xff]  }
 0xb02   : > { %v2722_v45 = vadd.f32 %v2721_v4, %v2348_v20  ;;  %v2765_v47 = vadd.f32 %v2764_v43, %v2356_v23  ;;  %v2768_v61 = vmax.f32 %v2718_v35, 0.0  ;;  %v2770_v34 = vmax.f32 %v2761_v22, 0.0  ;;  %v5158_v21 = vld [vmem:[#allocation13 + $0x2e0] ss:$16 sps:$4 sm:$0xff]   ;;  %v5161_v20 = vld [vmem:[#allocation13 + $0x2e8] ss:$16 sps:$4 sm:$0xff]  }
 0xb03   : > { %v2771_v10 = vmax.f32 %v2720_v44, 0.0  ;;  %v2773_v55 = vmax.f32 %v2763_v3, 0.0  ;;  %v5166_v23 = vld [vmem:[#allocation13 + $0x304] ss:$16 sps:$4 sm:$0xff]   ;;  %v5167_v31 = vld [vmem:[#allocation13 + $0x308] ss:$16 sps:$4 sm:$0xff]  }
 0xb04   : > { %v2772_v53 = vmax.f32 %v2722_v45, 0.0  ;;  %v2774_v50 = vmax.f32 %v2765_v47, 0.0  ;;  %v5172_v32 = vld [vmem:[#allocation13 + $0x324] ss:$16 sps:$4 sm:$0xff]   ;;  %v5173_v35 = vld [vmem:[#allocation13 + $0x328] ss:$16 sps:$4 sm:$0xff]  }
 0xb05   : > { %v2775_v59 = vpack.c.bf16 %v2771_v10, %v2767_v11  ;;  %v6348_v60 = vpack.c.bf16 %v2773_v55, %v2769_v56  ;;  %v5178_v22 = vld [vmem:[#allocation13 + $0x344] ss:$16 sps:$4 sm:$0xff]   ;;  %v5181_v28 = vld [vmem:[#allocation13 + $0x34c] ss:$16 sps:$4 sm:$0xff]   ;;  %v5176_v25 = vld [vmem:[#allocation13 + $0x340] ss:$16 sps:$4 sm:$0xff]  }
 0xb06   : > { %v2776_v15 = vpack.c.bf16 %v2772_v53, %v2768_v61  ;;  %v2778_v7 = vpack.c.bf16 %v2774_v50, %v2770_v34  ;;  %v5179_v44 = vld [vmem:[#allocation13 + $0x348] ss:$16 sps:$4 sm:$0xff]   ;;  %v5184_v3 = vld [vmem:[#allocation13 + $0x364] ss:$16 sps:$4 sm:$0xff]   ;;  %v5187_v4 = vld [vmem:[#allocation13 + $0x36c] ss:$16 sps:$4 sm:$0xff]  }
 0xb07   : > { %v5182_v43 = vld [vmem:[#allocation13 + $0x360] ss:$16 sps:$4 sm:$0xff]   ;;  %v5185_v45 = vld [vmem:[#allocation13 + $0x368] ss:$16 sps:$4 sm:$0xff]   ;;  %v5190_v47 = vld [vmem:[#allocation13 + $0x384] ss:$16 sps:$4 sm:$0xff]  }
 0xb08   : > { %3602 = vmatprep.mubr.bf16.mxu1 %v2776_v15  ;;  %3688 = vmatprep.mubr.bf16.mxu0 %v2776_v15  ;;  %v5193_v11 = vld [vmem:[#allocation13 + $0x38c] ss:$16 sps:$4 sm:$0xff]   ;;  %v5188_v56 = vld [vmem:[#allocation13 + $0x380] ss:$16 sps:$4 sm:$0xff]   ;;  %v5191_v10 = vld [vmem:[#allocation13 + $0x388] ss:$16 sps:$4 sm:$0xff]  }
 0xb09   : > { %3603 = vmatmul.mubr.bf16.vlgmr.msra.gmra.mrb[44].mxu1 %v2775_v59  ;;  %3689 = vmatmul.mubr.bf16.vlgmr.msra.gmra.mrb[44].mxu0 %v2775_v59  ;;  %v5196_v55 = vld [vmem:[#allocation13 + $0x3a4] ss:$16 sps:$4 sm:$0xff]   ;;  %v5199_v61 = vld [vmem:[#allocation13 + $0x3ac] ss:$16 sps:$4 sm:$0xff]   ;;  %v5194_v34 = vld [vmem:[#allocation13 + $0x3a0] ss:$16 sps:$4 sm:$0xff]  }
 0xb0a   : > { %3614 = vmatpush1.bf16.msra.mxu1 %v5116_v14  ;;  %3700 = vmatpush1.bf16.msra.mxu0 %v5119_v18  ;;  %v5197_v53 = vld [vmem:[#allocation13 + $0x3a8] ss:$16 sps:$4 sm:$0xff]   ;;  %v5202_v50 = vld [vmem:[#allocation13 + $0x3c4] ss:$16 sps:$4 sm:$0xff]   ;;  %v5205_v59 = vld [vmem:[#allocation13 + $0x3cc] ss:$16 sps:$4 sm:$0xff]  }
 0xb0b   : > { %3645 = vmatprep.mubr.bf16.mxu1 %v2778_v7  ;;  %3731 = vmatprep.mubr.bf16.mxu0 %v2778_v7  ;;  %v5200_v15 = vld [vmem:[#allocation13 + $0x3c0] ss:$16 sps:$4 sm:$0xff]   ;;  %v5203_v7 = vld [vmem:[#allocation13 + $0x3c8] ss:$16 sps:$4 sm:$0xff]   ;;  %v5208_v14 = vld [vmem:[#allocation13 + $0x3e4] ss:$16 sps:$4 sm:$0xff]  }
 0xb0c   : > { %3615 = vmatprep.subr.bf16.mxu1 %v5124_v36  ;;  %3701 = vmatprep.subr.bf16.mxu0 %v5127_v12  ;;  %v5211_v18 = vld [vmem:[#allocation13 + $0x3ec] ss:$16 sps:$4 sm:$0xff]   ;;  %v5206_v36 = vld [vmem:[#allocation13 + $0x3e0] ss:$16 sps:$4 sm:$0xff]   ;;  %v5209_v12 = vld [vmem:[#allocation13 + $0x3e8] ss:$16 sps:$4 sm:$0xff]  }
 0xb0e   : > { %3616 = vmatpush1.bf16.msra.mxu1 %v5122_v6  ;;  %3702 = vmatpush1.bf16.msra.mxu0 %v5125_v16  ;;  %v2908_v6 = vld [vmem:[#allocation15 + $0x24] ss:$8 sm:$0xf] }
 0xb0f   : > { %3617 = vmatprep.subr.bf16.mxu1 %v5130_v17  ;;  %3703 = vmatprep.subr.bf16.mxu0 %v5133_v37  ;;  %v2913_v16 = vrot.slane %v2908_v6, %v6323_v2  ;;  %v2921_v17 = vrot.slane %v2908_v6, %v2351_v5  ;;  %v2917_v37 = vrot.slane %v2908_v6, %v6326_v8 }
 0xb12   : > { %3618 = vmatpush1.bf16.msra.mxu1 %v5128_v38  ;;  %3704 = vmatpush1.bf16.msra.mxu0 %v5131_v39  ;;  %v2925_v38 = vrot.slane %v2908_v6, %v2355_v13 }
 0xb13   : > { %3619 = vmatprep.subr.bf16.mxu1 %v5136_v40  ;;  %3705 = vmatprep.subr.bf16.mxu0 %v5139_v41 }
 0xb16   : > { %3620 = vmatpush1.bf16.msra.mxu1 %v5134_v42  ;;  %3706 = vmatpush1.bf16.msra.mxu0 %v5137_v0 }
 0xb17   : > { %3621 = vmatprep.subr.bf16.mxu1 %v5142_v46  ;;  %3707 = vmatprep.subr.bf16.mxu0 %v5145_v48 }
 0xb1a   : > { %3622 = vmatpush1.bf16.msra.mxu1 %v5140_v24  ;;  %3708 = vmatpush1.bf16.msra.mxu0 %v5143_v49 }
 0xb1b   : > { %3623 = vmatprep.subr.bf16.mxu1 %v5148_v29  ;;  %3709 = vmatprep.subr.bf16.mxu0 %v5151_v51 }
 0xb1e   : > { %3624 = vmatpush1.bf16.msra.mxu1 %v5146_v52  ;;  %3710 = vmatpush1.bf16.msra.mxu0 %v5149_v54 }
 0xb1f   : > { %3625 = vmatprep.subr.bf16.mxu1 %v5154_v57  ;;  %3711 = vmatprep.subr.bf16.mxu0 %v5157_v58 }
 0xb22   : > { %3626 = vmatpush1.bf16.msra.mxu1 %v5152_v62  ;;  %3712 = vmatpush1.bf16.msra.mxu0 %v5155_v63 }
 0xb23   : > { %3627 = vmatprep.subr.bf16.mxu1 %v5160_v9  ;;  %3713 = vmatprep.subr.bf16.mxu0 %v5163_v19 }
 0xb26   : > { %3628 = vmatpush1.bf16.msra.mxu1 %v5158_v21  ;;  %3714 = vmatpush1.bf16.msra.mxu0 %v5161_v20 }
 0xb27   : > { %3629 = vmatprep.subr.bf16.mxu1 %v5166_v23  ;;  %3715 = vmatprep.subr.bf16.mxu0 %v5169_v27 }
 0xb2a   : > { %3630 = vmatpush1.bf16.msra.mxu1 %v5164_v30  ;;  %3716 = vmatpush1.bf16.msra.mxu0 %v5167_v31 }
 0xb2b   : > { %3631 = vmatprep.subr.bf16.mxu1 %v5172_v32  ;;  %3717 = vmatprep.subr.bf16.mxu0 %v5175_v26 }
 0xb2e   : > { %3632 = vmatpush1.bf16.msra.mxu1 %v5170_v33  ;;  %3718 = vmatpush1.bf16.msra.mxu0 %v5173_v35 }
 0xb2f   : > { %3633 = vmatprep.subr.bf16.mxu1 %v5178_v22  ;;  %3719 = vmatprep.subr.bf16.mxu0 %v5181_v28 }
 0xb32   : > { %3634 = vmatpush1.bf16.msra.mxu1 %v5176_v25  ;;  %3720 = vmatpush1.bf16.msra.mxu0 %v5179_v44 }
 0xb33   : > { %3635 = vmatprep.subr.bf16.mxu1 %v5184_v3  ;;  %3721 = vmatprep.subr.bf16.mxu0 %v5187_v4 }
 0xb36   : > { %3636 = vmatpush1.bf16.msra.mxu1 %v5182_v43  ;;  %3722 = vmatpush1.bf16.msra.mxu0 %v5185_v45 }
 0xb37   : > { %3637 = vmatprep.subr.bf16.mxu1 %v5190_v47  ;;  %3723 = vmatprep.subr.bf16.mxu0 %v5193_v11 }
 0xb3a   : > { %3638 = vmatpush1.bf16.msra.mxu1 %v5188_v56  ;;  %3724 = vmatpush1.bf16.msra.mxu0 %v5191_v10 }
 0xb3b   : > { %3639 = vmatprep.subr.bf16.mxu1 %v5196_v55  ;;  %3725 = vmatprep.subr.bf16.mxu0 %v5199_v61 }
 0xb3e   : > { %3640 = vmatpush1.bf16.msra.mxu1 %v5194_v34  ;;  %3726 = vmatpush1.bf16.msra.mxu0 %v5197_v53 }
 0xb3f   : > { %3641 = vmatprep.subr.bf16.mxu1 %v5202_v50  ;;  %3727 = vmatprep.subr.bf16.mxu0 %v5205_v59 }
 0xb42   : > { %3642 = vmatpush1.bf16.msra.mxu1 %v5200_v15  ;;  %3728 = vmatpush1.bf16.msra.mxu0 %v5203_v7 }
 0xb43   : > { %3643 = vmatprep.subr.bf16.mxu1 %v5208_v14  ;;  %3729 = vmatprep.subr.bf16.mxu0 %v5211_v18 }
 0xb46   : > { %3644 = vmatpush1.bf16.msra.mxu1 %v5206_v36  ;;  %3730 = vmatpush1.bf16.msra.mxu0 %v5209_v12 }
 0xb49   : > { %3646 = vmatmul.mubr.bf16.vlgmr.msra.gmra.mrb[44].mxu1 %v6348_v60  ;;  %3732 = vmatmul.mubr.bf16.vlgmr.msra.gmra.mrb[44].mxu0 %v6348_v60 }
 0xc1c   : > { %v3647_v39 = vpop.f32.mrb[44].mxu1  ;;  %v3733_v40 = vpop.f32.mrb[44].mxu0 }
 0xc1d   : > { %v4715_v41 = vadd.f32 %v3647_v39, %v2913_v16  ;;  %v4719_v60 = vadd.f32 %v3733_v40, %v2921_v17  ;;  %v3649_v42 = vpop.f32.mrb[45].mxu1  ;;  %v3735_v0 = vpop.f32.mrb[45].mxu0 }
 0xc1e   : > { %v4716_v46 = vadd.f32 %v3649_v42, %v2917_v37  ;;  %v4720_v2 = vadd.f32 %v3735_v0, %v2925_v38  ;;  %v3651_v48 = vpop.f32.mrb[46].mxu1  ;;  %v3737_v24 = vpop.f32.mrb[46].mxu0 }
 0xc1f   : > { %3742 = vst [vmem:[%s654_s28] sm:$0xff] %v4715_v41  ;;  %3744 = vst [vmem:[%s654_s28 + $0x10] sm:$0xff] %v4719_v60  ;;  %v4717_v8 = vadd.f32 %v3651_v48, %v2913_v16  ;;  %v4721_v5 = vadd.f32 %v3737_v24, %v2921_v17  ;;  %v3653_v1 = vpop.f32.mrb[47].mxu1  ;;  %v3739_v13 = vpop.f32.mrb[47].mxu0 }
 0xc20   : > { %3743 = vst [vmem:[%s654_s28 + $0x8] sm:$0xff] %v4716_v46  ;;  %3745 = vst [vmem:[%s654_s28 + $0x18] sm:$0xff] %v4720_v2  ;;  %v4718_v49 = vadd.f32 %v3653_v1, %v2917_v37  ;;  %v4722_v29 = vadd.f32 %v3739_v13, %v2925_v38 }
 0xc21   : > { %3746 = vst [vmem:[%s654_s28 + $0x20] sm:$0xff] %v4717_v8  ;;  %3748 = vst [vmem:[%s654_s28 + $0x30] sm:$0xff] %v4721_v5 }
 0xc22   : > { %3747 = vst [vmem:[%s654_s28 + $0x28] sm:$0xff] %v4718_v49  ;;  %3749 = vst [vmem:[%s654_s28 + $0x38] sm:$0xff] %v4722_v29 }
 0xc23 PF: > { %p30_p3 = scmp.ge.s32.totalorder %s5825_s13, 6   ;;  %s6435_s25 = smov %s5518_s26 }
 0xc24   : > { %s6436_s26 = smov %s5522_s27  ;;  %s6437_s27 = smov %s5836_s23 }
 0xc25   : > { %s6438_s28 = smov %s5825_s13  ;;  %32 = sbr.rel (!%p30_p3) target bundleno = 16 (0x10), region = 171 }
 0xc2c   :  { %3787 = vsyncpa [#allocation3], 1 }
 0xc2d   :  { %3789 = vsyncpa [#allocation3 + $0x1], 1 }
 0xc2e   :  { %3790 = vsyncpa [#allocation5], 1 }
 0xc2f   :  { %3792 = vsyncpa [#allocation5 + $0x1], 1 }
 0xc30   :  { %3793 = vsyncpa [#allocation8], 1 }
 0xc31   :  { %3794 = vsyncpa [#allocation11], 1 }
 0xc32   :  { %3795 = vsyncpa [#allocation14], 1 }

</bundles_post_ra>
